<compile_context>
chip_gen: v6e
topology: v6e:2x2x1
jax: 0.10.0
libtpu: 0.0.40
codegen_flags: <defaults>
</compile_context>

<pallas_src>
import jax
import jax.numpy as jnp
from jax import lax
from jax.experimental import pallas as pl
from jax.experimental.pallas import tpu as pltpu

# ---- static model dimensions ----
NUM_CLASS = 10
C_OUT = 32
KH = KW = 3
POOL = 4
# fc1 expects 864 = 32 * 3 * 9 flattened features -> choose input 1 x 14 x 38:
#   conv(3x3, stride 1, valid): 14x38 -> 12x36 ; maxpool(4): 12x36 -> 3x9
N = 2
H_IN, W_IN = 14, 38
H_CONV, W_CONV = H_IN - KH + 1, W_IN - KW + 1        # 12, 36
H_P, W_P = H_CONV // POOL, W_CONV // POOL            # 3, 9
NPOS = H_P * W_P                                     # 27 pooled positions
FEAT = C_OUT * NPOS                                  # 864
LANES = 128                                          # padded class dim (lane-dense store)
BN_EPS = 1e-5
TERN_THRESH = 0.5   # TODO(synk): TerneryHardTanh class not provided; assume hardtanh
                    # followed by ternarization to {-1,0,+1} with |x| <= 0.5 -> 0.


def _ternary(y):
    return jnp.where(y > TERN_THRESH, 1.0,
                     jnp.where(y < -TERN_THRESH, -1.0, 0.0)).astype(jnp.float32)


def _binarize(w):
    # TODO(synk): Binary{Conv2d,Linear} definitions not provided; assume weight
    # binarization w -> sign(w) with sign(0) = +1, full-precision bias.
    return jnp.where(w >= 0, 1.0, -1.0).astype(jnp.float32)


def net_kernel(patches_ref, wk_ref, scale_ref, shift_ref, tmat_ref, sel_ref,
               wfc_ref, bfc_ref, out_ref):
    """Whole batch in one grid step, channels-on-sublanes layout.

    patches_ref : (9, 16*nb*27)  im2col taps; lane = q*(nb*27) + n*27 + ip*9 + jp
    wk_ref      : (32, 9)        binarized conv weight, tap t = dy*3 + dx
    scale_ref   : (32, 1)        folded BN scale  gamma/sqrt(var+eps)
    shift_ref   : (32, 1)        folded BN shift  (conv_bias-mean)*scale+beta
    tmat_ref    : (27, 864)      [I27 I27 ... I27] lane-replication matrix
    sel_ref     : (32, 864)      sel[c, f] = 1 if f // 27 == c else 0
    wfc_ref     : (864, 128)     binarized FC weight, torch flatten order, 0-padded
    bfc_ref     : (1, 128)       FC bias, 0-padded
    out_ref     : (nb, 128)      logits (columns >= NUM_CLASS are zero padding)
    """
    nb = out_ref.shape[0]
    chunk = nb * NPOS

    # BinaryConv2d (in_channels=1): 9 broadcast MACs on the VPU (exact in f32),
    # channels on sublanes, spatial*batch lane-dense.
    px = patches_ref[...]                               # (9, 16*chunk)
    wk = wk_ref[...]                                    # (32, 9)
    acc = wk[:, 0:1] * px[0:1, :]                       # (32, 16*chunk)
    for t in range(1, KH * KW):
        acc = acc + wk[:, t:t + 1] * px[t:t + 1, :]

    # BatchNorm2d (inference running-stats semantics, folded) + TerneryHardTanh.
    # TODO(synk): training-mode batch-statistics BN not implemented.
    y = acc * scale_ref[...] + shift_ref[...]
    t3 = _ternary(y)

    # MaxPool2d(4): the 16 in-window offsets live in 16 contiguous lane chunks.
    pooled = t3[:, 0:chunk]
    for q in range(1, POOL * POOL):
        pooled = jnp.maximum(pooled, t3[:, q * chunk:(q + 1) * chunk])  # (32, nb*27)

    # Flatten (torch (C,H,W) order) + BinaryLinear, per batch element:
    #   rep[c, f] = pooled_n[c, f % 27]   (MXU replication; ternary x {0,1} -> exact)
    #   flat[f]   = rep[f // 27, f]       (mask + cross-sublane sum)
    #   logits    = flat @ wfc + b        (one lane-dense MXU matmul)
    tmat = tmat_ref[...]
    sel = sel_ref[...]
    wfc = wfc_ref[...]
    bfc = bfc_ref[...]
    for n in range(nb):
        pn = pooled[:, n * NPOS:(n + 1) * NPOS]                           # (32, 27)
        rep = jnp.dot(pn, tmat, preferred_element_type=jnp.float32)       # (32, 864)
        flat = jnp.sum(rep * sel, axis=0, keepdims=True)                  # (1, 864)
        logits = jnp.dot(flat, wfc, preferred_element_type=jnp.float32) + bfc
        out_ref[pl.ds(n, 1), :] = logits                                  # (1, 128)


def _im2col(x_nchw):
    """(nb,1,14,38) -> (9, 16*nb*27) tap matrix in pool-friendly lane order."""
    xs = x_nchw[:, 0]                                   # (nb, 14, 38)
    taps = []
    for dy in range(KH):
        for dx in range(KW):
            offs = []
            for iw in range(POOL):
                for jw in range(POOL):
                    sl = xs[:, dy + iw::POOL, dx + jw::POOL][:, :H_P, :W_P]  # (nb,3,9)
                    offs.append(sl)
            taps.append(jnp.stack(offs, axis=0))        # (16, nb, 3, 9)
    pat = jnp.stack(taps, axis=0)                       # (9, 16, nb, 3, 9)
    return pat.reshape(KH * KW, POOL * POOL * xs.shape[0] * NPOS)


def net_forward(x_nchw, packed_params):
    """x_nchw: (nb, 1, H_IN, W_IN) float32 -> logits (nb, NUM_CLASS) float32."""
    wk, scale, shift, tmat, sel, wfc, bfc = packed_params
    nb = x_nchw.shape[0]
    patches = _im2col(x_nchw)                           # (9, 16*nb*27)
    out = pl.pallas_call(
        net_kernel,
        out_shape=jax.ShapeDtypeStruct((nb, LANES), jnp.float32),
        grid_spec=pltpu.PrefetchScalarGridSpec(
            num_scalar_prefetch=0,
            grid=(1,),
            in_specs=[
                pl.BlockSpec(patches.shape, lambda i: (0, 0)),
                pl.BlockSpec((C_OUT, KH * KW), lambda i: (0, 0)),
                pl.BlockSpec((C_OUT, 1), lambda i: (0, 0)),
                pl.BlockSpec((C_OUT, 1), lambda i: (0, 0)),
                pl.BlockSpec((NPOS, FEAT), lambda i: (0, 0)),
                pl.BlockSpec((C_OUT, FEAT), lambda i: (0, 0)),
                pl.BlockSpec((FEAT, LANES), lambda i: (0, 0)),
                pl.BlockSpec((1, LANES), lambda i: (0, 0)),
            ],
            out_specs=pl.BlockSpec((nb, LANES), lambda i: (0, 0)),
        ),
        compiler_params=pltpu.CompilerParams(dimension_semantics=("arbitrary",)),
    )(patches, wk, scale, shift, tmat, sel, wfc, bfc)
    return out[:, :NUM_CLASS]


def init_params(key):
    ks = jax.random.split(key, 8)
    return dict(
        conv_w=0.1 * jax.random.normal(ks[0], (C_OUT, 1, KH, KW), jnp.float32),
        conv_b=0.1 * jax.random.normal(ks[1], (C_OUT,), jnp.float32),
        bn_gamma=1.0 + 0.1 * jax.random.normal(ks[2], (C_OUT,), jnp.float32),
        bn_beta=0.1 * jax.random.normal(ks[3], (C_OUT,), jnp.float32),
        bn_mean=0.5 * jax.random.normal(ks[4], (C_OUT,), jnp.float32),
        bn_var=1.0 + 0.5 * jax.random.uniform(ks[5], (C_OUT,), jnp.float32),
        fc_w=0.1 * jax.random.normal(ks[6], (NUM_CLASS, FEAT), jnp.float32),
        fc_b=0.1 * jax.random.normal(ks[7], (NUM_CLASS,), jnp.float32),
    )


def pack_params(p):
    """Binarize weights, fold BN (+conv bias), build kernel-layout constants."""
    wb = _binarize(p["conv_w"])                                  # (32,1,3,3)
    wk = wb[:, 0].reshape(C_OUT, KH * KW)                        # (32, 9), t = dy*3+dx
    inv_std = 1.0 / jnp.sqrt(p["bn_var"] + BN_EPS)
    scale = p["bn_gamma"] * inv_std                              # (32,)
    shift = (p["conv_b"] - p["bn_mean"]) * scale + p["bn_beta"]  # (32,)
    # flatten helpers: rep[c, f] = pn[c, f % 27]; keep only rows where f//27 == c.
    tmat = jnp.tile(jnp.eye(NPOS, dtype=jnp.float32), (1, C_OUT))            # (27, 864)
    sel = (jnp.arange(FEAT)[None, :] // NPOS ==
           jnp.arange(C_OUT)[:, None]).astype(jnp.float32)                   # (32, 864)
    # FC weight (10, 864) already in torch flatten (c, h, w) order -> (864, 128) padded.
    wfc = jnp.zeros((FEAT, LANES), jnp.float32).at[:, :NUM_CLASS].set(
        _binarize(p["fc_w"]).T)
    bfc = jnp.zeros((1, LANES), jnp.float32).at[0, :NUM_CLASS].set(p["fc_b"])
    return (wk, scale.reshape(C_OUT, 1), shift.reshape(C_OUT, 1),
            tmat, sel, wfc, bfc)


def reference_forward(x_nchw, p):
    """Pure-JAX NCHW reference mirroring the PyTorch forward (for self-check)."""
    wb = _binarize(p["conv_w"])                                  # (32,1,3,3)
    inv_std = 1.0 / jnp.sqrt(p["bn_var"] + BN_EPS)
    scale = p["bn_gamma"] * inv_std
    shift = (p["conv_b"] - p["bn_mean"]) * scale + p["bn_beta"]
    conv = jnp.zeros((x_nchw.shape[0], C_OUT, H_CONV, W_CONV), jnp.float32)
    for dy in range(KH):
        for dx in range(KW):
            w_tap = wb[:, 0, dy, dx][None, :, None, None]        # (1,32,1,1)
            conv = conv + x_nchw[:, :, dy:dy + H_CONV, dx:dx + W_CONV] * w_tap
    y = conv * scale[None, :, None, None] + shift[None, :, None, None]
    t = _ternary(y)
    pooled = lax.reduce_window(t, -jnp.inf, lax.max,
                               window_dimensions=(1, 1, POOL, POOL),
                               window_strides=(1, 1, POOL, POOL),
                               padding="VALID")                  # (N,32,3,9)
    flat = pooled.reshape(pooled.shape[0], -1)                   # torch.flatten(x, 1)
    return flat @ _binarize(p["fc_w"]).T + p["fc_b"]


if __name__ == "__main__":
    key = jax.random.PRNGKey(0)
    kx, kp = jax.random.split(key)
    x = jax.random.normal(kx, (N, 1, H_IN, W_IN), jnp.float32)   # NCHW, like PyTorch
    raw = init_params(kp)
    packed = pack_params(raw)

    out = jax.block_until_ready(net_forward(x, packed))
    assert out.shape == (N, NUM_CLASS) and out.dtype == jnp.float32

    ref = reference_forward(x, raw)
    if not jnp.allclose(out, ref, atol=1e-4, rtol=1e-4):
        raise AssertionError(
            f"mismatch vs reference: max abs diff {float(jnp.max(jnp.abs(out - ref)))}")
    print("KERNEL_OK")
</pallas_src>

<mosaic_0001>
module attributes {stable_mosaic.version = 11 : i64} {
  func.func @net_kernel(%arg0: i32, %arg1: memref<9x864xf32, #tpu.memory_space<vmem>>, %arg2: memref<32x9xf32, #tpu.memory_space<vmem>>, %arg3: memref<32x1xf32, #tpu.memory_space<vmem>>, %arg4: memref<32x1xf32, #tpu.memory_space<vmem>>, %arg5: memref<27x864xf32, #tpu.memory_space<vmem>>, %arg6: memref<32x864xf32, #tpu.memory_space<vmem>>, %arg7: memref<864x128xf32, #tpu.memory_space<vmem>>, %arg8: memref<1x128xf32, #tpu.memory_space<vmem>>, %arg9: memref<2x128xf32, #tpu.memory_space<vmem>>) attributes {dimension_semantics = [#tpu.dimension_semantics<arbitrary>], iteration_bounds = array<i64: 1>, scalar_prefetch = 0 : i64, scratch_operands = 0 : i64, tpu.core_type = #tpu.core_type<tc>, window_params = [{pipeline_mode = #tpu.pipeline_mode<synchronous>, transform_indices = @transform_0, window_bounds = array<i64: 9, 864>}, {pipeline_mode = #tpu.pipeline_mode<synchronous>, transform_indices = @transform_1, window_bounds = array<i64: 32, 9>}, {pipeline_mode = #tpu.pipeline_mode<synchronous>, transform_indices = @transform_2, window_bounds = array<i64: 32, 1>}, {pipeline_mode = #tpu.pipeline_mode<synchronous>, transform_indices = @transform_3, window_bounds = array<i64: 32, 1>}, {pipeline_mode = #tpu.pipeline_mode<synchronous>, transform_indices = @transform_4, window_bounds = array<i64: 27, 864>}, {pipeline_mode = #tpu.pipeline_mode<synchronous>, transform_indices = @transform_5, window_bounds = array<i64: 32, 864>}, {pipeline_mode = #tpu.pipeline_mode<synchronous>, transform_indices = @transform_6, window_bounds = array<i64: 864, 128>}, {pipeline_mode = #tpu.pipeline_mode<synchronous>, transform_indices = @transform_7, window_bounds = array<i64: 1, 128>}, {pipeline_mode = #tpu.pipeline_mode<synchronous>, transform_indices = @transform_8, window_bounds = array<i64: 2, 128>}]} {
    %c0 = arith.constant 0 : index
    %c0_0 = arith.constant 0 : index
    %0 = vector.load %arg1[%c0, %c0_0] : memref<9x864xf32, #tpu.memory_space<vmem>>, vector<9x864xf32>
    %c0_1 = arith.constant 0 : index
    %c0_2 = arith.constant 0 : index
    %1 = vector.load %arg2[%c0_1, %c0_2] : memref<32x9xf32, #tpu.memory_space<vmem>>, vector<32x9xf32>
    %2 = vector.extract_strided_slice %1 {offsets = [0, 0], sizes = [32, 1], strides = [1, 1]} : vector<32x9xf32> to vector<32x1xf32>
    %3 = vector.extract_strided_slice %0 {offsets = [0, 0], sizes = [1, 864], strides = [1, 1]} : vector<9x864xf32> to vector<1x864xf32>
    %4 = vector.broadcast %2 : vector<32x1xf32> to vector<32x864xf32>
    %5 = vector.broadcast %3 : vector<1x864xf32> to vector<32x864xf32>
    %6 = arith.mulf %4, %5 : vector<32x864xf32>
    %7 = vector.extract_strided_slice %1 {offsets = [0, 1], sizes = [32, 1], strides = [1, 1]} : vector<32x9xf32> to vector<32x1xf32>
    %8 = vector.extract_strided_slice %0 {offsets = [1, 0], sizes = [1, 864], strides = [1, 1]} : vector<9x864xf32> to vector<1x864xf32>
    %9 = vector.broadcast %7 : vector<32x1xf32> to vector<32x864xf32>
    %10 = vector.broadcast %8 : vector<1x864xf32> to vector<32x864xf32>
    %11 = arith.mulf %9, %10 : vector<32x864xf32>
    %12 = arith.addf %6, %11 : vector<32x864xf32>
    %13 = vector.extract_strided_slice %1 {offsets = [0, 2], sizes = [32, 1], strides = [1, 1]} : vector<32x9xf32> to vector<32x1xf32>
    %14 = vector.extract_strided_slice %0 {offsets = [2, 0], sizes = [1, 864], strides = [1, 1]} : vector<9x864xf32> to vector<1x864xf32>
    %15 = vector.broadcast %13 : vector<32x1xf32> to vector<32x864xf32>
    %16 = vector.broadcast %14 : vector<1x864xf32> to vector<32x864xf32>
    %17 = arith.mulf %15, %16 : vector<32x864xf32>
    %18 = arith.addf %12, %17 : vector<32x864xf32>
    %19 = vector.extract_strided_slice %1 {offsets = [0, 3], sizes = [32, 1], strides = [1, 1]} : vector<32x9xf32> to vector<32x1xf32>
    %20 = vector.extract_strided_slice %0 {offsets = [3, 0], sizes = [1, 864], strides = [1, 1]} : vector<9x864xf32> to vector<1x864xf32>
    %21 = vector.broadcast %19 : vector<32x1xf32> to vector<32x864xf32>
    %22 = vector.broadcast %20 : vector<1x864xf32> to vector<32x864xf32>
    %23 = arith.mulf %21, %22 : vector<32x864xf32>
    %24 = arith.addf %18, %23 : vector<32x864xf32>
    %25 = vector.extract_strided_slice %1 {offsets = [0, 4], sizes = [32, 1], strides = [1, 1]} : vector<32x9xf32> to vector<32x1xf32>
    %26 = vector.extract_strided_slice %0 {offsets = [4, 0], sizes = [1, 864], strides = [1, 1]} : vector<9x864xf32> to vector<1x864xf32>
    %27 = vector.broadcast %25 : vector<32x1xf32> to vector<32x864xf32>
    %28 = vector.broadcast %26 : vector<1x864xf32> to vector<32x864xf32>
    %29 = arith.mulf %27, %28 : vector<32x864xf32>
    %30 = arith.addf %24, %29 : vector<32x864xf32>
    %31 = vector.extract_strided_slice %1 {offsets = [0, 5], sizes = [32, 1], strides = [1, 1]} : vector<32x9xf32> to vector<32x1xf32>
    %32 = vector.extract_strided_slice %0 {offsets = [5, 0], sizes = [1, 864], strides = [1, 1]} : vector<9x864xf32> to vector<1x864xf32>
    %33 = vector.broadcast %31 : vector<32x1xf32> to vector<32x864xf32>
    %34 = vector.broadcast %32 : vector<1x864xf32> to vector<32x864xf32>
    %35 = arith.mulf %33, %34 : vector<32x864xf32>
    %36 = arith.addf %30, %35 : vector<32x864xf32>
    %37 = vector.extract_strided_slice %1 {offsets = [0, 6], sizes = [32, 1], strides = [1, 1]} : vector<32x9xf32> to vector<32x1xf32>
    %38 = vector.extract_strided_slice %0 {offsets = [6, 0], sizes = [1, 864], strides = [1, 1]} : vector<9x864xf32> to vector<1x864xf32>
    %39 = vector.broadcast %37 : vector<32x1xf32> to vector<32x864xf32>
    %40 = vector.broadcast %38 : vector<1x864xf32> to vector<32x864xf32>
    %41 = arith.mulf %39, %40 : vector<32x864xf32>
    %42 = arith.addf %36, %41 : vector<32x864xf32>
    %43 = vector.extract_strided_slice %1 {offsets = [0, 7], sizes = [32, 1], strides = [1, 1]} : vector<32x9xf32> to vector<32x1xf32>
    %44 = vector.extract_strided_slice %0 {offsets = [7, 0], sizes = [1, 864], strides = [1, 1]} : vector<9x864xf32> to vector<1x864xf32>
    %45 = vector.broadcast %43 : vector<32x1xf32> to vector<32x864xf32>
    %46 = vector.broadcast %44 : vector<1x864xf32> to vector<32x864xf32>
    %47 = arith.mulf %45, %46 : vector<32x864xf32>
    %48 = arith.addf %42, %47 : vector<32x864xf32>
    %49 = vector.extract_strided_slice %1 {offsets = [0, 8], sizes = [32, 1], strides = [1, 1]} : vector<32x9xf32> to vector<32x1xf32>
    %50 = vector.extract_strided_slice %0 {offsets = [8, 0], sizes = [1, 864], strides = [1, 1]} : vector<9x864xf32> to vector<1x864xf32>
    %51 = vector.broadcast %49 : vector<32x1xf32> to vector<32x864xf32>
    %52 = vector.broadcast %50 : vector<1x864xf32> to vector<32x864xf32>
    %53 = arith.mulf %51, %52 : vector<32x864xf32>
    %54 = arith.addf %48, %53 : vector<32x864xf32>
    %c0_3 = arith.constant 0 : index
    %c0_4 = arith.constant 0 : index
    %55 = vector.load %arg3[%c0_3, %c0_4] : memref<32x1xf32, #tpu.memory_space<vmem>>, vector<32x1xf32>
    %56 = vector.broadcast %55 : vector<32x1xf32> to vector<32x864xf32>
    %57 = arith.mulf %54, %56 : vector<32x864xf32>
    %c0_5 = arith.constant 0 : index
    %c0_6 = arith.constant 0 : index
    %58 = vector.load %arg4[%c0_5, %c0_6] : memref<32x1xf32, #tpu.memory_space<vmem>>, vector<32x1xf32>
    %59 = vector.broadcast %58 : vector<32x1xf32> to vector<32x864xf32>
    %60 = arith.addf %57, %59 : vector<32x864xf32>
    %cst = arith.constant 5.000000e-01 : f32
    %61 = vector.broadcast %cst : f32 to vector<32x864xf32>
    %62 = arith.cmpf ogt, %60, %61 : vector<32x864xf32>
    %cst_7 = arith.constant -5.000000e-01 : f32
    %63 = vector.broadcast %cst_7 : f32 to vector<32x864xf32>
    %64 = arith.cmpf olt, %60, %63 : vector<32x864xf32>
    %cst_8 = arith.constant -1.000000e+00 : f32
    %cst_9 = arith.constant 0.000000e+00 : f32
    %65 = vector.broadcast %cst_8 : f32 to vector<32x864xf32>
    %66 = vector.broadcast %cst_9 : f32 to vector<32x864xf32>
    %67 = arith.select %64, %65, %66 : vector<32x864xi1>, vector<32x864xf32>
    %cst_10 = arith.constant 1.000000e+00 : f32
    %68 = vector.broadcast %cst_10 : f32 to vector<32x864xf32>
    %69 = arith.select %62, %68, %67 : vector<32x864xi1>, vector<32x864xf32>
    %70 = vector.extract_strided_slice %69 {offsets = [0, 0], sizes = [32, 54], strides = [1, 1]} : vector<32x864xf32> to vector<32x54xf32>
    %71 = vector.extract_strided_slice %69 {offsets = [0, 54], sizes = [32, 54], strides = [1, 1]} : vector<32x864xf32> to vector<32x54xf32>
    %72 = arith.maximumf %70, %71 : vector<32x54xf32>
    %73 = vector.extract_strided_slice %69 {offsets = [0, 108], sizes = [32, 54], strides = [1, 1]} : vector<32x864xf32> to vector<32x54xf32>
    %74 = arith.maximumf %72, %73 : vector<32x54xf32>
    %75 = vector.extract_strided_slice %69 {offsets = [0, 162], sizes = [32, 54], strides = [1, 1]} : vector<32x864xf32> to vector<32x54xf32>
    %76 = arith.maximumf %74, %75 : vector<32x54xf32>
    %77 = vector.extract_strided_slice %69 {offsets = [0, 216], sizes = [32, 54], strides = [1, 1]} : vector<32x864xf32> to vector<32x54xf32>
    %78 = arith.maximumf %76, %77 : vector<32x54xf32>
    %79 = vector.extract_strided_slice %69 {offsets = [0, 270], sizes = [32, 54], strides = [1, 1]} : vector<32x864xf32> to vector<32x54xf32>
    %80 = arith.maximumf %78, %79 : vector<32x54xf32>
    %81 = vector.extract_strided_slice %69 {offsets = [0, 324], sizes = [32, 54], strides = [1, 1]} : vector<32x864xf32> to vector<32x54xf32>
    %82 = arith.maximumf %80, %81 : vector<32x54xf32>
    %83 = vector.extract_strided_slice %69 {offsets = [0, 378], sizes = [32, 54], strides = [1, 1]} : vector<32x864xf32> to vector<32x54xf32>
    %84 = arith.maximumf %82, %83 : vector<32x54xf32>
    %85 = vector.extract_strided_slice %69 {offsets = [0, 432], sizes = [32, 54], strides = [1, 1]} : vector<32x864xf32> to vector<32x54xf32>
    %86 = arith.maximumf %84, %85 : vector<32x54xf32>
    %87 = vector.extract_strided_slice %69 {offsets = [0, 486], sizes = [32, 54], strides = [1, 1]} : vector<32x864xf32> to vector<32x54xf32>
    %88 = arith.maximumf %86, %87 : vector<32x54xf32>
    %89 = vector.extract_strided_slice %69 {offsets = [0, 540], sizes = [32, 54], strides = [1, 1]} : vector<32x864xf32> to vector<32x54xf32>
    %90 = arith.maximumf %88, %89 : vector<32x54xf32>
    %91 = vector.extract_strided_slice %69 {offsets = [0, 594], sizes = [32, 54], strides = [1, 1]} : vector<32x864xf32> to vector<32x54xf32>
    %92 = arith.maximumf %90, %91 : vector<32x54xf32>
    %93 = vector.extract_strided_slice %69 {offsets = [0, 648], sizes = [32, 54], strides = [1, 1]} : vector<32x864xf32> to vector<32x54xf32>
    %94 = arith.maximumf %92, %93 : vector<32x54xf32>
    %95 = vector.extract_strided_slice %69 {offsets = [0, 702], sizes = [32, 54], strides = [1, 1]} : vector<32x864xf32> to vector<32x54xf32>
    %96 = arith.maximumf %94, %95 : vector<32x54xf32>
    %97 = vector.extract_strided_slice %69 {offsets = [0, 756], sizes = [32, 54], strides = [1, 1]} : vector<32x864xf32> to vector<32x54xf32>
    %98 = arith.maximumf %96, %97 : vector<32x54xf32>
    %99 = vector.extract_strided_slice %69 {offsets = [0, 810], sizes = [32, 54], strides = [1, 1]} : vector<32x864xf32> to vector<32x54xf32>
    %100 = arith.maximumf %98, %99 : vector<32x54xf32>
    %c0_11 = arith.constant 0 : index
    %c0_12 = arith.constant 0 : index
    %101 = vector.load %arg5[%c0_11, %c0_12] : memref<27x864xf32, #tpu.memory_space<vmem>>, vector<27x864xf32>
    %c0_13 = arith.constant 0 : index
    %c0_14 = arith.constant 0 : index
    %102 = vector.load %arg6[%c0_13, %c0_14] : memref<32x864xf32, #tpu.memory_space<vmem>>, vector<32x864xf32>
    %c0_15 = arith.constant 0 : index
    %c0_16 = arith.constant 0 : index
    %103 = vector.load %arg7[%c0_15, %c0_16] : memref<864x128xf32, #tpu.memory_space<vmem>>, vector<864x128xf32>
    %c0_17 = arith.constant 0 : index
    %c0_18 = arith.constant 0 : index
    %104 = vector.load %arg8[%c0_17, %c0_18] : memref<1x128xf32, #tpu.memory_space<vmem>>, vector<1x128xf32>
    %105 = vector.extract_strided_slice %100 {offsets = [0, 0], sizes = [32, 27], strides = [1, 1]} : vector<32x54xf32> to vector<32x27xf32>
    %cst_19 = arith.constant dense<0.000000e+00> : vector<32x864xf32>
    %106 = tpu.matmul %105, %101, %cst_19 {dimension_numbers = #tpu.dot_dimension_numbers<[1], [0], [0], [1], [0, 0, 1, 1], [], []>} : vector<32x27xf32>, vector<27x864xf32>, vector<32x864xf32> -> vector<32x864xf32>
    %107 = arith.mulf %106, %102 : vector<32x864xf32>
    %cst_20 = arith.constant dense<0.000000e+00> : vector<864xf32>
    %108 = vector.multi_reduction <add>, %107, %cst_20 [0] : vector<32x864xf32> to vector<864xf32>
    %109 = vector.shape_cast %108 : vector<864xf32> to vector<1x864xf32>
    %cst_21 = arith.constant dense<0.000000e+00> : vector<1x128xf32>
    %110 = tpu.matmul %109, %103, %cst_21 {dimension_numbers = #tpu.dot_dimension_numbers<[1], [0], [0], [1], [0, 0, 1, 1], [], []>} : vector<1x864xf32>, vector<864x128xf32>, vector<1x128xf32> -> vector<1x128xf32>
    %111 = arith.addf %110, %104 : vector<1x128xf32>
    %c0_22 = arith.constant 0 : index
    %c0_23 = arith.constant 0 : index
    %112 = vector.load %arg9[%c0_22, %c0_23] : memref<2x128xf32, #tpu.memory_space<vmem>>, vector<1x128xf32>
    tpu.vector_store %arg9[%c0_22, %c0_23], %111 {strides = array<i32>} : memref<2x128xf32, #tpu.memory_space<vmem>>, vector<1x128xf32>,
    %113 = vector.extract_strided_slice %100 {offsets = [0, 27], sizes = [32, 27], strides = [1, 1]} : vector<32x54xf32> to vector<32x27xf32>
    %cst_24 = arith.constant dense<0.000000e+00> : vector<32x864xf32>
    %114 = tpu.matmul %113, %101, %cst_24 {dimension_numbers = #tpu.dot_dimension_numbers<[1], [0], [0], [1], [0, 0, 1, 1], [], []>} : vector<32x27xf32>, vector<27x864xf32>, vector<32x864xf32> -> vector<32x864xf32>
    %115 = arith.mulf %114, %102 : vector<32x864xf32>
    %cst_25 = arith.constant dense<0.000000e+00> : vector<864xf32>
    %116 = vector.multi_reduction <add>, %115, %cst_25 [0] : vector<32x864xf32> to vector<864xf32>
    %117 = vector.shape_cast %116 : vector<864xf32> to vector<1x864xf32>
    %cst_26 = arith.constant dense<0.000000e+00> : vector<1x128xf32>
    %118 = tpu.matmul %117, %103, %cst_26 {dimension_numbers = #tpu.dot_dimension_numbers<[1], [0], [0], [1], [0, 0, 1, 1], [], []>} : vector<1x864xf32>, vector<864x128xf32>, vector<1x128xf32> -> vector<1x128xf32>
    %119 = arith.addf %118, %104 : vector<1x128xf32>
    %c1 = arith.constant 1 : index
    %c0_27 = arith.constant 0 : index
    %120 = vector.load %arg9[%c1, %c0_27] : memref<2x128xf32, #tpu.memory_space<vmem>>, vector<1x128xf32>
    tpu.vector_store %arg9[%c1, %c0_27], %119 {strides = array<i32>} : memref<2x128xf32, #tpu.memory_space<vmem>>, vector<1x128xf32>,
    return
  }
  func.func @transform_0(%arg0: i32) -> (i32, i32) {
    %c0_i32 = arith.constant 0 : i32
    %c0_i32_0 = arith.constant 0 : i32
    %c0_i32_1 = arith.constant 0 : i32
    return %c0_i32, %c0_i32_0 : i32, i32
  }
  func.func @transform_1(%arg0: i32) -> (i32, i32) {
    %c0_i32 = arith.constant 0 : i32
    %c0_i32_0 = arith.constant 0 : i32
    %c0_i32_1 = arith.constant 0 : i32
    return %c0_i32, %c0_i32_0 : i32, i32
  }
  func.func @transform_2(%arg0: i32) -> (i32, i32) {
    %c0_i32 = arith.constant 0 : i32
    %c0_i32_0 = arith.constant 0 : i32
    %c0_i32_1 = arith.constant 0 : i32
    return %c0_i32, %c0_i32_0 : i32, i32
  }
  func.func @transform_3(%arg0: i32) -> (i32, i32) {
    %c0_i32 = arith.constant 0 : i32
    %c0_i32_0 = arith.constant 0 : i32
    %c0_i32_1 = arith.constant 0 : i32
    return %c0_i32, %c0_i32_0 : i32, i32
  }
  func.func @transform_4(%arg0: i32) -> (i32, i32) {
    %c0_i32 = arith.constant 0 : i32
    %c0_i32_0 = arith.constant 0 : i32
    %c0_i32_1 = arith.constant 0 : i32
    return %c0_i32, %c0_i32_0 : i32, i32
  }
  func.func @transform_5(%arg0: i32) -> (i32, i32) {
    %c0_i32 = arith.constant 0 : i32
    %c0_i32_0 = arith.constant 0 : i32
    %c0_i32_1 = arith.constant 0 : i32
    return %c0_i32, %c0_i32_0 : i32, i32
  }
  func.func @transform_6(%arg0: i32) -> (i32, i32) {
    %c0_i32 = arith.constant 0 : i32
    %c0_i32_0 = arith.constant 0 : i32
    %c0_i32_1 = arith.constant 0 : i32
    return %c0_i32, %c0_i32_0 : i32, i32
  }
  func.func @transform_7(%arg0: i32) -> (i32, i32) {
    %c0_i32 = arith.constant 0 : i32
    %c0_i32_0 = arith.constant 0 : i32
    %c0_i32_1 = arith.constant 0 : i32
    return %c0_i32, %c0_i32_0 : i32, i32
  }
  func.func @transform_8(%arg0: i32) -> (i32, i32) {
    %c0_i32 = arith.constant 0 : i32
    %c0_i32_0 = arith.constant 0 : i32
    %c0_i32_1 = arith.constant 0 : i32
    return %c0_i32, %c0_i32_0 : i32, i32
  }
}

</mosaic_0001>

<bundles_post_ra>
// kernel: tpu_custom_call.1
= control target key start
LH: loop header
LB: loop body
LE: loop exit
PB: predicated region body
PF: predicated region fallthrough
CT: control target
= control target key end

     0   :  { %13 = vsyncpa [#allocation3], 0  ;;  %s6320_s0 = inlined_call_operand.vmem [shape: f32[9,864], index: 0, kind: input, shape index: {}]   ;;  %s6321_s1 = inlined_call_operand.vmem [shape: f32[32,9], index: 1, kind: input, shape index: {}]   ;;  %s6322_s2 = inlined_call_operand.vmem [shape: f32[32,1], index: 2, kind: input, shape index: {}]   ;;  %s6323_s3 = inlined_call_operand.vmem [shape: f32[32,1], index: 3, kind: input, shape index: {}]   ;;  %s6324_s4 = inlined_call_operand.hbm [shape: f32[27,864], index: 4, kind: input, shape index: {}]   ;;  %s6325_s5 = inlined_call_operand.hbm [shape: f32[32,864], index: 5, kind: input, shape index: {}]   ;;  %s6326_s6 = inlined_call_operand.hbm [shape: f32[864,128], index: 6, kind: input, shape index: {}]   ;;  %s6327_s7 = inlined_call_operand.vmem [shape: f32[1,128], index: 7, kind: input, shape index: {}]   ;;  %s6328_s8 = inlined_call_operand.hbm [shape: f32[2,128], index: 8, kind: output, shape index: {}]  }
   0x1   :  { %14 = vsyncpa [#allocation6], 0 }
   0x2   :  { %15 = vsyncpa [#allocation4], 0  ;;  %s3999_s27 = smov [#allocation5]   ;;  %s4000_s29 = smov [#allocation2]  }
   0x3   :  { %s41_s28 = sshll.u32 %s3999_s27, 4  ;;  %s29_s30 = sshll.u32 %s4000_s29, 4  ;;  %s42_s28 = int_to_ptr.vmem [resolvable:$true] %s41_s28  ;;  %s30_s30 = int_to_ptr.vmem [resolvable:$true] %s29_s30 }
   0x4   :  { %s3921_s9 = scalar_lea.vmem %s42_s28, 3584  ;;  %p3926_p1 = scmp.lt.s32.totalorder %s42_s28, %s42_s28 }
   0x5   :  { %p3922_p0 = scmp.ne.s32.totalorder %s42_s28, %s3921_s9  ;;  %p3927_p2 = scmp.lt.s32.totalorder %s3921_s9, %s3921_s9 }
   0x7   :  { %p3928_p3 = por %p3927_p2, %p3926_p1 }
   0x9   :  { %p3929_p4 = pnand %p3928_p3, %p3922_p0 }
   0xb   :  { %3932 = shalt.err (!%p3929_p4)
}
   0xc   :  { %s4001_s10 = smov 896   ;;  %s4002_s11 = smov 56  }
   0xd   :  { %47 = dma.hbm_to_vmem [thread:$0]  %s6325_s5, 3584, %s42_s28, [#allocation6], %s4001_s10, %s4001_s10, %s4002_s11  }
   0xe   :  { %s3941_s14 = scalar_lea.vmem %s30_s30, 3584  ;;  %p3946_p6 = scmp.lt.s32.totalorder %s30_s30, %s30_s30 }
   0xf   :  { %p3942_p5 = scmp.ne.s32.totalorder %s30_s30, %s3941_s14  ;;  %p3947_p7 = scmp.lt.s32.totalorder %s3941_s14, %s3941_s14 }
  0x11   :  { %p3948_p8 = por %p3947_p7, %p3946_p6 }
  0x13   :  { %p3949_p9 = pnand %p3948_p8, %p3942_p5 }
  0x15   :  { %3952 = shalt.err (!%p3949_p9)
}
  0x16   :  { %35 = dma.hbm_to_vmem [thread:$0]  %s6324_s4, 3584, %s30_s30, [#allocation3], %s4001_s10, %s4001_s10, %s4002_s11  }
  0x17   :  { %s4003_s17 = smov [#allocation7]  }
  0x18   :  { %s53_s18 = sshll.u32 %s4003_s17, 4  ;;  %s54_s18 = int_to_ptr.vmem [resolvable:$true] %s53_s18 }
  0x19   :  { %s3961_s19 = scalar_lea.vmem %s54_s18, 13824  ;;  %p3966_p11 = scmp.lt.s32.totalorder %s54_s18, %s54_s18 }
  0x1a   :  { %p3962_p10 = scmp.ne.s32.totalorder %s54_s18, %s3961_s19  ;;  %p3967_p12 = scmp.lt.s32.totalorder %s3961_s19, %s3961_s19 }
  0x1c   :  { %p3968_p13 = por %p3967_p12, %p3966_p11 }
  0x1e   :  { %p3969_p0 = pnand %p3968_p13, %p3962_p10 }
  0x20   :  { %3972 = shalt.err (!%p3969_p0)
}
  0x21   :  { %s4004_s5 = smov 128   ;;  %s4005_s20 = smov 8  }
  0x22   :  { %59 = dma.hbm_to_vmem [thread:$0]  %s6326_s6, 13824, %s54_s18, [#allocation6], %s4004_s5, %s4004_s5, %s4005_s20  }
  0x23   :  { %3993 = dma.done.wait [#allocation3], 3584  }
  0x24   :  { %3994 = vsyncadd [#allocation3], 4294963712 }
  0x25   :  { %3995 = dma.done.wait [#allocation6], 17408  }
  0x26   :  { %3996 = vsyncadd [#allocation6], 4294949888  ;;  %v4006_v0 = vmov 2   ;;  %v6331_v1 = vmov 0   ;;  %v85_v2 = vld [vmem:[%s6321_s1] sm:$0xff]  ;;  %v4095_v3 = vld [vmem:[%s6321_s1 + $0x8] sm:$0xff]  ;;  %v109_v17 = vlaneseq }
  0x27   :  { %3648 = vset.pattern.permute.xlu1 %v4006_v0  ;;  %3646 = vset.pattern.permute.xlu0 %v6331_v1  ;;  %v4008_v4 = vmov 1   ;;  %v4102_v5 = vld [vmem:[%s6321_s1 + $0x10] sm:$0xff]  ;;  %v4009_v6 = vmov 5   ;;  %v4010_v7 = vmov 4   ;;  %v4011_v8 = vmov 6   ;;  %v4116_v10 = vld [vmem:[%s6321_s1 + $0x18] sm:$0xff] }
  0x28   :  { %266 = vperm.xlu1 %3648, %v85_v2   ;;  %91 = vperm.xlu0 %3646, %v85_v2   ;;  %v4012_v9 = vmov 3   ;;  %v4013_v11 = vmov 7   ;;  %v4014_v12 = vmov 8   ;;  %v1018_v13 = vld [vmem:[%s6323_s3 + $0x8] sm:$0xff]  ;;  %v1019_v14 = vld [vmem:[%s6323_s3 + $0x10] sm:$0xff]  ;;  %v1020_v15 = vld [vmem:[%s6323_s3 + $0x18] sm:$0xff] }
  0x29   :  { %v965_v16 = vld [vmem:[%s6322_s2] sm:$0xff]  ;;  %v4161_v19 = vshrl.u32 %v109_v17, 7  ;;  %v4175_v24 = vld [vmem:[%s6320_s0 + $0x8] sm:$0xff]  ;;  %v4180_v25 = vld [vmem:[%s6320_s0 + $0x10] sm:$0xff]  ;;  %v6329_v32 = vmov 0.0   ;;  %s4017_s5 = smov 74  }
  0x2a   :  { %v1017_v18 = vld [vmem:[%s6323_s3] sm:$0xff]  ;;  %v4185_v26 = vld [vmem:[%s6320_s0 + $0x18] sm:$0xff]  ;;  %v4196_v28 = vld [vmem:[%s6320_s0 + $0x28] sm:$0xff]  ;;  %1791 = vmatprep.mubr.f32.mxu0 %v6329_v32  ;;  %1880 = vmatprep.mubr.f32.mxu1 %v6329_v32  ;;  %s4016_s3 = smov 20   ;;  %s4018_s20 = smov 94  }
  0x2b   :  { %v283_v20 = vsub.s32 2, %v4161_v19  ;;  %v111_v21 = vsub.s32 0, %v4161_v19  ;;  %v4169_v22 = vld [vmem:[%s6320_s0] sm:$0xff]  ;;  %v183_v23 = vsub.s32 1, %v4161_v19  ;;  %v4202_v29 = vld [vmem:[%s6320_s0 + $0x30] sm:$0xff]  ;;  %v966_v37 = vld [vmem:[%s6322_s2 + $0x8] sm:$0xff] }
  0x2c   :  { %3649 = vset.pattern.permute.xlu1 %v6331_v1  ;;  %3647 = vset.pattern.permute.xlu0 %v4008_v4  ;;  %v4191_v27 = vld [vmem:[%s6320_s0 + $0x20] sm:$0xff]  ;;  %v583_v41 = vsub.s32 5, %v4161_v19  ;;  %v483_v49 = vsub.s32 4, %v4161_v19  ;;  %v683_v57 = vsub.s32 6, %v4161_v19  ;;  %s4019_s21 = smov 40   ;;  %s4020_s22 = smov 114  }
  0x2d   :  { %96 = vperm.xlu1 %3649, %v4095_v3   ;;  %166 = vperm.xlu0 %3647, %v85_v2   ;;  %v4205_v30 = vrot.slane %v4169_v22, %v283_v20  ;;  %v4208_v31 = vrot.slane %v4169_v22, %v111_v21  ;;  %v4212_v33 = vrot.slane %v4175_v24, %v283_v20  ;;  %s4021_s24 = smov 6   ;;  %s4023_s25 = smov 80  }
  0x2e   :  { %v4215_v34 = vrot.slane %v4180_v25, %v283_v20  ;;  %v4218_v35 = vrot.slane %v4185_v26, %v283_v20  ;;  %v4221_v36 = vrot.slane %v4169_v22, %v183_v23  ;;  %v4228_v38 = vrot.slane %v4191_v27, %v283_v20  ;;  %s4024_s6 = smov 26   ;;  %s4025_s26 = smov 100  }
  0x2f   :  { %6493 = vst [vmem:[#allocation12_spill] sm:$0xff] %v4208_v31  ;;  %v4231_v39 = vrot.slane %v4196_v28, %v283_v20  ;;  %v4234_v40 = vrot.slane %v4175_v24, %v111_v21  ;;  %v4238_v42 = vrot.slane %v4202_v29, %v283_v20  ;;  %v4241_v43 = vrot.slane %v4180_v25, %v111_v21  ;;  %s4026_s27 = smov 46   ;;  %s4027_s28 = smov 120  }
  0x30   :  { %6494 = vst [vmem:[#allocation13_spill] sm:$0xff] %v4221_v36  ;;  %v4244_v44 = vrot.slane %v4185_v26, %v111_v21  ;;  %v4247_v45 = vrot.slane %v4191_v27, %v111_v21  ;;  %v4251_v46 = vrot.slane %v4196_v28, %v111_v21  ;;  %v4254_v47 = vrot.slane %v4202_v29, %v111_v21  ;;  %s4028_s1 = smov 12   ;;  %s4029_s29 = smov 66  }
  0x31   :  { %3650 = vset.pattern.permute.xlu1 %v4008_v4  ;;  %3653 = vset.pattern.permute.xlu0 %v6331_v1  ;;  %6495 = vst [vmem:[#allocation14_spill] sm:$0xff] %v4234_v40  ;;  %6496 = vst [vmem:[#allocation15_spill] sm:$0xff] %v4241_v43  ;;  %v4257_v48 = vrot.slane %v4175_v24, %v183_v23  ;;  %v4261_v50 = vrot.slane %v4180_v25, %v183_v23  ;;  %s4030_s30 = smov 86  }
  0x32   :  { %170 = vperm.xlu1 %3650, %v4095_v3   ;;  %101 = vperm.xlu0 %3653, %v4102_v5   ;;  %6497 = vst [vmem:[#allocation16_spill] sm:$0xff] %v4244_v44  ;;  %6498 = vst [vmem:[#allocation17_spill] sm:$0xff] %v4247_v45  ;;  %v4264_v51 = vrot.slane %v4185_v26, %v183_v23  ;;  %v4267_v52 = vrot.slane %v4191_v27, %v183_v23 }
  0x33   :  { %6499 = vst [vmem:[#allocation18_spill] sm:$0xff] %v4251_v46  ;;  %6500 = vst [vmem:[#allocation19_spill] sm:$0xff] %v4254_v47  ;;  %v4270_v53 = vrot.slane %v4196_v28, %v183_v23  ;;  %v4273_v54 = vrot.slane %v4202_v29, %v183_v23  ;;  %v4276_v55 = vrot.slane %v4169_v22, %v583_v41 }
  0x34   :  { %6501 = vst [vmem:[#allocation20_spill] sm:$0xff] %v4257_v48  ;;  %6502 = vst [vmem:[#allocation21_spill] sm:$0xff] %v4261_v50  ;;  %v4279_v56 = vrot.slane %v4175_v24, %v583_v41  ;;  %v4283_v58 = vrot.slane %v4180_v25, %v583_v41  ;;  %v4286_v59 = vrot.slane %v4185_v26, %v583_v41 }
  0x35   :  { %6503 = vst [vmem:[#allocation22_spill] sm:$0xff] %v4264_v51  ;;  %6504 = vst [vmem:[#allocation23_spill] sm:$0xff] %v4267_v52  ;;  %v4289_v60 = vrot.slane %v4191_v27, %v583_v41  ;;  %v4292_v61 = vrot.slane %v4196_v28, %v583_v41  ;;  %v4295_v62 = vrot.slane %v4202_v29, %v583_v41 }
  0x36   :  { %3651 = vset.pattern.permute.xlu1 %v4006_v0  ;;  %3656 = vset.pattern.permute.xlu0 %v4009_v6  ;;  %6505 = vst [vmem:[#allocation24_spill] sm:$0xff] %v4270_v53  ;;  %6506 = vst [vmem:[#allocation25_spill] sm:$0xff] %v4273_v54  ;;  %v4298_v63 = vrot.slane %v4169_v22, %v483_v49  ;;  %v4341_v17 = vrot.slane %v4202_v29, %v683_v57 }
  0x37   :  { %270 = vperm.xlu1 %3651, %v4095_v3   ;;  %566 = vperm.xlu0 %3656, %v85_v2   ;;  %6507 = vst [vmem:[#allocation26_spill] sm:$0xff] %v4276_v55  ;;  %6508 = vst [vmem:[#allocation27_spill] sm:$0xff] %v4279_v56 }
  0x38   :  { %6509 = vst [vmem:[#allocation28_spill] sm:$0xff] %v4283_v58  ;;  %6510 = vst [vmem:[#allocation29_spill] sm:$0xff] %v4286_v59 }
  0x39   :  { %6511 = vst [vmem:[#allocation30_spill] sm:$0xff] %v4289_v60  ;;  %6512 = vst [vmem:[#allocation31_spill] sm:$0xff] %v4292_v61 }
  0x3a   :  { %6513 = vst [vmem:[#allocation32_spill] sm:$0xff] %v4295_v62  ;;  %6514 = vst [vmem:[#allocation33_spill] sm:$0xff] %v4298_v63 }
  0x3b   :  { %3652 = vset.pattern.permute.xlu1 %v4010_v7  ;;  %3659 = vset.pattern.permute.xlu0 %v4011_v8  ;;  %6527 = vst [vmem:[#allocation46_spill] sm:$0xff] %v4341_v17 }
  0x3c   :  { %466 = vperm.xlu1 %3652, %v85_v2   ;;  %666 = vperm.xlu0 %3659, %v85_v2  }
  0x40   :  { %3654 = vset.pattern.permute.xlu1 %v4008_v4  ;;  %3660 = vset.pattern.permute.xlu0 %v4012_v9 }
  0x41   :  { %174 = vperm.xlu1 %3654, %v4102_v5   ;;  %366 = vperm.xlu0 %3660, %v85_v2  }
  0x45   :  { %3655 = vset.pattern.permute.xlu1 %v4012_v9  ;;  %374 = vperm.xlu0 %3660, %v4102_v5  }
  0x46   :  { %370 = vperm.xlu1 %3655, %v4095_v3  }
  0x49   :  { %3665 = vset.pattern.permute.xlu0 %v4006_v0 }
  0x4a   :  { %3657 = vset.pattern.permute.xlu1 %v4006_v0  ;;  %278 = vperm.xlu0 %3665, %v4116_v10   ;;  %v4301_v0 = vrot.slane %v4175_v24, %v483_v49 }
  0x4b   :  { %274 = vperm.xlu1 %3657, %v4102_v5  }
  0x4c   :  { %6515 = vst [vmem:[#allocation34_spill] sm:$0xff] %v4301_v0 }
  0x4e   :  { %3670 = vset.pattern.permute.xlu0 %v4013_v11 }
  0x4f   :  { %3658 = vset.pattern.permute.xlu1 %v4010_v7  ;;  %770 = vperm.xlu0 %3670, %v4095_v3  }
  0x50   :  { %470 = vperm.xlu1 %3658, %v4095_v3  }
  0x53   :  { %774 = vperm.xlu0 %3670, %v4102_v5  }
  0x54   :  { %3661 = vset.pattern.permute.xlu1 %v6331_v1 }
  0x55   :  { %106 = vperm.xlu1 %3661, %v4116_v10  }
  0x57   :  { %3675 = vset.pattern.permute.xlu0 %v4014_v12 }
  0x58   :  { %866 = vperm.xlu0 %3675, %v85_v2  }
  0x59   :  { %3662 = vset.pattern.permute.xlu1 %v4008_v4  ;;  %v4309_v4 = vrot.slane %v4185_v26, %v483_v49 }
  0x5a   :  { %178 = vperm.xlu1 %3662, %v4116_v10  }
  0x5b   :  { %6517 = vst [vmem:[#allocation36_spill] sm:$0xff] %v4309_v4 }
  0x5c   :  { %870 = vperm.xlu0 %3675, %v4095_v3  }
  0x5e   :  { %3663 = vset.pattern.permute.xlu1 %v4009_v6 }
  0x5f   :  { %570 = vperm.xlu1 %3663, %v4095_v3  }
  0x60   :  { %874 = vperm.xlu0 %3675, %v4102_v5  }
  0x63   :  { %3664 = vset.pattern.permute.xlu1 %v4013_v11 }
  0x64   :  { %766 = vperm.xlu1 %3664, %v85_v2   ;;  %3680 = vset.pattern.permute.xlu0 %v6331_v1  ;;  %v383_v2 = vsub.s32 3, %v4161_v19 }
  0x65   :  { %1028 = vperm.xlu0 %3680, %v1018_v13   ;;  %v4329_v13 = vrot.slane %v4180_v25, %v683_v57 }
  0x66   :  { %v4350_v20 = vrot.slane %v4180_v25, %v383_v2  ;;  %v4356_v41 = vrot.slane %v4191_v27, %v383_v2 }
  0x67   :  { %6523 = vst [vmem:[#allocation42_spill] sm:$0xff] %v4329_v13 }
  0x68   :  { %3666 = vset.pattern.permute.xlu1 %v4010_v7  ;;  %6530 = vst [vmem:[#allocation49_spill] sm:$0xff] %v4350_v20  ;;  %6532 = vst [vmem:[#allocation51_spill] sm:$0xff] %v4356_v41 }
  0x69   :  { %474 = vperm.xlu1 %3666, %v4102_v5   ;;  %1033 = vperm.xlu0 %3680, %v1019_v14   ;;  %v4332_v14 = vrot.slane %v4185_v26, %v683_v57 }
  0x6b   :  { %6524 = vst [vmem:[#allocation43_spill] sm:$0xff] %v4332_v14 }
  0x6d   :  { %3667 = vset.pattern.permute.xlu1 %v4011_v8  ;;  %1038 = vperm.xlu0 %3680, %v1020_v15   ;;  %v4335_v15 = vrot.slane %v4191_v27, %v683_v57 }
  0x6e   :  { %670 = vperm.xlu1 %3667, %v4095_v3   ;;  %v4306_v3 = vrot.slane %v4180_v25, %v483_v49 }
  0x6f   :  { %6525 = vst [vmem:[#allocation44_spill] sm:$0xff] %v4335_v15 }
  0x70   :  { %6516 = vst [vmem:[#allocation35_spill] sm:$0xff] %v4306_v3 }
  0x72   :  { %3668 = vset.pattern.permute.xlu1 %v4012_v9  ;;  %v4325_v9 = vrot.slane %v4175_v24, %v683_v57 }
  0x73   :  { %378 = vperm.xlu1 %3668, %v4116_v10  }
  0x74   :  { %6522 = vst [vmem:[#allocation41_spill] sm:$0xff] %v4325_v9 }
  0x77   :  { %3669 = vset.pattern.permute.xlu1 %v4009_v6 }
  0x78   :  { %574 = vperm.xlu1 %3669, %v4102_v5  }
  0x7c   :  { %3671 = vset.pattern.permute.xlu1 %v4010_v7  ;;  %v4319_v7 = vrot.slane %v4202_v29, %v483_v49 }
  0x7d   :  { %478 = vperm.xlu1 %3671, %v4116_v10  }
  0x7e   :  { %6520 = vst [vmem:[#allocation39_spill] sm:$0xff] %v4319_v7 }
  0x81   :  { %3672 = vset.pattern.permute.xlu1 %v4011_v8 }
  0x82   :  { %674 = vperm.xlu1 %3672, %v4102_v5   ;;  %v4312_v5 = vrot.slane %v4191_v27, %v483_v49 }
  0x84   :  { %6518 = vst [vmem:[#allocation37_spill] sm:$0xff] %v4312_v5 }
  0x86   :  { %3673 = vset.pattern.permute.xlu1 %v6331_v1 }
  0x87   :  { %971 = vperm.xlu1 %3673, %v965_v16   ;;  %v4338_v16 = vrot.slane %v4196_v28, %v683_v57 }
  0x89   :  { %6526 = vst [vmem:[#allocation45_spill] sm:$0xff] %v4338_v16 }
  0x8b   :  { %3674 = vset.pattern.permute.xlu1 %v4009_v6  ;;  %v4315_v6 = vrot.slane %v4196_v28, %v483_v49  ;;  %v4359_v49 = vrot.slane %v4196_v28, %v383_v2 }
  0x8c   :  { %578 = vperm.xlu1 %3674, %v4116_v10  }
  0x8d   :  { %6519 = vst [vmem:[#allocation38_spill] sm:$0xff] %v4315_v6  ;;  %6533 = vst [vmem:[#allocation52_spill] sm:$0xff] %v4359_v49 }
  0x90   :  { %3676 = vset.pattern.permute.xlu1 %v6331_v1 }
  0x91   :  { %1023 = vperm.xlu1 %3676, %v1017_v18   ;;  %v4344_v18 = vrot.slane %v4169_v22, %v383_v2 }
  0x93   :  { %6528 = vst [vmem:[#allocation47_spill] sm:$0xff] %v4344_v18  ;;  %v6549_v18 = vmov 0  }
  0x95   :  { %3677 = vset.pattern.permute.xlu1 %v4011_v8  ;;  %v4322_v8 = vrot.slane %v4169_v22, %v683_v57  ;;  %v4362_v57 = vrot.slane %v4202_v29, %v383_v2 }
  0x96   :  { %678 = vperm.xlu1 %3677, %v4116_v10  }
  0x97   :  { %6521 = vst [vmem:[#allocation40_spill] sm:$0xff] %v4322_v8  ;;  %6534 = vst [vmem:[#allocation53_spill] sm:$0xff] %v4362_v57 }
  0x9a   :  { %3678 = vset.pattern.permute.xlu1 %v6331_v1 }
  0x9b   :  { %976 = vperm.xlu1 %3678, %v966_v37   ;;  %v4353_v37 = vrot.slane %v4185_v26, %v383_v2 }
  0x9d   :  { %6531 = vst [vmem:[#allocation50_spill] sm:$0xff] %v4353_v37 }
  0x9f   :  { %3679 = vset.pattern.permute.xlu1 %v4013_v11  ;;  %v783_v11 = vsub.s32 7, %v4161_v19  ;;  %v4347_v19 = vrot.slane %v4175_v24, %v383_v2 }
  0xa0   :  { %778 = vperm.xlu1 %3679, %v4116_v10  }
  0xa1   :  { %6529 = vst [vmem:[#allocation48_spill] sm:$0xff] %v4347_v19  ;;  %v4366_v32 = vrot.slane %v4169_v22, %v783_v11  ;;  %v4369_v1 = vrot.slane %v4175_v24, %v783_v11  ;;  %v4372_v20 = vrot.slane %v4180_v25, %v783_v11  ;;  %v4375_v37 = vrot.slane %v4185_v26, %v783_v11 }
  0xa2   :  { %v4382_v2 = vrot.slane %v4191_v27, %v783_v11  ;;  %v4388_v22 = vrot.slane %v4202_v29, %v783_v11 }
  0xa3   :  { %v267_v21 = vpop.permute.xlu1 %266  ;;  %v92_v23 = vpop.permute.xlu0 %91  ;;  %6535 = vst [vmem:[#allocation54_spill] sm:$0xff] %v4366_v32  ;;  %6536 = vst [vmem:[#allocation55_spill] sm:$0xff] %v4369_v1 }
  0xa4   :  { %3681 = vset.pattern.permute.xlu1 %v4014_v12  ;;  %6537 = vst [vmem:[#allocation56_spill] sm:$0xff] %v4372_v20  ;;  %6538 = vst [vmem:[#allocation57_spill] sm:$0xff] %v4375_v37  ;;  %v4378_v41 = vmul.f32 %v4205_v30, %v267_v21  ;;  %v4385_v12 = vrot.slane %v4196_v28, %v783_v11  ;;  %v4391_v24 = vmul.f32 %v4212_v33, %v267_v21 }
  0xa5   :  { %878 = vperm.xlu1 %3681, %v4116_v10   ;;  %6540 = vst [vmem:[#allocation59_spill] sm:$0xff] %v4382_v2  ;;  %6542 = vst [vmem:[#allocation61_spill] sm:$0xff] %v4388_v22  ;;  %v4394_v25 = vmul.f32 %v4215_v34, %v267_v21  ;;  %v4397_v26 = vmul.f32 %v4218_v35, %v267_v21  ;;  %v4400_v10 = vmul.f32 %v4228_v38, %v267_v21  ;;  %v967_v22 = vld [vmem:[%s6322_s2 + $0x10] sm:$0xff] }
  0xa6   :  { %6539 = vst [vmem:[#allocation58_spill] sm:$0xff] %v4378_v41  ;;  %6541 = vst [vmem:[#allocation60_spill] sm:$0xff] %v4385_v12  ;;  %v4403_v27 = vmul.f32 %v4231_v39, %v267_v21  ;;  %v4406_v28 = vmul.f32 %v4238_v42, %v267_v21  ;;  %v142_v29 = vmul.f32 %v4251_v46, %v92_v23 }
  0xa7   :  { %6543 = vst [vmem:[#allocation62_spill] sm:$0xff] %v4391_v24  ;;  %6544 = vst [vmem:[#allocation63_spill] sm:$0xff] %v4394_v25  ;;  %v143_v11 = vmul.f32 %v4254_v47, %v92_v23  ;;  %v137_v12 = vmul.f32 %v4208_v31, %v92_v23  ;;  %v138_v2 = vmul.f32 %v4234_v40, %v92_v23 }
  0xa8   :  { %6545 = vst [vmem:[#allocation64_spill] sm:$0xff] %v4397_v26  ;;  %6546 = vst [vmem:[#allocation65_spill] sm:$0xff] %v4400_v10  ;;  %v139_v37 = vmul.f32 %v4241_v43, %v92_v23  ;;  %v140_v20 = vmul.f32 %v4244_v44, %v92_v23  ;;  %v97_v1 = vpop.permute.xlu1 %96  ;;  %v167_v32 = vpop.permute.xlu0 %166  ;;  %v141_v21 = vmul.f32 %v4247_v45, %v92_v23 }
  0xa9   :  { %6547 = vst [vmem:[#allocation66_spill] sm:$0xff] %v4403_v27  ;;  %6548 = vst [vmem:[#allocation67_spill] sm:$0xff] %v4406_v28  ;;  %v144_v57 = vmul.f32 %v4208_v31, %v97_v1  ;;  %v145_v49 = vmul.f32 %v4234_v40, %v97_v1  ;;  %v146_v19 = vmul.f32 %v4241_v43, %v97_v1  ;;  %3682 = vset.pattern.permute.xlu1 %v6549_v18  ;;  %v968_v18 = vld [vmem:[%s6322_s2 + $0x18] sm:$0xff]  ;;  %s4031_s2 = smov 101  }
  0xaa   :  { %v147_v28 = vmul.f32 %v4244_v44, %v97_v1  ;;  %v148_v27 = vmul.f32 %v4247_v45, %v97_v1  ;;  %v149_v10 = vmul.f32 %v4251_v46, %v97_v1  ;;  %v209_v26 = vmul.f32 %v4221_v36, %v167_v32  ;;  %981 = vperm.xlu1 %3682, %v967_v22  }
  0xab   :  { %v210_v25 = vmul.f32 %v4257_v48, %v167_v32  ;;  %v211_v23 = vmul.f32 %v4261_v50, %v167_v32  ;;  %v212_v24 = vmul.f32 %v4264_v51, %v167_v32  ;;  %v213_v41 = vmul.f32 %v4267_v52, %v167_v32 }
  0xac   :  { %v150_v17 = vmul.f32 %v4254_v47, %v97_v1  ;;  %v214_v16 = vmul.f32 %v4270_v53, %v167_v32  ;;  %v215_v15 = vmul.f32 %v4273_v54, %v167_v32  ;;  %v4436_v14 = vadd.f32 %v209_v26, %v137_v12 }
  0xad   :  { %v4438_v22 = vadd.f32 %v210_v25, %v138_v2  ;;  %v4440_v13 = vadd.f32 %v211_v23, %v139_v37  ;;  %v4442_v9 = vadd.f32 %v212_v24, %v140_v20  ;;  %v4444_v8 = vadd.f32 %v213_v41, %v141_v21  ;;  %v171_v7 = vpop.permute.xlu1 %170  ;;  %v102_v6 = vpop.permute.xlu0 %101 }
  0xae   :  { %v4446_v5 = vadd.f32 %v214_v16, %v142_v29  ;;  %v4448_v4 = vadd.f32 %v215_v15, %v143_v11  ;;  %v216_v1 = vmul.f32 %v4221_v36, %v171_v7  ;;  %v217_v32 = vmul.f32 %v4257_v48, %v171_v7  ;;  %986 = vperm.xlu1 %3682, %v968_v18  }
  0xaf   :  { %6550 = vst [vmem:[#allocation68_spill] sm:$0xff] %v4444_v8  ;;  %v218_v2 = vmul.f32 %v4261_v50, %v171_v7  ;;  %v219_v37 = vmul.f32 %v4264_v51, %v171_v7  ;;  %v220_v20 = vmul.f32 %v4267_v52, %v171_v7  ;;  %v221_v41 = vmul.f32 %v4270_v53, %v171_v7 }
  0xb0   :  { %6551 = vst [vmem:[#allocation69_spill] sm:$0xff] %v4446_v5  ;;  %6552 = vst [vmem:[#allocation70_spill] sm:$0xff] %v4448_v4  ;;  %v222_v12 = vmul.f32 %v4273_v54, %v171_v7  ;;  %v4458_v16 = vmul.f32 %v4208_v31, %v102_v6  ;;  %v4461_v15 = vmul.f32 %v4234_v40, %v102_v6 }
  0xb1   :  { %v4464_v24 = vmul.f32 %v4241_v43, %v102_v6  ;;  %v4467_v25 = vmul.f32 %v4244_v44, %v102_v6  ;;  %v4470_v26 = vmul.f32 %v4247_v45, %v102_v6  ;;  %v4473_v29 = vmul.f32 %v4251_v46, %v102_v6 }
  0xb2   :  { %v4476_v7 = vmul.f32 %v4254_v47, %v102_v6  ;;  %v271_v11 = vpop.permute.xlu1 %270  ;;  %v244_v21 = vadd.f32 %v216_v1, %v144_v57  ;;  %v245_v23 = vadd.f32 %v217_v32, %v145_v49  ;;  %v246_v18 = vadd.f32 %v218_v2, %v146_v19  ;;  %v567_v31 = vpop.permute.xlu0 %566 }
  0xb3   :  { %v247_v40 = vadd.f32 %v219_v37, %v147_v28  ;;  %v248_v43 = vadd.f32 %v220_v20, %v148_v27  ;;  %v249_v4 = vadd.f32 %v221_v41, %v149_v10  ;;  %v250_v5 = vadd.f32 %v222_v12, %v150_v17  ;;  %v6560_v20 = vld [vmem:[#allocation36_spill] sm:$0xff]  ;;  %v6561_v12 = vld [vmem:[#allocation37_spill] sm:$0xff] }
  0xb4   :  { %v316_v44 = vmul.f32 %v4205_v30, %v271_v11  ;;  %v317_v45 = vmul.f32 %v4212_v33, %v271_v11  ;;  %v318_v8 = vmul.f32 %v4215_v34, %v271_v11  ;;  %v319_v46 = vmul.f32 %v4218_v35, %v271_v11 }
  0xb5   :  { %v320_v6 = vmul.f32 %v4228_v38, %v271_v11  ;;  %v321_v47 = vmul.f32 %v4231_v39, %v271_v11  ;;  %v322_v49 = vmul.f32 %v4238_v42, %v271_v11  ;;  %v4488_v57 = vmul.f32 %v4276_v55, %v567_v31 }
  0xb6   :  { %v4485_v19 = vadd.f32 %v316_v44, %v244_v21  ;;  %v4490_v17 = vadd.f32 %v317_v45, %v245_v23  ;;  %v4492_v10 = vadd.f32 %v318_v8, %v246_v18  ;;  %v4494_v27 = vadd.f32 %v319_v46, %v247_v40  ;;  %v6562_v21 = vld [vmem:[#allocation38_spill] sm:$0xff]  ;;  %v6563_v18 = vld [vmem:[#allocation39_spill] sm:$0xff] }
  0xb7   :  { %6553 = vst [vmem:[#allocation71_spill] sm:$0xff] %v4488_v57  ;;  %v4496_v28 = vadd.f32 %v320_v6, %v248_v43  ;;  %v4498_v1 = vadd.f32 %v321_v47, %v249_v4  ;;  %v4500_v32 = vadd.f32 %v322_v49, %v250_v5  ;;  %v4503_v2 = vmul.f32 %v4279_v56, %v567_v31  ;;  %v467_v37 = vpop.permute.xlu1 %466  ;;  %v667_v46 = vpop.permute.xlu0 %666  ;;  %v6564_v49 = vld [vmem:[#allocation40_spill] sm:$0xff] }
  0xb8   :  { %v4506_v44 = vmul.f32 %v4283_v58, %v567_v31  ;;  %v4509_v45 = vmul.f32 %v4286_v59, %v567_v31  ;;  %v4512_v8 = vmul.f32 %v4289_v60, %v567_v31  ;;  %v4515_v40 = vmul.f32 %v4292_v61, %v567_v31  ;;  %v6572_v57 = vld [vmem:[#allocation44_spill] sm:$0xff]  ;;  %v6574_v61 = vld [vmem:[#allocation45_spill] sm:$0xff]  ;;  %v6576_v59 = vld [vmem:[#allocation46_spill] sm:$0xff] }
  0xb9   :  { %6554 = vst [vmem:[#allocation72_spill] sm:$0xff] %v4503_v2  ;;  %v4518_v43 = vmul.f32 %v4295_v62, %v567_v31  ;;  %v509_v47 = vmul.f32 %v4298_v63, %v467_v37  ;;  %v510_v4 = vmul.f32 %v4301_v0, %v467_v37  ;;  %v511_v5 = vmul.f32 %v4306_v3, %v467_v37  ;;  %v6566_v31 = vld [vmem:[#allocation41_spill] sm:$0xff] }
  0xba   :  { %6555 = vst [vmem:[#allocation73_spill] sm:$0xff] %v4506_v44  ;;  %6556 = vst [vmem:[#allocation74_spill] sm:$0xff] %v4509_v45  ;;  %v512_v41 = vmul.f32 %v6560_v20, %v467_v37  ;;  %v513_v11 = vmul.f32 %v6561_v12, %v467_v37  ;;  %v514_v23 = vmul.f32 %v6562_v21, %v467_v37  ;;  %v6570_v44 = vld [vmem:[#allocation43_spill] sm:$0xff] }
  0xbb   :  { %6557 = vst [vmem:[#allocation75_spill] sm:$0xff] %v4512_v8  ;;  %6558 = vst [vmem:[#allocation76_spill] sm:$0xff] %v4515_v40  ;;  %v515_v6 = vmul.f32 %v6563_v18, %v467_v37  ;;  %v4528_v40 = vmul.f32 %v6564_v49, %v667_v46  ;;  %v6568_v8 = vld [vmem:[#allocation42_spill] sm:$0xff]  ;;  %v4537_v2 = vmul.f32 %v6570_v44, %v667_v46 }
  0xbc   :  { %6559 = vst [vmem:[#allocation77_spill] sm:$0xff] %v4518_v43  ;;  %v4531_v43 = vmul.f32 %v6566_v31, %v667_v46  ;;  %v4534_v45 = vmul.f32 %v6568_v8, %v667_v46  ;;  %v4540_v62 = vmul.f32 %v6572_v57, %v667_v46  ;;  %v4543_v60 = vmul.f32 %v6574_v61, %v667_v46  ;;  %v175_v49 = vpop.permute.xlu1 %174 }
  0xbd   :  { %6565 = vst [vmem:[#allocation78_spill] sm:$0xff] %v4528_v40  ;;  %6571 = vst [vmem:[#allocation81_spill] sm:$0xff] %v4537_v2  ;;  %v4546_v37 = vmul.f32 %v6576_v59, %v667_v46  ;;  %v6578_v40 = vld [vmem:[#allocation58_spill] sm:$0xff]  ;;  %v224_v2 = vmul.f32 %v4257_v48, %v175_v49  ;;  %v225_v57 = vmul.f32 %v4261_v50, %v175_v49  ;;  %v367_v59 = vpop.permute.xlu0 %366 }
  0xbe   :  { %6567 = vst [vmem:[#allocation79_spill] sm:$0xff] %v4531_v43  ;;  %6569 = vst [vmem:[#allocation80_spill] sm:$0xff] %v4534_v45  ;;  %v337_v31 = vadd.f32 %v6578_v40, %v4436_v14  ;;  %v6579_v43 = vld [vmem:[#allocation62_spill] sm:$0xff]  ;;  %v223_v45 = vmul.f32 %v4221_v36, %v175_v49  ;;  %v228_v46 = vmul.f32 %v4270_v53, %v175_v49  ;;  %v6580_v14 = vld [vmem:[#allocation63_spill] sm:$0xff] }
  0xbf   :  { %6573 = vst [vmem:[#allocation82_spill] sm:$0xff] %v4540_v62  ;;  %6575 = vst [vmem:[#allocation83_spill] sm:$0xff] %v4543_v60  ;;  %v338_v8 = vadd.f32 %v6579_v43, %v4438_v22  ;;  %v226_v62 = vmul.f32 %v4264_v51, %v175_v49  ;;  %v227_v60 = vmul.f32 %v4267_v52, %v175_v49  ;;  %v6582_v53 = vld [vmem:[#allocation68_spill] sm:$0xff]  ;;  %v6583_v52 = vld [vmem:[#allocation65_spill] sm:$0xff] }
  0xc0   :  { %6577 = vst [vmem:[#allocation84_spill] sm:$0xff] %v4546_v37  ;;  %v229_v37 = vmul.f32 %v4273_v54, %v175_v49  ;;  %v339_v40 = vadd.f32 %v6580_v14, %v4440_v13  ;;  %v251_v22 = vadd.f32 %v223_v45, %v4458_v16  ;;  %v252_v43 = vadd.f32 %v224_v2, %v4461_v15  ;;  %v6581_v49 = vld [vmem:[#allocation64_spill] sm:$0xff]  ;;  %v6584_v14 = vld [vmem:[#allocation69_spill] sm:$0xff]  ;;  %v6585_v16 = vld [vmem:[#allocation66_spill] sm:$0xff] }
  0xc1   :  { %v253_v61 = vadd.f32 %v225_v57, %v4464_v24  ;;  %v254_v44 = vadd.f32 %v226_v62, %v4467_v25  ;;  %v255_v58 = vadd.f32 %v227_v60, %v4470_v26  ;;  %v256_v56 = vadd.f32 %v228_v46, %v4473_v29  ;;  %v6586_v15 = vld [vmem:[#allocation70_spill] sm:$0xff]  ;;  %v6587_v2 = vld [vmem:[#allocation67_spill] sm:$0xff]  ;;  %v371_v25 = vpop.permute.xlu1 %370  ;;  %v6589_v60 = vld [vmem:[#allocation48_spill] sm:$0xff] }
  0xc2   :  { %v257_v55 = vadd.f32 %v229_v37, %v4476_v7  ;;  %v340_v54 = vadd.f32 %v6581_v49, %v4442_v9  ;;  %v341_v13 = vadd.f32 %v6583_v52, %v6582_v53  ;;  %v342_v45 = vadd.f32 %v6585_v16, %v6584_v14  ;;  %v6588_v57 = vld [vmem:[#allocation47_spill] sm:$0xff]  ;;  %v6590_v29 = vld [vmem:[#allocation49_spill] sm:$0xff]  ;;  %v6591_v7 = vld [vmem:[#allocation50_spill] sm:$0xff] }
  0xc3   :  { %v343_v24 = vadd.f32 %v6587_v2, %v6586_v15  ;;  %v409_v62 = vmul.f32 %v6588_v57, %v367_v59  ;;  %v410_v26 = vmul.f32 %v6589_v60, %v367_v59  ;;  %v411_v46 = vmul.f32 %v6590_v29, %v367_v59  ;;  %v6592_v51 = vld [vmem:[#allocation51_spill] sm:$0xff]  ;;  %v6593_v49 = vld [vmem:[#allocation52_spill] sm:$0xff]  ;;  %v6594_v52 = vld [vmem:[#allocation53_spill] sm:$0xff] }
  0xc4   :  { %v412_v37 = vmul.f32 %v6591_v7, %v367_v59  ;;  %v413_v9 = vmul.f32 %v6592_v51, %v367_v59  ;;  %v414_v50 = vmul.f32 %v6593_v49, %v367_v59  ;;  %v415_v53 = vmul.f32 %v6594_v52, %v367_v59 }
  0xc5   :  { %v437_v48 = vadd.f32 %v409_v62, %v337_v31  ;;  %v416_v14 = vmul.f32 %v6588_v57, %v371_v25  ;;  %v438_v16 = vadd.f32 %v410_v26, %v338_v8  ;;  %v439_v15 = vadd.f32 %v411_v46, %v339_v40 }
  0xc6   :  { %v440_v2 = vadd.f32 %v412_v37, %v340_v54  ;;  %v441_v36 = vadd.f32 %v413_v9, %v341_v13  ;;  %v442_v18 = vadd.f32 %v414_v50, %v342_v45  ;;  %v443_v21 = vadd.f32 %v415_v53, %v343_v24  ;;  %v275_v31 = vpop.permute.xlu1 %274 }
  0xc7   :  { %v4584_v12 = vadd.f32 %v509_v47, %v437_v48  ;;  %v417_v20 = vmul.f32 %v6589_v60, %v371_v25  ;;  %v4587_v3 = vadd.f32 %v510_v4, %v438_v16  ;;  %v4589_v0 = vadd.f32 %v511_v5, %v439_v15 }
  0xc8   :  { %v4591_v63 = vadd.f32 %v512_v41, %v440_v2  ;;  %v4593_v59 = vadd.f32 %v513_v11, %v441_v36  ;;  %v4595_v62 = vadd.f32 %v514_v23, %v442_v18  ;;  %v4597_v8 = vadd.f32 %v515_v6, %v443_v21  ;;  %v375_v23 = vpop.permute.xlu0 %374 }
  0xc9   :  { %6595 = vst [vmem:[#allocation58_spill] sm:$0xff] %v4589_v0  ;;  %v418_v50 = vmul.f32 %v6590_v29, %v371_v25  ;;  %v419_v48 = vmul.f32 %v6591_v7, %v371_v25  ;;  %v420_v54 = vmul.f32 %v6592_v51, %v371_v25  ;;  %v421_v47 = vmul.f32 %v6593_v49, %v371_v25  ;;  %v6612_v0 = vld [vmem:[#allocation17_spill] sm:$0xff] }
  0xca   :  { %6596 = vst [vmem:[#allocation62_spill] sm:$0xff] %v4591_v63  ;;  %6597 = vst [vmem:[#allocation63_spill] sm:$0xff] %v4593_v59  ;;  %v422_v4 = vmul.f32 %v6594_v52, %v371_v25  ;;  %v444_v5 = vadd.f32 %v416_v14, %v4485_v19  ;;  %v445_v36 = vadd.f32 %v417_v20, %v4490_v17 }
  0xcb   :  { %6598 = vst [vmem:[#allocation64_spill] sm:$0xff] %v4595_v62  ;;  %6599 = vst [vmem:[#allocation68_spill] sm:$0xff] %v4597_v8  ;;  %v446_v41 = vadd.f32 %v418_v50, %v4492_v10  ;;  %v447_v11 = vadd.f32 %v419_v48, %v4494_v27  ;;  %v323_v21 = vmul.f32 %v4205_v30, %v275_v31  ;;  %v471_v27 = vpop.permute.xlu1 %470  ;;  %v6611_v8 = vld [vmem:[#allocation16_spill] sm:$0xff] }
  0xcc   :  { %v448_v18 = vadd.f32 %v420_v54, %v4496_v28  ;;  %v449_v6 = vadd.f32 %v421_v47, %v4498_v1  ;;  %v450_v40 = vadd.f32 %v422_v4, %v4500_v32  ;;  %v324_v13 = vmul.f32 %v4212_v33, %v275_v31  ;;  %v279_v2 = vpop.permute.xlu0 %278  ;;  %v6602_v47 = vld [vmem:[#allocation34_spill] sm:$0xff] }
  0xcd   :  { %v325_v45 = vmul.f32 %v4215_v34, %v275_v31  ;;  %v326_v19 = vmul.f32 %v4218_v35, %v275_v31  ;;  %v327_v17 = vmul.f32 %v4228_v38, %v275_v31  ;;  %v328_v10 = vmul.f32 %v4231_v39, %v275_v31 }
  0xce   :  { %v329_v20 = vmul.f32 %v4238_v42, %v275_v31  ;;  %v351_v24 = vadd.f32 %v323_v21, %v251_v22  ;;  %v352_v25 = vadd.f32 %v324_v13, %v252_v43  ;;  %v423_v28 = vmul.f32 %v6588_v57, %v375_v23  ;;  %v6603_v21 = vld [vmem:[#allocation35_spill] sm:$0xff]  ;;  %v6604_v13 = vld [vmem:[#allocation36_spill] sm:$0xff] }
  0xcf   :  { %v353_v1 = vadd.f32 %v325_v45, %v253_v61  ;;  %v354_v26 = vadd.f32 %v326_v19, %v254_v44  ;;  %v355_v32 = vadd.f32 %v327_v17, %v255_v58  ;;  %v356_v46 = vadd.f32 %v328_v10, %v256_v56  ;;  %v6600_v56 = vld [vmem:[#allocation33_spill] sm:$0xff]  ;;  %v6606_v10 = vld [vmem:[#allocation38_spill] sm:$0xff] }
  0xd0   :  { %v357_v37 = vadd.f32 %v329_v20, %v257_v55  ;;  %v424_v9 = vmul.f32 %v6589_v60, %v375_v23  ;;  %v425_v53 = vmul.f32 %v6590_v29, %v375_v23  ;;  %v426_v14 = vmul.f32 %v6591_v7, %v375_v23  ;;  %v107_v31 = vpop.permute.xlu1 %106  ;;  %v6605_v19 = vld [vmem:[#allocation37_spill] sm:$0xff]  ;;  %v771_v63 = vpop.permute.xlu0 %770 }
  0xd1   :  { %v427_v16 = vmul.f32 %v6592_v51, %v375_v23  ;;  %v428_v15 = vmul.f32 %v6593_v49, %v375_v23  ;;  %v429_v22 = vmul.f32 %v6594_v52, %v375_v23  ;;  %v4625_v43 = vadd.f32 %v423_v28, %v351_v24  ;;  %v6607_v24 = vld [vmem:[#allocation39_spill] sm:$0xff] }
  0xd2   :  { %v4627_v61 = vadd.f32 %v424_v9, %v352_v25  ;;  %v4629_v58 = vadd.f32 %v425_v53, %v353_v1  ;;  %v4631_v55 = vadd.f32 %v426_v14, %v354_v26  ;;  %v516_v44 = vmul.f32 %v6600_v56, %v471_v27  ;;  %v6608_v26 = vld [vmem:[#allocation12_spill] sm:$0xff] }
  0xd3   :  { %v4634_v50 = vadd.f32 %v427_v16, %v355_v32  ;;  %v4636_v48 = vadd.f32 %v428_v15, %v356_v46  ;;  %v4638_v54 = vadd.f32 %v429_v22, %v357_v37  ;;  %v517_v4 = vmul.f32 %v6602_v47, %v471_v27  ;;  %v6609_v16 = vld [vmem:[#allocation14_spill] sm:$0xff]  ;;  %v6610_v22 = vld [vmem:[#allocation15_spill] sm:$0xff] }
  0xd4   :  { %v518_v23 = vmul.f32 %v6603_v21, %v471_v27  ;;  %v519_v45 = vmul.f32 %v6604_v13, %v471_v27  ;;  %v520_v17 = vmul.f32 %v6605_v19, %v471_v27  ;;  %v521_v20 = vmul.f32 %v6606_v10, %v471_v27 }
  0xd5   :  { %6601 = vst [vmem:[#allocation65_spill] sm:$0xff] %v4638_v54  ;;  %v522_v25 = vmul.f32 %v6607_v24, %v471_v27  ;;  %v544_v28 = vadd.f32 %v516_v44, %v444_v5  ;;  %v545_v1 = vadd.f32 %v517_v4, %v445_v36  ;;  %v158_v32 = vmul.f32 %v6608_v26, %v107_v31  ;;  %v179_v59 = vpop.permute.xlu1 %178  ;;  %v6613_v27 = vld [vmem:[#allocation18_spill] sm:$0xff]  ;;  %v6614_v36 = vld [vmem:[#allocation19_spill] sm:$0xff]  ;;  %v6615_v4 = vld [vmem:[#allocation13_spill] sm:$0xff] }
  0xd6   :  { %v546_v46 = vadd.f32 %v518_v23, %v446_v41  ;;  %v547_v9 = vadd.f32 %v519_v45, %v447_v11  ;;  %v548_v37 = vadd.f32 %v520_v17, %v448_v18  ;;  %v549_v53 = vadd.f32 %v521_v20, %v449_v6  ;;  %v6616_v11 = vld [vmem:[#allocation20_spill] sm:$0xff]  ;;  %v6617_v6 = vld [vmem:[#allocation21_spill] sm:$0xff]  ;;  %v6618_v23 = vld [vmem:[#allocation22_spill] sm:$0xff] }
  0xd7   :  { %v550_v14 = vadd.f32 %v522_v25, %v450_v40  ;;  %v159_v15 = vmul.f32 %v6609_v16, %v107_v31  ;;  %v160_v54 = vmul.f32 %v6610_v22, %v107_v31  ;;  %v161_v62 = vmul.f32 %v6611_v8, %v107_v31  ;;  %v6619_v17 = vld [vmem:[#allocation23_spill] sm:$0xff]  ;;  %v6620_v25 = vld [vmem:[#allocation24_spill] sm:$0xff]  ;;  %v6621_v26 = vld [vmem:[#allocation25_spill] sm:$0xff] }
  0xd8   :  { %v162_v52 = vmul.f32 %v6612_v0, %v107_v31  ;;  %v163_v5 = vmul.f32 %v6613_v27, %v107_v31  ;;  %v164_v44 = vmul.f32 %v6614_v36, %v107_v31  ;;  %v230_v41 = vmul.f32 %v6615_v4, %v179_v59 }
  0xd9   :  { %v231_v18 = vmul.f32 %v6616_v11, %v179_v59  ;;  %v232_v40 = vmul.f32 %v6617_v6, %v179_v59  ;;  %v233_v45 = vmul.f32 %v6618_v23, %v179_v59  ;;  %v234_v20 = vmul.f32 %v6619_v17, %v179_v59 }
  0xda   :  { %v235_v8 = vmul.f32 %v6620_v25, %v179_v59  ;;  %v236_v16 = vmul.f32 %v6621_v26, %v179_v59  ;;  %v258_v22 = vadd.f32 %v230_v41, %v158_v32  ;;  %v330_v0 = vmul.f32 %v4205_v30, %v279_v2  ;;  %v571_v23 = vpop.permute.xlu1 %570  ;;  %v4667_v30 = vpop.permute.xlu0 %774  ;;  %v6627_v41 = vld [vmem:[#allocation57_spill] sm:$0xff] }
  0xdb   :  { %v259_v27 = vadd.f32 %v231_v18, %v159_v15  ;;  %v260_v49 = vadd.f32 %v232_v40, %v160_v54  ;;  %v261_v31 = vadd.f32 %v233_v45, %v161_v62  ;;  %v262_v36 = vadd.f32 %v234_v20, %v162_v52  ;;  %6622 = vst [vmem:[#allocation69_spill] sm:$0xff] %v4667_v30  ;;  %v6629_v18 = vld [vmem:[#allocation59_spill] sm:$0xff]  ;;  %v6631_v45 = vld [vmem:[#allocation60_spill] sm:$0xff] }
  0xdc   :  { %v263_v4 = vadd.f32 %v235_v8, %v163_v5  ;;  %v264_v51 = vadd.f32 %v236_v16, %v164_v44  ;;  %v331_v11 = vmul.f32 %v4212_v33, %v279_v2  ;;  %v332_v6 = vmul.f32 %v4215_v34, %v279_v2  ;;  %v6623_v33 = vld [vmem:[#allocation54_spill] sm:$0xff]  ;;  %v6625_v5 = vld [vmem:[#allocation56_spill] sm:$0xff]  ;;  %v6633_v8 = vld [vmem:[#allocation61_spill] sm:$0xff] }
  0xdd   :  { %v333_v17 = vmul.f32 %v4218_v35, %v279_v2  ;;  %v334_v25 = vmul.f32 %v4228_v38, %v279_v2  ;;  %v335_v59 = vmul.f32 %v4231_v39, %v279_v2  ;;  %v336_v32 = vmul.f32 %v4238_v42, %v279_v2  ;;  %v6624_v42 = vld [vmem:[#allocation55_spill] sm:$0xff] }
  0xde   :  { %v4669_v54 = vadd.f32 %v330_v0, %v258_v22  ;;  %v4671_v52 = vadd.f32 %v331_v11, %v259_v27  ;;  %v4673_v62 = vadd.f32 %v332_v6, %v260_v49  ;;  %v4676_v15 = vmul.f32 %v6623_v33, %v771_v63  ;;  %v6636_v22 = vld [vmem:[#allocation27_spill] sm:$0xff]  ;;  %v6639_v6 = vld [vmem:[#allocation30_spill] sm:$0xff] }
  0xdf   :  { %v4678_v34 = vadd.f32 %v333_v17, %v261_v31  ;;  %v4680_v35 = vadd.f32 %v334_v25, %v262_v36  ;;  %v4682_v38 = vadd.f32 %v335_v59, %v263_v4  ;;  %v4684_v39 = vadd.f32 %v336_v32, %v264_v51  ;;  %v6635_v51 = vld [vmem:[#allocation26_spill] sm:$0xff]  ;;  %v767_v27 = vpop.permute.xlu1 %766  ;;  %v6637_v31 = vld [vmem:[#allocation28_spill] sm:$0xff]  ;;  %v6638_v4 = vld [vmem:[#allocation29_spill] sm:$0xff] }
  0xe0   :  { %v4687_v2 = vmul.f32 %v6624_v42, %v771_v63  ;;  %v4690_v44 = vmul.f32 %v6625_v5, %v771_v63  ;;  %v4693_v49 = vmul.f32 %v6627_v41, %v771_v63  ;;  %v4696_v40 = vmul.f32 %v6629_v18, %v771_v63  ;;  %v6640_v25 = vld [vmem:[#allocation31_spill] sm:$0xff]  ;;  %v6641_v32 = vld [vmem:[#allocation32_spill] sm:$0xff] }
  0xe1   :  { %v4699_v20 = vmul.f32 %v6631_v45, %v771_v63  ;;  %v4702_v26 = vmul.f32 %v6633_v8, %v771_v63  ;;  %v616_v16 = vmul.f32 %v6635_v51, %v571_v23  ;;  %v617_v0 = vmul.f32 %v6636_v22, %v571_v23 }
  0xe2   :  { %6626 = vst [vmem:[#allocation66_spill] sm:$0xff] %v4690_v44  ;;  %6628 = vst [vmem:[#allocation70_spill] sm:$0xff] %v4693_v49  ;;  %v618_v36 = vmul.f32 %v6637_v31, %v571_v23  ;;  %v619_v11 = vmul.f32 %v6638_v4, %v571_v23  ;;  %v620_v17 = vmul.f32 %v6639_v6, %v571_v23 }
  0xe3   :  { %6630 = vst [vmem:[#allocation67_spill] sm:$0xff] %v4696_v40  ;;  %6632 = vst [vmem:[#allocation47_spill] sm:$0xff] %v4699_v20  ;;  %v621_v59 = vmul.f32 %v6640_v25, %v571_v23  ;;  %v622_v40 = vmul.f32 %v6641_v32, %v571_v23  ;;  %v644_v49 = vadd.f32 %v616_v16, %v544_v28 }
  0xe4   :  { %6634 = vst [vmem:[#allocation48_spill] sm:$0xff] %v4702_v26  ;;  %v645_v20 = vadd.f32 %v617_v0, %v545_v1  ;;  %v4713_v63 = vmul.f32 %v6623_v33, %v4667_v30  ;;  %v4715_v26 = vpop.permute.xlu0 %866  ;;  %v646_v44 = vadd.f32 %v618_v36, %v546_v46  ;;  %v4717_v22 = vadd.f32 %v619_v11, %v547_v9  ;;  %v4738_v46 = vld [vmem:[%s6320_s0 + $0x48] ss:$0 sm:$0xff]  ;;  %v4743_v9 = vld [vmem:[%s6320_s0 + $0x60] ss:$0 sm:$0xff] }
  0xe5   :  { %v4719_v31 = vadd.f32 %v620_v17, %v548_v37  ;;  %v649_v4 = vadd.f32 %v621_v59, %v549_v53  ;;  %v4721_v51 = vadd.f32 %v622_v40, %v550_v14  ;;  %v4725_v25 = vmul.f32 %v6624_v42, %v4667_v30  ;;  %6649 = vst [vmem:[#allocation38_spill] sm:$0xff] %v4738_v46  ;;  %v475_v40 = vpop.permute.xlu1 %474 }
  0xe6   :  { %6642 = vst [vmem:[#allocation49_spill] sm:$0xff] %v4713_v63  ;;  %6643 = vst [vmem:[#allocation50_spill] sm:$0xff] %v4717_v22  ;;  %v4729_v28 = vmul.f32 %v6625_v5, %v4667_v30  ;;  %v4733_v1 = vmul.f32 %v6627_v41, %v4667_v30  ;;  %v4747_v37 = vmul.f32 %v6629_v18, %v4667_v30 }
  0xe7   :  { %6644 = vst [vmem:[#allocation33_spill] sm:$0xff] %v4719_v31  ;;  %6645 = vst [vmem:[#allocation34_spill] sm:$0xff] %v4721_v51  ;;  %v4751_v53 = vmul.f32 %v6631_v45, %v4667_v30  ;;  %v4754_v14 = vmul.f32 %v6623_v33, %v767_v27  ;;  %v4757_v23 = vmul.f32 %v6624_v42, %v767_v27 }
  0xe8   :  { %6646 = vst [vmem:[#allocation35_spill] sm:$0xff] %v4725_v25  ;;  %6647 = vst [vmem:[#allocation36_spill] sm:$0xff] %v4729_v28  ;;  %v4760_v16 = vmul.f32 %v6625_v5, %v767_v27  ;;  %v4763_v0 = vmul.f32 %v6627_v41, %v767_v27  ;;  %v4766_v36 = vmul.f32 %v6629_v18, %v767_v27  ;;  %v4771_v17 = vpop.permute.xlu0 %870  ;;  %v6662_v28 = vld [vmem:[#allocation42_spill] sm:$0xff] }
  0xe9   :  { %6648 = vst [vmem:[#allocation37_spill] sm:$0xff] %v4733_v1  ;;  %6650 = vst [vmem:[#allocation39_spill] sm:$0xff] %v4743_v9  ;;  %v4769_v11 = vmul.f32 %v6631_v45, %v767_v27  ;;  %v4774_v59 = vmul.f32 %v6633_v8, %v767_v27  ;;  %v4778_v30 = vmul.f32 %v4738_v46, %v4715_v26  ;;  %v671_v1 = vpop.permute.xlu1 %670 }
  0xea   :  { %6651 = vst [vmem:[#allocation12_spill] sm:$0xff] %v4747_v37  ;;  %6652 = vst [vmem:[#allocation14_spill] sm:$0xff] %v4751_v53  ;;  %v4782_v53 = vmul.f32 %v4743_v9, %v4715_v26  ;;  %v523_v51 = vmul.f32 %v6600_v56, %v475_v40  ;;  %v524_v37 = vmul.f32 %v6602_v47, %v475_v40 }
  0xeb   :  { %6653 = vst [vmem:[#allocation15_spill] sm:$0xff] %v4763_v0  ;;  %6654 = vst [vmem:[#allocation16_spill] sm:$0xff] %v4766_v36  ;;  %v525_v45 = vmul.f32 %v6603_v21, %v475_v40  ;;  %v526_v18 = vmul.f32 %v6604_v13, %v475_v40  ;;  %v527_v41 = vmul.f32 %v6605_v19, %v475_v40  ;;  %v6675_v0 = vld [vmem:[#allocation72_spill] sm:$0xff] }
  0xec   :  { %6655 = vst [vmem:[#allocation17_spill] sm:$0xff] %v4769_v11  ;;  %6656 = vst [vmem:[#allocation18_spill] sm:$0xff] %v4774_v59  ;;  %v528_v27 = vmul.f32 %v6606_v10, %v475_v40  ;;  %v4791_v8 = vmul.f32 %v6607_v24, %v475_v40  ;;  %v551_v59 = vadd.f32 %v523_v51, %v4625_v43  ;;  %v4802_v36 = vpop.permute.xlu0 %874  ;;  %v6661_v43 = vld [vmem:[#allocation41_spill] sm:$0xff] }
  0xed   :  { %6657 = vst [vmem:[#allocation19_spill] sm:$0xff] %v4778_v30  ;;  %6658 = vst [vmem:[#allocation13_spill] sm:$0xff] %v4782_v53  ;;  %v4796_v5 = vmul.f32 %v4738_v46, %v4771_v17  ;;  %v552_v42 = vadd.f32 %v524_v37, %v4627_v61  ;;  %v553_v33 = vadd.f32 %v525_v45, %v4629_v58  ;;  %v4811_v61 = vld [vmem:[%s6320_s0 + $0x38] ss:$0 sm:$0xff]  ;;  %v6663_v58 = vld [vmem:[#allocation43_spill] sm:$0xff] }
  0xee   :  { %6659 = vst [vmem:[#allocation20_spill] sm:$0xff] %v4791_v8  ;;  %v554_v53 = vadd.f32 %v526_v18, %v4631_v55  ;;  %v555_v11 = vadd.f32 %v527_v41, %v4634_v50  ;;  %v556_v40 = vadd.f32 %v528_v27, %v4636_v48  ;;  %v6660_v8 = vld [vmem:[#allocation40_spill] sm:$0xff]  ;;  %v717_v51 = vmul.f32 %v6661_v43, %v671_v1  ;;  %v6667_v18 = vld [vmem:[#allocation45_spill] sm:$0xff]  ;;  %v6668_v48 = vld [vmem:[#allocation46_spill] sm:$0xff] }
  0xef   :  { %v716_v31 = vmul.f32 %v6660_v8, %v671_v1  ;;  %v718_v25 = vmul.f32 %v6662_v28, %v671_v1  ;;  %v4814_v55 = vmul.f32 %v6663_v58, %v671_v1  ;;  %v6665_v50 = vld [vmem:[#allocation44_spill] sm:$0xff]  ;;  %v721_v45 = vmul.f32 %v6667_v18, %v671_v1  ;;  %v4826_v27 = vld [vmem:[%s6320_s0 + $0x40] ss:$0 sm:$0xff]  ;;  %v6678_v18 = vld [vmem:[#allocation53_spill] sm:$0xff] }
  0xf0   :  { %v4817_v41 = vmul.f32 %v6665_v50, %v671_v1  ;;  %v4821_v37 = vmul.f32 %v6668_v48, %v671_v1  ;;  %v4830_v22 = vmul.f32 %v4743_v9, %v4771_v17  ;;  %v745_v30 = vadd.f32 %v717_v51, %v645_v20  ;;  %v6679_v58 = vld [vmem:[#allocation78_spill] sm:$0xff] }
  0xf1   :  { %6664 = vst [vmem:[#allocation21_spill] sm:$0xff] %v4814_v55  ;;  %v746_v63 = vadd.f32 %v718_v25, %v646_v44  ;;  %v4834_v55 = vmul.f32 %v4738_v46, %v4802_v36  ;;  %v4840_v1 = vadd.f32 %v721_v45, %v649_v4  ;;  %v638_v44 = vadd.f32 %v6675_v0, %v4587_v3  ;;  %v6676_v0 = vld [vmem:[#allocation51_spill] sm:$0xff] }
  0xf2   :  { %6666 = vst [vmem:[#allocation22_spill] sm:$0xff] %v4817_v41  ;;  %6669 = vst [vmem:[#allocation23_spill] sm:$0xff] %v4821_v37  ;;  %v4838_v41 = vmul.f32 %v4743_v9, %v4802_v36  ;;  %v6674_v37 = vld [vmem:[#allocation71_spill] sm:$0xff]  ;;  %v909_v25 = vmul.f32 %v4811_v61, %v4715_v26  ;;  %v910_v46 = vmul.f32 %v4826_v27, %v4715_v26  ;;  %v6677_v9 = vld [vmem:[#allocation52_spill] sm:$0xff] }
  0xf3   :  { %6670 = vst [vmem:[#allocation24_spill] sm:$0xff] %v4830_v22  ;;  %6671 = vst [vmem:[#allocation25_spill] sm:$0xff] %v4834_v55  ;;  %v637_v48 = vadd.f32 %v6674_v37, %v4584_v12  ;;  %v379_v22 = vpop.permute.xlu1 %378  ;;  %v744_v55 = vadd.f32 %v716_v31, %v644_v49 }
  0xf4   :  { %6672 = vst [vmem:[#allocation40_spill] sm:$0xff] %v4838_v41  ;;  %6673 = vst [vmem:[#allocation41_spill] sm:$0xff] %v4840_v1  ;;  %v916_v41 = vmul.f32 %v4811_v61, %v4771_v17  ;;  %v430_v4 = vmul.f32 %v6588_v57, %v379_v22  ;;  %v431_v45 = vmul.f32 %v6589_v60, %v379_v22 }
  0xf5   :  { %v432_v12 = vmul.f32 %v6590_v29, %v379_v22  ;;  %v433_v3 = vmul.f32 %v6591_v7, %v379_v22  ;;  %v434_v37 = vmul.f32 %v6676_v0, %v379_v22  ;;  %v435_v1 = vmul.f32 %v6677_v9, %v379_v22  ;;  %v6680_v0 = vld [vmem:[#allocation79_spill] sm:$0xff] }
  0xf6   :  { %v436_v50 = vmul.f32 %v6678_v18, %v379_v22  ;;  %v737_v49 = vadd.f32 %v6679_v58, %v637_v48  ;;  %v458_v20 = vadd.f32 %v430_v4, %v4669_v54  ;;  %v459_v31 = vadd.f32 %v431_v45, %v4671_v52  ;;  %v6682_v18 = vld [vmem:[#allocation27_spill] sm:$0xff]  ;;  %v6683_v48 = vld [vmem:[#allocation28_spill] sm:$0xff] }
  0xf7   :  { %v460_v57 = vadd.f32 %v432_v12, %v4673_v62  ;;  %v461_v60 = vadd.f32 %v433_v3, %v4678_v34  ;;  %v462_v29 = vadd.f32 %v434_v37, %v4680_v35  ;;  %v463_v7 = vadd.f32 %v435_v1, %v4682_v38  ;;  %v575_v28 = vpop.permute.xlu1 %574  ;;  %v6681_v62 = vld [vmem:[#allocation26_spill] sm:$0xff]  ;;  %v6684_v1 = vld [vmem:[#allocation29_spill] sm:$0xff] }
  0xf8   :  { %v464_v51 = vadd.f32 %v436_v50, %v4684_v39  ;;  %v738_v9 = vadd.f32 %v6680_v0, %v638_v44  ;;  %v837_v22 = vadd.f32 %v4754_v14, %v737_v49  ;;  %v844_v58 = vadd.f32 %v4676_v15, %v744_v55  ;;  %v6685_v44 = vld [vmem:[#allocation31_spill] sm:$0xff] }
  0xf9   :  { %v845_v54 = vadd.f32 %v4687_v2, %v745_v30  ;;  %v917_v52 = vmul.f32 %v4826_v27, %v4771_v17  ;;  %v623_v34 = vmul.f32 %v6681_v62, %v575_v28  ;;  %v624_v35 = vmul.f32 %v6682_v18, %v575_v28 }
  0xfa   :  { %v625_v38 = vmul.f32 %v6683_v48, %v575_v28  ;;  %v626_v39 = vmul.f32 %v6684_v1, %v575_v28  ;;  %v627_v50 = vmul.f32 %v6639_v6, %v575_v28  ;;  %v628_v4 = vmul.f32 %v6685_v44, %v575_v28  ;;  %v6687_v44 = vld [vmem:[#allocation58_spill] sm:$0xff] }
  0xfb   :  { %v4880_v14 = vmul.f32 %v6641_v32, %v575_v28  ;;  %v838_v30 = vadd.f32 %v4757_v23, %v738_v9  ;;  %v651_v15 = vadd.f32 %v623_v34, %v551_v59  ;;  %v652_v2 = vadd.f32 %v624_v35, %v552_v42  ;;  %v479_v0 = vpop.permute.xlu1 %478  ;;  %v6688_v28 = vld [vmem:[#allocation73_spill] sm:$0xff]  ;;  %v6689_v32 = vld [vmem:[#allocation66_spill] sm:$0xff] }
  0xfc   :  { %v653_v55 = vadd.f32 %v625_v38, %v553_v33  ;;  %v4883_v45 = vadd.f32 %v626_v39, %v554_v53  ;;  %v4885_v12 = vadd.f32 %v627_v50, %v555_v11  ;;  %v656_v3 = vadd.f32 %v628_v4, %v556_v40  ;;  %v6696_v35 = vld [vmem:[#allocation45_spill] sm:$0xff]  ;;  %v6697_v39 = vld [vmem:[#allocation19_spill] sm:$0xff] }
  0xfd   :  { %6686 = vst [vmem:[#allocation71_spill] sm:$0xff] %v4880_v14  ;;  %v937_v37 = vadd.f32 %v909_v25, %v837_v22  ;;  %v938_v49 = vadd.f32 %v910_v46, %v838_v30  ;;  %v4887_v1 = vadd.f32 %v916_v41, %v844_v58  ;;  %v4889_v6 = vadd.f32 %v917_v52, %v845_v54  ;;  %v6690_v41 = vld [vmem:[#allocation80_spill] sm:$0xff] }
  0xfe   :  { %v639_v14 = vadd.f32 %v6688_v28, %v6687_v44  ;;  %v846_v23 = vadd.f32 %v6689_v32, %v746_v63  ;;  %v530_v42 = vmul.f32 %v6600_v56, %v479_v0  ;;  %v531_v33 = vmul.f32 %v6602_v47, %v479_v0  ;;  %v4905_v32 = vld [vmem:[%s6320_s0 + $0x50] ss:$0 sm:$0xff]  ;;  %v6695_v52 = vld [vmem:[#allocation44_spill] sm:$0xff] }
  0xff   :  { %v532_v53 = vmul.f32 %v6603_v21, %v479_v0  ;;  %v533_v11 = vmul.f32 %v6604_v13, %v479_v0  ;;  %v534_v46 = vmul.f32 %v6605_v19, %v479_v0  ;;  %v535_v59 = vmul.f32 %v6606_v10, %v479_v0  ;;  %v4922_v9 = vpop.permute.xlu1 %674  ;;  %v6698_v44 = vld [vmem:[#allocation81_spill] sm:$0xff] }
 0x100   :  { %v536_v40 = vmul.f32 %v6607_v24, %v479_v0  ;;  %v739_v25 = vadd.f32 %v6690_v41, %v639_v14  ;;  %v4907_v56 = vadd.f32 %v530_v42, %v458_v20  ;;  %v4909_v47 = vadd.f32 %v531_v33, %v459_v31  ;;  %v6691_v31 = vld [vmem:[#allocation62_spill] sm:$0xff]  ;;  %v6699_v33 = vld [vmem:[#allocation15_spill] sm:$0xff] }
 0x101   :  { %v4911_v21 = vadd.f32 %v532_v53, %v460_v57  ;;  %v4913_v13 = vadd.f32 %v533_v11, %v461_v60  ;;  %v4915_v19 = vadd.f32 %v534_v46, %v462_v29  ;;  %v4917_v10 = vadd.f32 %v535_v59, %v463_v7  ;;  %v6692_v57 = vld [vmem:[#allocation74_spill] sm:$0xff]  ;;  %v6701_v46 = vld [vmem:[#allocation21_spill] sm:$0xff] }
 0x102   :  { %v4919_v24 = vadd.f32 %v536_v40, %v464_v51  ;;  %v839_v63 = vadd.f32 %v4760_v16, %v739_v25  ;;  %v4925_v22 = vadd.f32 %v4796_v5, %v846_v23  ;;  %v923_v20 = vmul.f32 %v4811_v61, %v4802_v36  ;;  %v6693_v51 = vld [vmem:[#allocation42_spill] sm:$0xff]  ;;  %v6694_v5 = vld [vmem:[#allocation43_spill] sm:$0xff]  ;;  %v6702_v25 = vld [vmem:[#allocation49_spill] sm:$0xff] }
 0x103   :  { %v640_v60 = vadd.f32 %v6692_v57, %v6691_v31  ;;  %v912_v29 = vmul.f32 %v4905_v32, %v4715_v26  ;;  %v723_v7 = vmul.f32 %v6660_v8, %v4922_v9  ;;  %v724_v16 = vmul.f32 %v6661_v43, %v4922_v9  ;;  %v4952_v14 = vld [vmem:[%s6320_s0 + $0x58] ss:$0 sm:$0xff]  ;;  %v4963_v41 = vpop.permute.xlu1 %971  ;;  %v6705_v31 = vld [vmem:[#allocation75_spill] sm:$0xff] }
 0x104   :  { %v725_v58 = vmul.f32 %v6693_v51, %v4922_v9  ;;  %v726_v54 = vmul.f32 %v6694_v5, %v4922_v9  ;;  %v4943_v34 = vmul.f32 %v6695_v52, %v4922_v9  ;;  %v728_v38 = vmul.f32 %v6696_v35, %v4922_v9  ;;  %v6700_v11 = vld [vmem:[#allocation50_spill] sm:$0xff] }
 0x105   :  { %v939_v50 = vadd.f32 %v6697_v39, %v839_v63  ;;  %v740_v4 = vadd.f32 %v6698_v44, %v640_v60  ;;  %v751_v0 = vadd.f32 %v723_v7, %v651_v15  ;;  %v752_v28 = vadd.f32 %v724_v16, %v652_v2  ;;  %v6704_v2 = vld [vmem:[#allocation63_spill] sm:$0xff]  ;;  %v6706_v44 = vld [vmem:[#allocation70_spill] sm:$0xff] }
 0x106   :  { %v753_v30 = vadd.f32 %v725_v58, %v653_v55  ;;  %v924_v23 = vmul.f32 %v4826_v27, %v4802_v36  ;;  %v4956_v42 = vadd.f32 %v728_v38, %v656_v3  ;;  %v747_v59 = vadd.f32 %v6701_v46, %v6700_v11  ;;  %v6703_v55 = vld [vmem:[#allocation35_spill] sm:$0xff]  ;;  %v6708_v11 = vld [vmem:[#allocation36_spill] sm:$0xff] }
 0x107   :  { %v840_v53 = vadd.f32 %v6699_v33, %v740_v4  ;;  %v919_v40 = vmul.f32 %v4905_v32, %v4771_v17  ;;  %v851_v63 = vadd.f32 %v6702_v25, %v751_v0  ;;  %v852_v15 = vadd.f32 %v6703_v55, %v752_v28  ;;  %v6707_v0 = vld [vmem:[#allocation82_spill] sm:$0xff]  ;;  %v6709_v25 = vld [vmem:[#allocation33_spill] sm:$0xff] }
 0x108   :  { %v641_v57 = vadd.f32 %v6705_v31, %v6704_v2  ;;  %v913_v3 = vmul.f32 %v4952_v14, %v4715_v26  ;;  %v989_v60 = vmul.f32 %v4963_v41, %v937_v37  ;;  %v990_v7 = vmul.f32 %v4963_v41, %v938_v49  ;;  %v6710_v55 = vld [vmem:[#allocation22_spill] sm:$0xff]  ;;  %v6714_v31 = vld [vmem:[#allocation64_spill] sm:$0xff] }
 0x109   :  { %v991_v16 = vmul.f32 %v4963_v41, %v939_v50  ;;  %v940_v58 = vadd.f32 %v912_v29, %v840_v53  ;;  %v4974_v38 = vadd.f32 %v923_v20, %v851_v63  ;;  %v4976_v39 = vadd.f32 %v924_v23, %v852_v15  ;;  %v6711_v20 = vld [vmem:[#allocation16_spill] sm:$0xff]  ;;  %v6712_v63 = vld [vmem:[#allocation25_spill] sm:$0xff] }
 0x10a   :  { %v847_v4 = vadd.f32 %v6706_v44, %v747_v59  ;;  %v741_v28 = vadd.f32 %v6707_v0, %v641_v57  ;;  %v853_v46 = vadd.f32 %v6708_v11, %v753_v30  ;;  %v748_v37 = vadd.f32 %v6710_v55, %v6709_v25  ;;  %v579_v59 = vpop.permute.xlu1 %578  ;;  %v6713_v30 = vld [vmem:[#allocation67_spill] sm:$0xff]  ;;  %v6715_v57 = vld [vmem:[#allocation76_spill] sm:$0xff]  ;;  %v6716_v44 = vld [vmem:[#allocation41_spill] sm:$0xff] }
 0x10b   :  { %v992_v33 = vmul.f32 %v4963_v41, %v940_v58  ;;  %v920_v49 = vmul.f32 %v4952_v14, %v4771_v17  ;;  %v754_v23 = vadd.f32 %v726_v54, %v4883_v45  ;;  %v926_v53 = vmul.f32 %v4905_v32, %v4802_v36  ;;  %v6717_v0 = vld [vmem:[#allocation47_spill] sm:$0xff]  ;;  %v6718_v54 = vld [vmem:[#allocation29_spill] sm:$0xff]  ;;  %v6719_v25 = vld [vmem:[#allocation30_spill] sm:$0xff] }
 0x10c   :  { %v4986_v50 = vadd.f32 %v919_v40, %v847_v4  ;;  %v841_v29 = vadd.f32 %v6711_v20, %v741_v28  ;;  %v4993_v15 = vadd.f32 %v6712_v63, %v853_v46  ;;  %v848_v2 = vadd.f32 %v6713_v30, %v748_v37  ;;  %v6720_v46 = vld [vmem:[#allocation31_spill] sm:$0xff]  ;;  %v6721_v63 = vld [vmem:[#allocation32_spill] sm:$0xff] }
 0x10d   :  { %v642_v58 = vadd.f32 %v6715_v57, %v6714_v31  ;;  %v849_v40 = vadd.f32 %v6717_v0, %v6716_v44  ;;  %v630_v4 = vmul.f32 %v6681_v62, %v579_v59  ;;  %v631_v28 = vmul.f32 %v6682_v18, %v579_v59 }
 0x10e   :  { %v632_v45 = vmul.f32 %v6683_v48, %v579_v59  ;;  %v633_v11 = vmul.f32 %v6718_v54, %v579_v59  ;;  %v634_v55 = vmul.f32 %v6719_v25, %v579_v59  ;;  %v635_v20 = vmul.f32 %v6720_v46, %v579_v59  ;;  %v5018_v25 = vpop.permute.xlu1 %1023 }
 0x10f   :  { %v5007_v37 = vmul.f32 %v6721_v63, %v579_v59  ;;  %v941_v30 = vadd.f32 %v913_v3, %v841_v29  ;;  %v658_v31 = vadd.f32 %v630_v4, %v4907_v56  ;;  %v659_v57 = vadd.f32 %v631_v28, %v4909_v47  ;;  %v6722_v59 = vld [vmem:[#allocation37_spill] sm:$0xff]  ;;  %v6723_v29 = vld [vmem:[#allocation83_spill] sm:$0xff]  ;;  %v6724_v4 = vld [vmem:[#allocation24_spill] sm:$0xff] }
 0x110   :  { %v660_v62 = vadd.f32 %v632_v45, %v4911_v21  ;;  %v661_v18 = vadd.f32 %v633_v11, %v4913_v13  ;;  %v5014_v48 = vadd.f32 %v634_v55, %v4915_v19  ;;  %v663_v44 = vadd.f32 %v635_v20, %v4917_v10  ;;  %v6725_v21 = vld [vmem:[#allocation68_spill] sm:$0xff]  ;;  %v6726_v28 = vld [vmem:[#allocation77_spill] sm:$0xff] }
 0x111   :  { %v993_v0 = vmul.f32 %v4963_v41, %v941_v30  ;;  %v948_v54 = vadd.f32 %v920_v49, %v848_v2  ;;  %v854_v3 = vadd.f32 %v6722_v59, %v754_v23  ;;  %v742_v56 = vadd.f32 %v6723_v29, %v642_v58  ;;  %v6727_v23 = vld [vmem:[#allocation17_spill] sm:$0xff]  ;;  %v6728_v55 = vld [vmem:[#allocation84_spill] sm:$0xff] }
 0x112   :  { %v5023_v47 = vadd.f32 %v6724_v4, %v849_v40  ;;  %v643_v13 = vadd.f32 %v6726_v28, %v6725_v21  ;;  %v1041_v19 = vadd.f32 %v5018_v25, %v989_v60  ;;  %v1042_v45 = vadd.f32 %v5018_v25, %v990_v7 }
 0x113   :  { %v1043_v10 = vadd.f32 %v5018_v25, %v991_v16  ;;  %v1044_v49 = vadd.f32 %v5018_v25, %v992_v33  ;;  %v1045_v2 = vadd.f32 %v5018_v25, %v993_v0  ;;  %v5032_v11 = vadd.f32 %v926_v53, %v854_v3  ;;  %v679_v16 = vpop.permute.xlu1 %678 }
 0x114   :  { %v842_v58 = vadd.f32 %v6727_v23, %v742_v56  ;;  %v5036_v40 = vadd.f32 %v6728_v55, %v643_v13  ;;  %vm1069_vm0 = vcmp.gt.f32.partialorder %v1041_v19, 0.5  ;;  %vm1070_vm1 = vcmp.gt.f32.partialorder %v1042_v45, 0.5  ;;  %v6730_v56 = vld [vmem:[#allocation46_spill] sm:$0xff] }
 0x115   :  { %vm1097_vm2 = vcmp.lt.f32.partialorder %v1041_v19, -0.5  ;;  %vm1098_vm3 = vcmp.lt.f32.partialorder %v1042_v45, -0.5  ;;  %v6729_v60 = vmov 0.0   ;;  %vm1071_vm4 = vcmp.gt.f32.partialorder %v1043_v10, 0.5 }
 0x116   :  { %v1125_v46 = vsel %vm1097_vm2, -1.0, %v6729_v60  ;;  %v1126_v7 = vsel %vm1098_vm3, -1.0, %v6729_v60  ;;  %vm1099_vm5 = vcmp.lt.f32.partialorder %v1043_v10, -0.5  ;;  %vm1072_vm6 = vcmp.gt.f32.partialorder %v1044_v49, 0.5 }
 0x117   :  { %v5040_v33 = vsel %vm1069_vm0, 1.0, %v1125_v46  ;;  %v5042_v53 = vsel %vm1070_vm1, 1.0, %v1126_v7  ;;  %v1127_v20 = vsel %vm1099_vm5, -1.0, %v6729_v60  ;;  %v730_v63 = vmul.f32 %v6660_v8, %v679_v16  ;;  %v5069_v13 = vpop.permute.xlu1 %976 }
 0x118   :  { %v731_v30 = vmul.f32 %v6661_v43, %v679_v16  ;;  %v732_v0 = vmul.f32 %v6693_v51, %v679_v16  ;;  %v733_v59 = vmul.f32 %v6694_v5, %v679_v16  ;;  %v5050_v3 = vmul.f32 %v6695_v52, %v679_v16 }
 0x119   :  { %v735_v29 = vmul.f32 %v6696_v35, %v679_v16  ;;  %v5054_v4 = vmul.f32 %v6730_v56, %v679_v16  ;;  %v3688_v21 = vpack.i.bf16 %v5042_v53, %v5040_v33  ;;  %v5061_v8 = vsel %vm1071_vm4, 1.0, %v1127_v20 }
 0x11a   :  { %v5058_v28 = vadd.f32 %v732_v0, %v660_v62  ;;  %v758_v43 = vadd.f32 %v730_v63, %v658_v31  ;;  %vm1100_vm7 = vcmp.lt.f32.partialorder %v1044_v49, -0.5  ;;  %v3703_v5 = vpack.i.bf16 %v5061_v8, %v5042_v53  ;;  %v5071_v62 = vpop.permute.xlu0 %1028 }
 0x11b   :  { %v5063_v51 = vadd.f32 %v735_v29, %v663_v44  ;;  %3689 = vrot.lane.b32.xlu0 %v3688_v21, %s4016_s3  ;;  %v1128_v52 = vsel %vm1100_vm7, -1.0, %v6729_v60  ;;  %v759_v35 = vadd.f32 %v731_v30, %v659_v57  ;;  %vm1073_vm8 = vcmp.gt.f32.partialorder %v1045_v2, 0.5  ;;  %v6733_v30 = vld [vmem:[#allocation55_spill] sm:$0xff]  ;;  %v6735_v21 = vld [vmem:[#allocation57_spill] sm:$0xff] }
 0x11c   :  { %v5074_v19 = vsel %vm1072_vm6, 1.0, %v1128_v52  ;;  %vm1101_vm9 = vcmp.lt.f32.partialorder %v1045_v2, -0.5  ;;  %v5076_v31 = vadd.f32 %v733_v59, %v661_v18  ;;  %v996_v44 = vmul.f32 %v5069_v13, %v4887_v1  ;;  %v6731_v2 = vld [vmem:[#allocation13_spill] sm:$0xff]  ;;  %v6734_v59 = vld [vmem:[#allocation56_spill] sm:$0xff] }
 0x11d   :  { %v997_v45 = vmul.f32 %v5069_v13, %v4889_v6  ;;  %v998_v57 = vmul.f32 %v5069_v13, %v4925_v22  ;;  %v999_v49 = vmul.f32 %v5069_v13, %v4986_v50  ;;  %v1129_v23 = vsel %vm1101_vm9, -1.0, %v6729_v60 }
 0x11e   :  { %v1000_v18 = vmul.f32 %v5069_v13, %v948_v54  ;;  %v942_v55 = vadd.f32 %v6731_v2, %v842_v58  ;;  %v1048_v1 = vadd.f32 %v5071_v62, %v996_v44  ;;  %v5094_v7 = vsel %vm1073_vm8, 1.0, %v1129_v23  ;;  %v5103_v54 = vpop.permute.xlu1 %778  ;;  %v6732_v58 = vld [vmem:[#allocation54_spill] sm:$0xff]  ;;  %v6736_v44 = vld [vmem:[#allocation59_spill] sm:$0xff] }
 0x11f   :  { %v1049_v46 = vadd.f32 %v5071_v62, %v997_v45  ;;  %v1050_v6 = vadd.f32 %v5071_v62, %v998_v57  ;;  %v1051_v22 = vadd.f32 %v5071_v62, %v999_v49  ;;  %v830_v63 = vmul.f32 %v6732_v58, %v5103_v54  ;;  %v6737_v57 = vld [vmem:[#allocation60_spill] sm:$0xff] }
 0x120   :  { %v1052_v50 = vadd.f32 %v5071_v62, %v1000_v18  ;;  %v5101_v20 = vmul.f32 %v4963_v41, %v942_v55  ;;  %vm1076_vm10 = vcmp.gt.f32.partialorder %v1048_v1, 0.5  ;;  %vm1104_vm12 = vcmp.lt.f32.partialorder %v1048_v1, -0.5 }
 0x121   :  { %vm1077_vm11 = vcmp.gt.f32.partialorder %v1049_v46, 0.5  ;;  %vm1105_vm13 = vcmp.lt.f32.partialorder %v1049_v46, -0.5  ;;  %v831_v0 = vmul.f32 %v6733_v30, %v5103_v54  ;;  %v832_v29 = vmul.f32 %v6734_v59, %v5103_v54 }
 0x122   :  { %v833_v52 = vmul.f32 %v6735_v21, %v5103_v54  ;;  %v5115_v45 = vmul.f32 %v6736_v44, %v5103_v54  ;;  %v5119_v49 = vmul.f32 %v6737_v57, %v5103_v54  ;;  %v1132_v23 = vsel %vm1104_vm12, -1.0, %v6729_v60  ;;  %v5134_v59 = vpop.permute.xlu1 %878 }
 0x123   :  { %v1133_v18 = vsel %vm1105_vm13, -1.0, %v6729_v60  ;;  %v5123_v2 = vsel %vm1076_vm10, 1.0, %v1132_v23  ;;  %vm1078_vm14 = vcmp.gt.f32.partialorder %v1050_v6, 0.5  ;;  %vm1106_vm15 = vcmp.lt.f32.partialorder %v1050_v6, -0.5  ;;  %v6738_v6 = vld [vmem:[#allocation38_spill] sm:$0xff] }
 0x124   :  { %v5125_v55 = vsel %vm1077_vm11, 1.0, %v1133_v18  ;;  %v3683_v46 = vpack.i.bf16 %v5123_v2, %v5040_v33  ;;  %v1134_v30 = vsel %vm1106_vm15, -1.0, %v6729_v60  ;;  %v858_v44 = vadd.f32 %v830_v63, %v758_v43  ;;  %v6739_v18 = vld [vmem:[#allocation39_spill] sm:$0xff]  ;;  %v5162_v43 = vpop.permute.xlu0 %1033 }
 0x125   :  { %v3698_v1 = vpack.i.bf16 %v5125_v55, %v5123_v2  ;;  %v3693_v58 = vpack.i.bf16 %v5125_v55, %v5042_v53  ;;  %v5136_v21 = vsel %vm1078_vm14, 1.0, %v1134_v30  ;;  %v859_v57 = vadd.f32 %v831_v0, %v759_v35 }
 0x126   :  { %vm1079_vm0 = vcmp.gt.f32.partialorder %v1051_v22, 0.5  ;;  %v932_v23 = vmul.f32 %v6738_v6, %v5134_v59  ;;  %v5142_v16 = vmul.f32 %v6739_v18, %v5134_v59  ;;  %3684 = vrot.lane.b32.xlu1 %v3683_v46, %s4017_s5  ;;  %v5148_v10 = vpack.i.bf16 %v5136_v21, %v5061_v8 }
 0x127   :  { %3699 = vrot.lane.b32.xlu0 %v3698_v1, %s4016_s3  ;;  %vm1107_vm1 = vcmp.lt.f32.partialorder %v1051_v22, -0.5  ;;  %v930_v35 = vmul.f32 %v4811_v61, %v5134_v59  ;;  %v931_v63 = vmul.f32 %v4826_v27, %v5134_v59  ;;  %v860_v1 = vadd.f32 %v832_v29, %v5058_v28  ;;  %v5165_v61 = vpop.permute.xlu1 %981 }
 0x128   :  { %v1135_v0 = vsel %vm1107_vm1, -1.0, %v6729_v60  ;;  %vm1080_vm2 = vcmp.gt.f32.partialorder %v1052_v50, 0.5  ;;  %vm1108_vm3 = vcmp.lt.f32.partialorder %v1052_v50, -0.5  ;;  %v1003_v22 = vmul.f32 %v5165_v61, %v4974_v38 }
 0x129   :  { %v958_v46 = vadd.f32 %v930_v35, %v858_v44  ;;  %v959_v30 = vadd.f32 %v931_v63, %v859_v57  ;;  %v5159_v6 = vsel %vm1079_vm0, 1.0, %v1135_v0  ;;  %v1136_v18 = vsel %vm1108_vm3, -1.0, %v6729_v60 }
 0x12a   :  { %3694 = vrot.lane.b32.xlu1 %v3693_v58, %s4018_s20  ;;  %v3753_v27 = vpack.i.bf16 %v5159_v6, %v5074_v19  ;;  %v960_v28 = vadd.f32 %v932_v23, %v860_v1  ;;  %v5171_v29 = vsel %vm1080_vm2, 1.0, %v1136_v18  ;;  %v1004_v44 = vmul.f32 %v5165_v61, %v4976_v39  ;;  %v6740_v18 = vld [vmem:[#allocation18_spill] sm:$0xff] }
 0x12b   :  { %v1005_v58 = vmul.f32 %v5165_v61, %v4993_v15  ;;  %v861_v35 = vadd.f32 %v833_v52, %v5076_v31  ;;  %v933_v63 = vmul.f32 %v4905_v32, %v5134_v59  ;;  %v1006_v38 = vmul.f32 %v5165_v61, %v5032_v11  ;;  %v5199_v32 = vpop.permute.xlu1 %986 }
 0x12c   :  { %v1055_v0 = vadd.f32 %v5162_v43, %v1003_v22  ;;  %v1056_v39 = vadd.f32 %v5162_v43, %v1004_v44  ;;  %v5193_v1 = vadd.f32 %v5018_v25, %v5101_v20  ;;  %v1001_v52 = vmul.f32 %v5069_v13, %v5023_v47  ;;  %v5209_v44 = vpop.permute.xlu0 %1038 }
 0x12d   :  { %v1057_v15 = vadd.f32 %v5162_v43, %v1005_v58  ;;  %v961_v31 = vadd.f32 %v933_v63, %v861_v35  ;;  %v1058_v11 = vadd.f32 %v5162_v43, %v1006_v38  ;;  %v5206_v22 = vadd.f32 %v6740_v18, %v5036_v40 }
 0x12e   :  { %3704 = vrot.lane.b32.xlu1 %v3703_v5, %s4019_s21  ;;  %v1010_v20 = vmul.f32 %v5199_v32, %v958_v46  ;;  %vm1083_vm4 = vcmp.gt.f32.partialorder %v1055_v0, 0.5  ;;  %vm1111_vm5 = vcmp.lt.f32.partialorder %v1055_v0, -0.5  ;;  %vm1084_vm6 = vcmp.gt.f32.partialorder %v1056_v39, 0.5 }
 0x12f   :  { %v1139_v53 = vsel %vm1111_vm5, -1.0, %v6729_v60  ;;  %vm1112_vm7 = vcmp.lt.f32.partialorder %v1056_v39, -0.5  ;;  %v1011_v5 = vmul.f32 %v5199_v32, %v959_v30  ;;  %vm1085_vm8 = vcmp.gt.f32.partialorder %v1057_v15, 0.5 }
 0x130   :  { %v1062_v58 = vadd.f32 %v5209_v44, %v1010_v20  ;;  %v5214_v47 = vsel %vm1083_vm4, 1.0, %v1139_v53  ;;  %v1140_v40 = vsel %vm1112_vm7, -1.0, %v6729_v60  ;;  %vm1113_vm9 = vcmp.lt.f32.partialorder %v1057_v15, -0.5 }
 0x131   :  { %v5219_v46 = vsel %vm1084_vm6, 1.0, %v1140_v40  ;;  %v1063_v35 = vadd.f32 %v5209_v44, %v1011_v5  ;;  %v1141_v63 = vsel %vm1113_vm9, -1.0, %v6729_v60  ;;  %v1012_v30 = vmul.f32 %v5199_v32, %v960_v28 }
 0x132   :  { %3714 = vrot.lane.b32.xlu1 %v5148_v10, %s4020_s22  ;;  %vm1090_vm10 = vcmp.gt.f32.partialorder %v1062_v58, 0.5  ;;  %vm1118_vm11 = vcmp.lt.f32.partialorder %v1062_v58, -0.5  ;;  %v3718_v38 = vpack.i.bf16 %v5219_v46, %v5214_v47  ;;  %v5226_v0 = vsel %vm1085_vm8, 1.0, %v1141_v63 }
 0x133   :  { %v1146_v39 = vsel %vm1118_vm11, -1.0, %v6729_v60  ;;  %vm1091_vm12 = vcmp.gt.f32.partialorder %v1063_v35, 0.5  ;;  %vm1119_vm13 = vcmp.lt.f32.partialorder %v1063_v35, -0.5  ;;  %v3748_v15 = vpack.i.bf16 %v5226_v0, %v5219_v46 }
 0x134   :  { %v5231_v18 = vsel %vm1090_vm10, 1.0, %v1146_v39  ;;  %v1147_v20 = vsel %vm1119_vm13, -1.0, %v6729_v60  ;;  %v1064_v28 = vadd.f32 %v5209_v44, %v1012_v30  ;;  %v1013_v53 = vmul.f32 %v5199_v32, %v961_v31 }
 0x135   :  { %v6741_v5 = vpack.i.bf16 %v5136_v21, %v5125_v55  ;;  %v3708_v58 = vpack.i.bf16 %v5231_v18, %v5214_v47  ;;  %v5242_v40 = vsel %vm1091_vm12, 1.0, %v1147_v20  ;;  %vm1086_vm14 = vcmp.gt.f32.partialorder %v1058_v11, 0.5 }
 0x136   :  { %vm1114_vm15 = vcmp.lt.f32.partialorder %v1058_v11, -0.5  ;;  %v3743_v35 = vpack.i.bf16 %v5242_v40, %v5231_v18  ;;  %v3738_v63 = vpack.i.bf16 %v5242_v40, %v5219_v46  ;;  %vm1092_vm0 = vcmp.gt.f32.partialorder %v1064_v28, 0.5 }
 0x137   :  { %3724 = vrot.lane.b32.xlu1 %v6741_v5, %s4019_s21  ;;  %vm1120_vm1 = vcmp.lt.f32.partialorder %v1064_v28, -0.5  ;;  %3709 = vrot.lane.b32.xlu0 %v3708_v58, %s4017_s5  ;;  %v1065_v31 = vadd.f32 %v5209_v44, %v1013_v53  ;;  %v1142_v30 = vsel %vm1114_vm15, -1.0, %v6729_v60  ;;  %vm1074_vm2 = vcmp.gt.f32.partialorder %v5193_v1, 0.5  ;;  %v5262_v28 = vld [vmem:[%s6320_s0 + $0x68] ss:$0 sm:$0xff]  ;;  %s4022_s0 = smov 60  }
 0x138   :  { %v1148_v55 = vsel %vm1120_vm1, -1.0, %v6729_v60  ;;  %v5255_v11 = vsel %vm1086_vm14, 1.0, %v1142_v30  ;;  %vm1102_vm3 = vcmp.lt.f32.partialorder %v5193_v1, -0.5  ;;  %v1053_v20 = vadd.f32 %v5071_v62, %v1001_v52  ;;  %v6745_v1 = vld [vmem:[#allocation23_spill] sm:$0xff] }
 0x139   :  { %v5253_v39 = vsel %vm1092_vm0, 1.0, %v1148_v55  ;;  %v6742_v53 = vpack.i.bf16 %v5074_v19, %v5061_v8  ;;  %vm1093_vm4 = vcmp.gt.f32.partialorder %v1065_v31, 0.5  ;;  %vm1121_vm5 = vcmp.lt.f32.partialorder %v1065_v31, -0.5 }
 0x13a   :  { %v3773_v5 = vpack.i.bf16 %v5253_v39, %v5242_v40  ;;  %v5272_v58 = vpack.i.bf16 %v5253_v39, %v5226_v0  ;;  %v1130_v55 = vsel %vm1102_vm3, -1.0, %v6729_v60  ;;  %vm1081_vm6 = vcmp.gt.f32.partialorder %v1053_v20, 0.5 }
 0x13b   :  { %3734 = vrot.lane.b32.xlu1 %v6742_v53, %s4021_s24  ;;  %3719 = vrot.lane.b32.xlu0 %v3718_v38, %s4016_s3  ;;  %v1149_v8 = vsel %vm1121_vm5, -1.0, %v6729_v60  ;;  %v5281_v30 = vsel %vm1074_vm2, 1.0, %v1130_v55  ;;  %vm1109_vm7 = vcmp.lt.f32.partialorder %v1053_v20, -0.5  ;;  %v915_v53 = vmul.f32 %v5262_v28, %v4715_v26  ;;  %v6744_v20 = vld [vmem:[#allocation34_spill] sm:$0xff] }
 0x13c   :  { %v5285_v23 = vsel %vm1093_vm4, 1.0, %v1149_v8  ;;  %v1137_v52 = vsel %vm1109_vm7, -1.0, %v6729_v60  ;;  %v755_v38 = vadd.f32 %v4943_v34, %v4885_v12  ;;  %v6743_v12 = vld [vmem:[#allocation12_spill] sm:$0xff]  ;;  %v750_v57 = vadd.f32 %v6745_v1, %v6744_v20 }
 0x13d   :  { %v5297_v55 = vsel %vm1081_vm6, 1.0, %v1137_v52  ;;  %v943_v26 = vadd.f32 %v915_v53, %v5206_v22  ;;  %v762_v22 = vadd.f32 %v5050_v3, %v5014_v48  ;;  %v934_v53 = vmul.f32 %v4952_v14, %v5134_v59  ;;  %v6747_v3 = vld [vmem:[#allocation65_spill] sm:$0xff]  ;;  %v6749_v20 = vld [vmem:[#allocation48_spill] sm:$0xff] }
 0x13e   :  { %v5304_v31 = vpack.i.bf16 %v5297_v55, %v5281_v30  ;;  %v855_v34 = vadd.f32 %v6743_v12, %v755_v38  ;;  %v922_v38 = vmul.f32 %v5262_v28, %v4771_v17  ;;  %v6746_v12 = vld [vmem:[#allocation14_spill] sm:$0xff]  ;;  %v863_v48 = vadd.f32 %v5119_v49, %v5063_v51 }
 0x13f   :  { %3744 = vrot.lane.b32.xlu1 %v3743_v35, %s4016_s3  ;;  %v927_v35 = vmul.f32 %v4952_v14, %v4802_v36  ;;  %3729 = vrot.lane.b32.xlu0 %v5148_v10, %s4022_s0  ;;  %v995_v52 = vmul.f32 %v4963_v41, %v943_v26  ;;  %v856_v50 = vadd.f32 %v6746_v12, %v4956_v42  ;;  %v6748_v10 = vld [vmem:[#allocation20_spill] sm:$0xff] }
 0x140   :  { %v862_v14 = vadd.f32 %v5115_v45, %v762_v22  ;;  %v557_v1 = vadd.f32 %v6748_v10, %v6747_v3  ;;  %v850_v42 = vadd.f32 %v6749_v20, %v750_v57  ;;  %v6750_v26 = vld [vmem:[#allocation40_spill] sm:$0xff]  ;;  %v963_v45 = vadd.f32 %v5142_v16, %v863_v48  ;;  %v6752_v16 = vld [vmem:[#allocation71_spill] sm:$0xff]  ;;  %v6753_v3 = vld [vmem:[#allocation69_spill] sm:$0xff] }
 0x141   :  { %v955_v8 = vadd.f32 %v927_v35, %v855_v34  ;;  %v1047_v41 = vadd.f32 %v5018_v25, %v995_v52  ;;  %v956_v34 = vadd.f32 %v6750_v26, %v856_v50  ;;  %v729_v35 = vmul.f32 %v6730_v56, %v4922_v9 }
 0x142   :  { %v962_v25 = vadd.f32 %v934_v53, %v862_v14  ;;  %v6751_v50 = vpack.i.bf16 %v5094_v7, %v5074_v19  ;;  %v1015_v57 = vmul.f32 %v5199_v32, %v963_v45 }
 0x143   :  { %3754 = vrot.lane.b32.xlu1 %v3753_v27, %s4023_s25  ;;  %v1007_v17 = vmul.f32 %v5165_v61, %v955_v8  ;;  %3739 = vrot.lane.b32.xlu0 %v3738_v63, %s4018_s20  ;;  %vm1075_vm8 = vcmp.gt.f32.partialorder %v1047_v41, 0.5  ;;  %vm1103_vm9 = vcmp.lt.f32.partialorder %v1047_v41, -0.5  ;;  %v950_v27 = vadd.f32 %v922_v38, %v850_v42 }
 0x144   :  { %v1131_v51 = vsel %vm1103_vm9, -1.0, %v6729_v60  ;;  %v1008_v8 = vmul.f32 %v5165_v61, %v956_v34  ;;  %v1014_v56 = vmul.f32 %v5199_v32, %v962_v25  ;;  %v657_v63 = vadd.f32 %v6752_v16, %v557_v1 }
 0x145   :  { %v1059_v49 = vadd.f32 %v5162_v43, %v1007_v17  ;;  %v5346_v9 = vsel %vm1075_vm8, 1.0, %v1131_v51  ;;  %v1002_v22 = vmul.f32 %v5069_v13, %v950_v27  ;;  %v1067_v12 = vadd.f32 %v5209_v44, %v1015_v57  ;;  %v6754_v13 = vld [vmem:[#allocation61_spill] sm:$0xff] }
 0x146   :  { %v3833_v52 = vpack.i.bf16 %v5346_v9, %v5281_v30  ;;  %v1066_v53 = vadd.f32 %v5209_v44, %v1014_v56  ;;  %v1060_v38 = vadd.f32 %v5162_v43, %v1008_v8  ;;  %v757_v48 = vadd.f32 %v729_v35, %v657_v63 }
 0x147   :  { %3764 = vrot.lane.b32.xlu1 %v6751_v50, %s4024_s6  ;;  %vm1087_vm10 = vcmp.gt.f32.partialorder %v1059_v49, 0.5  ;;  %vm1115_vm11 = vcmp.lt.f32.partialorder %v1059_v49, -0.5  ;;  %3749 = vrot.lane.b32.xlu0 %v3748_v15, %s4019_s21  ;;  %v1054_v14 = vadd.f32 %v5071_v62, %v1002_v22  ;;  %v829_v10 = vmul.f32 %v6754_v13, %v6753_v3  ;;  %v1542_v3 = vld [vmem:[#allocation2 + $0x78] sm:$0xff] }
 0x148   :  { %v1143_v19 = vsel %vm1115_vm11, -1.0, %v6729_v60  ;;  %vm1094_vm12 = vcmp.gt.f32.partialorder %v1066_v53, 0.5  ;;  %vm1122_vm13 = vcmp.lt.f32.partialorder %v1066_v53, -0.5  ;;  %vm1088_vm14 = vcmp.gt.f32.partialorder %v1060_v38, 0.5 }
 0x149   :  { %v5362_v41 = vsel %vm1087_vm10, 1.0, %v1143_v19  ;;  %v1150_v15 = vsel %vm1122_vm13, -1.0, %v6729_v60  ;;  %vm1082_vm15 = vcmp.gt.f32.partialorder %v1054_v14, 0.5  ;;  %vm1110_vm0 = vcmp.lt.f32.partialorder %v1054_v14, -0.5 }
 0x14a   :  { %v3818_v46 = vpack.i.bf16 %v5362_v41, %v5255_v11  ;;  %vm1095_vm1 = vcmp.gt.f32.partialorder %v1067_v12, 0.5  ;;  %v6755_v62 = vpack.i.bf16 %v5159_v6, %v5136_v21  ;;  %v5378_v1 = vsel %vm1094_vm12, 1.0, %v1150_v15  ;;  %v1535_v15 = vld [vmem:[#allocation2 + $0x40] sm:$0xff] }
 0x14b   :  { %3774 = vrot.lane.b32.xlu1 %v3773_v5, %s4019_s21  ;;  %v1138_v40 = vsel %vm1110_vm0, -1.0, %v6729_v60  ;;  %vm1116_vm2 = vcmp.lt.f32.partialorder %v1060_v38, -0.5  ;;  %vm1123_vm3 = vcmp.lt.f32.partialorder %v1067_v12, -0.5  ;;  %v3843_v5 = vpack.i.bf16 %v5378_v1, %v5285_v23  ;;  %v1549_v38 = vld [vmem:[#allocation2 + $0xb0] sm:$0x7] }
 0x14c   :  { %3759 = vrot.lane.b32.xlu0 %v6755_v62, %s4021_s24  ;;  %v5383_v17 = vsel %vm1082_vm15, 1.0, %v1138_v40  ;;  %v3838_v20 = vpack.i.bf16 %v5378_v1, %v5362_v41  ;;  %v1144_v42 = vsel %vm1116_vm2, -1.0, %v6729_v60  ;;  %v6756_v21 = vpack.i.bf16 %v5171_v29, %v5094_v7  ;;  %v1551_v12 = vld [vmem:[#allocation2 + $0xc0] sm:$0x7]  ;;  %v1537_v62 = vld [vmem:[#allocation2 + $0x50] sm:$0xff]  ;;  %v1534_v40 = vld [vmem:[#allocation2 + $0x38] sm:$0xff] }
 0x14d   :  { %v3853_v26 = vpack.i.bf16 %v5383_v17, %v5346_v9  ;;  %v1151_v34 = vsel %vm1123_vm3, -1.0, %v6729_v60  ;;  %v5396_v35 = vsel %vm1088_vm14, 1.0, %v1144_v42  ;;  %v3858_v25 = vpack.i.bf16 %v5383_v17, %v5297_v55  ;;  %v1530_v42 = vld [vmem:[#allocation2 + $0x18] sm:$0xff] }
 0x14e   :  { %v5401_v45 = vsel %vm1095_vm1, 1.0, %v1151_v34  ;;  %v3848_v51 = vpack.i.bf16 %v5396_v35, %v5362_v41  ;;  %v857_v49 = vadd.f32 %v829_v10, %v757_v48  ;;  %v929_v27 = vmul.f32 %v5262_v28, %v4802_v36  ;;  %v1550_v48 = vld [vmem:[#allocation2 + $0xb8] sm:$0x7]  ;;  %v1543_v10 = vld [vmem:[#allocation2 + $0x80] sm:$0xff] }
 0x14f   :  { %3784 = vrot.lane.b32.xlu1 %v6756_v21, %s4025_s26  ;;  %v5411_v8 = vpack.i.bf16 %v5401_v45, %v5396_v35  ;;  %v3868_v50 = vpack.i.bf16 %v5401_v45, %v5378_v1  ;;  %v664_v56 = vadd.f32 %v5007_v37, %v4919_v24  ;;  %v836_v16 = vmul.f32 %v6754_v13, %v5103_v54  ;;  %v1541_v13 = vld [vmem:[#allocation2 + $0x70] sm:$0xff]  ;;  %v1527_v21 = vld [vmem:[#allocation2] sm:$0xff] }
 0x150   :  { %3769 = vrot.lane.b32.xlu0 %v5272_v58, %s4020_s22  ;;  %v957_v57 = vadd.f32 %v929_v27, %v857_v49  ;;  %v6757_v36 = vpack.i.bf16 %v5171_v29, %v5159_v6  ;;  %v936_v22 = vmul.f32 %v5262_v28, %v5134_v59  ;;  %v6758_v54 = vpack.i.bf16 %v5285_v23, %v5255_v11 }
 0x151   :  { %v764_v63 = vadd.f32 %v5054_v4, %v664_v56  ;;  %v6759_v4 = vpack.i.bf16 %v5255_v11, %v5226_v0  ;;  %v6761_v0 = vpack.i.bf16 %v5281_v30, %v5094_v7  ;;  %vm1705_vm8 = vcmask 1042432   ;;  %v1548_v7 = vld [vmem:[#allocation2 + $0xa8] sm:$0x7]  ;;  %v1529_v11 = vld [vmem:[#allocation2 + $0x10] sm:$0xff] }
 0x152   :  { %v1009_v19 = vmul.f32 %v5165_v61, %v957_v57  ;;  %3229 = vmatprep.subr.msk.mxu0 %vm1705_vm8, %v1549_v38  ;;  %3235 = vmatprep.subr.msk.mxu1 %vm1705_vm8, %v1551_v12  ;;  %v1536_v30 = vld [vmem:[#allocation2 + $0x48] sm:$0xff]  ;;  %vm1221_vm9 = vcmask 162816   ;;  %vm1270_vm10 = vcmask 326656   ;;  %vm1335_vm11 = vcmask 48128  }
 0x153   :  { %3794 = vrot.lane.b32.xlu1 %v6757_v36, %s4024_s6  ;;  %v864_v24 = vadd.f32 %v836_v16, %v764_v63  ;;  %3230 = vmatpush1.msk.msra.mxu0 %vm1705_vm8, %v1548_v7  ;;  %vm1384_vm12 = vcmask 211968   ;;  %vm1433_vm13 = vcmask 375808   ;;  %vm1498_vm14 = vcmask 97280  }
 0x154   :  { %3779 = vrot.lane.b32.xlu0 %v5272_v58, %s4022_s0  ;;  %v1061_v37 = vadd.f32 %v5162_v43, %v1009_v19  ;;  %v6760_v43 = vpack.i.bf16 %v5285_v23, %v5253_v39  ;;  %v6762_v39 = vpack.i.bf16 %v5297_v55, %v5171_v29  ;;  %v1544_v29 = vld [vmem:[#allocation2 + $0x88] sm:$0xff]  ;;  %3236 = vmatpush1.msk.msra.mxu1 %vm1705_vm8, %v1550_v48  ;;  %v1553_v23 = vld [vmem:[#allocation2 + $0xd0] sm:$0x7]  ;;  %vm1692_vm15 = vcmask 220160  }
 0x155   :  { %v964_v6 = vadd.f32 %v936_v22, %v864_v24  ;;  %1753 = vmatprep.subr.mxu0 %v1542_v3  ;;  %1842 = vmatprep.subr.mxu1 %v1544_v29  ;;  %vm2161_vm0 = vcmask 785408   ;;  %vm4032_vm1 = vmmov 0  }
 0x156   :  { %vm1089_vm4 = vcmp.gt.f32.partialorder %v1061_v37, 0.5  ;;  %vm1117_vm5 = vcmp.lt.f32.partialorder %v1061_v37, -0.5  ;;  %1754 = vmatpush1.msra.mxu0 %v1541_v13  ;;  %1843 = vmatpush1.msra.mxu1 %v1543_v10 }
 0x157   :  { %3804 = vrot.lane.b32.xlu1 %v6758_v54, %s4023_s25  ;;  %v1145_v59 = vsel %vm1117_vm5, -1.0, %v6729_v60  ;;  %v1016_v61 = vmul.f32 %v5199_v32, %v964_v6  ;;  %1755 = vmatprep.subr.mxu0 %v1535_v15 }
 0x158   :  { %3789 = vrot.lane.b32.xlu0 %v6759_v4, %s4021_s24  ;;  %v5440_v28 = vsel %vm1089_vm4, 1.0, %v1145_v59  ;;  %1844 = vmatprep.subr.mxu1 %v1537_v62 }
 0x159   :  { %v3878_v58 = vpack.i.bf16 %v5440_v28, %v5396_v35  ;;  %v1068_v53 = vadd.f32 %v5209_v44, %v1016_v61  ;;  %1756 = vmatpush1.msra.mxu0 %v1534_v40  ;;  %1845 = vmatpush1.msra.mxu1 %v1536_v30 }
 0x15a   :  { %1846 = vmatprep.subr.mxu1 %v1530_v42 }
 0x15b   :  { %3814 = vrot.lane.b32.xlu1 %v6760_v43, %s4021_s24  ;;  %vm1096_vm6 = vcmp.gt.f32.partialorder %v1068_v53, 0.5  ;;  %vm1124_vm7 = vcmp.lt.f32.partialorder %v1068_v53, -0.5  ;;  %1847 = vmatpush1.msra.mxu1 %v1529_v11 }
 0x15c   :  { %3799 = vrot.lane.b32.xlu0 %v6761_v0, %s4026_s27  ;;  %v1152_v32 = vsel %vm1124_vm7, -1.0, %v6729_v60 }
 0x15d   :  { %v1180_v14 = vsel %vm1096_vm6, 1.0, %v1152_v32 }
 0x15e   :  { %v3883_v44 = vpack.i.bf16 %v1180_v14, %v5401_v45 }
 0x15f   :  { %3824 = vrot.lane.b32.xlu1 %v6762_v39, %s4026_s27 }
 0x160   :  { %3809 = vrot.lane.b32.xlu0 %v5304_v31, %s4027_s28 }
 0x163   :  { %3834 = vrot.lane.b32.xlu1 %v3833_v52, %s4028_s1  ;;  %v1528_v52 = vld [vmem:[#allocation2 + $0x8] sm:$0xff] }
 0x164   :  { %3819 = vrot.lane.b32.xlu0 %v3818_v46, %s4024_s6  ;;  %1757 = vmatprep.subr.mxu0 %v1528_v52 }
 0x165   :  { %1758 = vmatpush1.msra.mxu0 %v1527_v21 }
 0x166   :  { %3241 = vmatprep.subr.msk.mxu0 %vm1705_vm8, %v1553_v23 }
 0x167   :  { %3844 = vrot.lane.b32.xlu1 %v3843_v5, %s4024_s6 }
 0x168   :  { %3829 = vrot.lane.b32.xlu0 %v5304_v31, %s4029_s29  ;;  %v5501_v31 = vld [vmem:[#allocation2 + $0xd8] sm:$0x7] }
 0x169   :  { %3529 = vmatprep.subr.msk.mxu1 %vm1705_vm8, %v5501_v31 }
 0x16b   :  { %3854 = vrot.lane.b32.xlu1 %v3853_v26, %s4030_s30 }
 0x16c   :  { %3839 = vrot.lane.b32.xlu0 %v3838_v20, %s4025_s26 }
 0x16f   :  { %3864 = vrot.lane.b32.xlu1 %v5411_v8, %s4027_s28 }
 0x170   :  { %3849 = vrot.lane.b32.xlu0 %v3848_v51, %s4026_s27 }
 0x173   :  { %3874 = vrot.lane.b32.xlu1 %v5411_v8, %s4029_s29 }
 0x174   :  { %3859 = vrot.lane.b32.xlu0 %v3858_v25, %s4028_s1 }
 0x177   :  { %1515 = vrot.lane.b32.xlu1 %v5440_v28, %s4030_s30 }
 0x178   :  { %3869 = vrot.lane.b32.xlu0 %v3868_v50, %s4026_s27 }
 0x17b   :  { %1517 = vrot.lane.b32.xlu1 %v1180_v14, %s4030_s30 }
 0x17c   :  { %3879 = vrot.lane.b32.xlu0 %v3878_v58, %s4028_s1 }
 0x180   :  { %3884 = vrot.lane.b32.xlu0 %v3883_v44, %s4028_s1 }
 0x18d   :  { %v3690_v46 = vpop.permute.xlu0 %3689 }
 0x18e   :  { %v3692_v49 = vunpack.i.h.bf16 %v3690_v46  ;;  %v3691_v27 = vunpack.i.l.bf16 %v3690_v46 }
 0x190   :  { %v1222_v57 = vsel %vm1221_vm9, %v3691_v27, %v3692_v49 }
 0x198   :  { %v3685_v55 = vpop.permute.xlu1 %3684 }
 0x199   :  { %v3700_v5 = vpop.permute.xlu0 %3699  ;;  %v3686_v35 = vunpack.i.l.bf16 %v3685_v55  ;;  %v3687_v24 = vunpack.i.h.bf16 %v3685_v55 }
 0x19a   :  { %v3702_v54 = vunpack.i.h.bf16 %v3700_v5  ;;  %v3701_v6 = vunpack.i.l.bf16 %v3700_v5 }
 0x19b   :  { %v1197_v50 = vmax.f32 %v5040_v33, %v3686_v35  ;;  %v1198_v61 = vmax.f32 %v5123_v2, %v3687_v24 }
 0x19c   :  { %v3695_v9 = vpop.permute.xlu1 %3694  ;;  %v1223_v43 = vsel %vm1221_vm9, %v3701_v6, %v3702_v54 }
 0x19d   :  { %v3696_v22 = vunpack.i.l.bf16 %v3695_v9  ;;  %v1230_v19 = vmax.f32 %v1197_v50, %v1222_v57  ;;  %v3697_v39 = vunpack.i.h.bf16 %v3695_v9  ;;  %v1231_v14 = vmax.f32 %v1198_v61, %v1223_v43 }
 0x19f   :  { %v1246_v33 = vmax.f32 %v1230_v19, %v3696_v22  ;;  %v1247_v10 = vmax.f32 %v1231_v14, %v3697_v39 }
 0x1a0   :  { %v3705_v41 = vpop.permute.xlu1 %3704 }
 0x1a1   :  { %v3707_v16 = vunpack.i.h.bf16 %v3705_v41  ;;  %v3706_v36 = vunpack.i.l.bf16 %v3705_v41 }
 0x1a3   :  { %v1271_v4 = vsel %vm1270_vm10, %v3706_v36, %v3707_v16 }
 0x1a4   :  { %v5511_v1 = vpop.permute.xlu1 %3714  ;;  %v1279_v53 = vmax.f32 %v1246_v33, %v1271_v4 }
 0x1a5   :  { %v3716_v58 = vunpack.i.l.bf16 %v5511_v1 }
 0x1a7   :  { %v1295_v7 = vmax.f32 %v1279_v53, %v3716_v58 }
 0x1a9   :  { %v3725_v17 = vpop.permute.xlu1 %3724  ;;  %v5513_v20 = vpop.permute.xlu0 %3709 }
 0x1aa   :  { %v3727_v32 = vunpack.i.h.bf16 %v3725_v17  ;;  %v3726_v38 = vunpack.i.l.bf16 %v3725_v17  ;;  %v3712_v62 = vunpack.i.h.bf16 %v5513_v20  ;;  %v3711_v30 = vunpack.i.l.bf16 %v5513_v20 }
 0x1ab   :  { %v3717_v17 = vunpack.i.h.bf16 %v5511_v1 }
 0x1ac   :  { %v1272_v29 = vsel %vm1270_vm10, %v3726_v38, %v3727_v32  ;;  %v1199_v49 = vmax.f32 %v5214_v47, %v3711_v30 }
 0x1ad   :  { %v3735_v26 = vpop.permute.xlu1 %3734  ;;  %v5515_v34 = vpop.permute.xlu0 %3719  ;;  %v1280_v40 = vmax.f32 %v1247_v10, %v1272_v29 }
 0x1ae   :  { %v3737_v48 = vunpack.i.h.bf16 %v3735_v26  ;;  %v3736_v2 = vunpack.i.l.bf16 %v3735_v26  ;;  %v3722_v42 = vunpack.i.h.bf16 %v5515_v34  ;;  %v3721_v11 = vunpack.i.l.bf16 %v5515_v34 }
 0x1af   :  { %v1200_v34 = vmax.f32 %v5231_v18, %v3712_v62  ;;  %v1296_v57 = vmax.f32 %v1280_v40, %v3717_v17 }
 0x1b0   :  { %v1336_v52 = vsel %vm1335_vm11, %v3736_v2, %v3737_v48  ;;  %v1224_v50 = vsel %vm1221_vm9, %v3721_v11, %v3722_v42 }
 0x1b1   :  { %v5517_v25 = vpop.permute.xlu1 %3744  ;;  %v5519_v45 = vpop.permute.xlu0 %3729  ;;  %v1232_v4 = vmax.f32 %v1199_v49, %v1224_v50 }
 0x1b2   :  { %v3731_v12 = vunpack.i.l.bf16 %v5519_v45  ;;  %v3747_v23 = vunpack.i.h.bf16 %v5517_v25  ;;  %v3746_v55 = vunpack.i.l.bf16 %v5517_v25  ;;  %v3732_v25 = vunpack.i.h.bf16 %v5519_v45 }
 0x1b4   :  { %v1311_v13 = vmax.f32 %v1295_v7, %v3731_v12  ;;  %v1312_v6 = vmax.f32 %v1296_v57, %v3732_v25 }
 0x1b5   :  { %v5521_v51 = vpop.permute.xlu1 %3754  ;;  %v5523_v8 = vpop.permute.xlu0 %3739 }
 0x1b6   :  { %v1344_v9 = vmax.f32 %v1311_v13, %v1336_v52  ;;  %v3756_v20 = vunpack.i.l.bf16 %v5521_v51  ;;  %v3741_v1 = vunpack.i.l.bf16 %v5523_v8  ;;  %v3742_v43 = vunpack.i.h.bf16 %v5523_v8 }
 0x1b7   :  { %v3757_v32 = vunpack.i.h.bf16 %v5521_v51 }
 0x1b8   :  { %v1360_v16 = vmax.f32 %v1344_v9, %v3756_v20  ;;  %v1248_v38 = vmax.f32 %v1232_v4, %v3741_v1 }
 0x1b9   :  { %v5526_v56 = vpop.permute.xlu1 %3764  ;;  %v5529_v63 = vpop.permute.xlu0 %3749 }
 0x1ba   :  { %v3767_v41 = vunpack.i.h.bf16 %v5526_v56  ;;  %v3766_v46 = vunpack.i.l.bf16 %v5526_v56  ;;  %v1225_v56 = vsel %vm1221_vm9, %v3746_v55, %v3747_v23  ;;  %v3752_v47 = vunpack.i.h.bf16 %v5529_v63 }
 0x1bb   :  { %v3751_v18 = vunpack.i.l.bf16 %v5529_v63  ;;  %v1233_v58 = vmax.f32 %v1200_v34, %v1225_v56 }
 0x1bc   :  { %v1385_v36 = vsel %vm1384_vm12, %v3766_v46, %v3767_v41 }
 0x1bd   :  { %v5531_v37 = vpop.permute.xlu1 %3774  ;;  %v1393_v53 = vmax.f32 %v1360_v16, %v1385_v36  ;;  %v1273_v14 = vsel %vm1270_vm10, %v3751_v18, %v3752_v47  ;;  %v1249_v10 = vmax.f32 %v1233_v58, %v3742_v43 }
 0x1be   :  { %v3760_v59 = vpop.permute.xlu0 %3759  ;;  %v3776_v33 = vunpack.i.l.bf16 %v5531_v37  ;;  %v1281_v30 = vmax.f32 %v1248_v38, %v1273_v14  ;;  %v1552_v38 = vld [vmem:[#allocation2 + $0xc8] sm:$0x7] }
 0x1bf   :  { %v3762_v26 = vunpack.i.h.bf16 %v3760_v59  ;;  %v3761_v35 = vunpack.i.l.bf16 %v3760_v59  ;;  %v3777_v59 = vunpack.i.h.bf16 %v5531_v37 }
 0x1c1   :  { %v5535_v28 = vpop.permute.xlu1 %3784  ;;  %v1337_v45 = vsel %vm1335_vm11, %v3761_v35, %v3762_v26  ;;  %v1274_v2 = vsel %vm1270_vm10, %v3776_v33, %v3777_v59 }
 0x1c2   :  { %v5539_v0 = vpop.permute.xlu0 %3769  ;;  %v3786_v54 = vunpack.i.l.bf16 %v5535_v28  ;;  %v1345_v63 = vmax.f32 %v1312_v6, %v1337_v45  ;;  %v1282_v23 = vmax.f32 %v1249_v10, %v1274_v2  ;;  %v3787_v36 = vunpack.i.h.bf16 %v5535_v28  ;;  %v1547_v2 = vld [vmem:[#allocation2 + $0xa0] sm:$0xff] }
 0x1c3   :  { %v3771_v8 = vunpack.i.l.bf16 %v5539_v0 }
 0x1c4   :  { %v1409_v7 = vmax.f32 %v1393_v53, %v3786_v54  ;;  %v1361_v52 = vmax.f32 %v1345_v63, %v3757_v32 }
 0x1c5   :  { %v5542_v44 = vpop.permute.xlu1 %3794  ;;  %v1297_v9 = vmax.f32 %v1281_v30, %v3771_v8  ;;  %v1545_v8 = vld [vmem:[#allocation2 + $0x90] sm:$0xff] }
 0x1c6   :  { %v5544_v3 = vpop.permute.xlu0 %3779  ;;  %v3797_v48 = vunpack.i.h.bf16 %v5542_v44  ;;  %v3796_v37 = vunpack.i.l.bf16 %v5542_v44  ;;  %v3772_v44 = vunpack.i.h.bf16 %v5539_v0 }
 0x1c7   :  { %v3781_v42 = vunpack.i.l.bf16 %v5544_v3  ;;  %v3782_v0 = vunpack.i.h.bf16 %v5544_v3 }
 0x1c8   :  { %v1386_v55 = vsel %vm1384_vm12, %v3796_v37, %v3797_v48  ;;  %v1298_v47 = vmax.f32 %v1282_v23, %v3772_v44 }
 0x1c9   :  { %v5547_v15 = vpop.permute.xlu1 %3804  ;;  %v1394_v49 = vmax.f32 %v1361_v52, %v1386_v55  ;;  %v1313_v25 = vmax.f32 %v1297_v9, %v3781_v42  ;;  %v1540_v52 = vld [vmem:[#allocation2 + $0x68] sm:$0xff]  ;;  %v5637_v42 = vld [vmem:[#allocation2 + $0x58] sm:$0xff] }
 0x1ca   :  { %v5553_v21 = vpop.permute.xlu0 %3789  ;;  %v3806_v54 = vunpack.i.l.bf16 %v5547_v15  ;;  %v3807_v10 = vunpack.i.h.bf16 %v5547_v15  ;;  %v5640_v55 = vld [vmem:[#allocation2 + $0x28] sm:$0xff] }
 0x1cb   :  { %v3792_v29 = vunpack.i.h.bf16 %v5553_v21  ;;  %v3791_v51 = vunpack.i.l.bf16 %v5553_v21  ;;  %v1410_v6 = vmax.f32 %v1394_v49, %v3787_v36 }
 0x1cd   :  { %v5560_v5 = vpop.permute.xlu1 %3814  ;;  %v1338_v21 = vsel %vm1335_vm11, %v3791_v51, %v3792_v29 }
 0x1ce   :  { %v3800_v27 = vpop.permute.xlu0 %3799  ;;  %v3816_v56 = vunpack.i.l.bf16 %v5560_v5 }
 0x1cf   :  { %v3802_v22 = vunpack.i.h.bf16 %v3800_v27  ;;  %v3801_v19 = vunpack.i.l.bf16 %v3800_v27  ;;  %v3817_v27 = vunpack.i.h.bf16 %v5560_v5  ;;  %v1314_v5 = vmax.f32 %v1298_v47, %v3782_v0 }
 0x1d1   :  { %v5571_v24 = vpop.permute.xlu1 %3824  ;;  %v1434_v12 = vsel %vm1433_vm13, %v3801_v19, %v3802_v22  ;;  %v1346_v22 = vmax.f32 %v1313_v25, %v1338_v21  ;;  %v1339_v4 = vsel %vm1335_vm11, %v3816_v56, %v3817_v27 }
 0x1d2   :  { %v5579_v61 = vpop.permute.xlu0 %3809  ;;  %v1442_v40 = vmax.f32 %v1409_v7, %v1434_v12  ;;  %v3827_v20 = vunpack.i.h.bf16 %v5571_v24  ;;  %v3826_v26 = vunpack.i.l.bf16 %v5571_v24  ;;  %v1347_v7 = vmax.f32 %v1314_v5, %v1339_v4 }
 0x1d3   :  { %v3811_v62 = vunpack.i.l.bf16 %v5579_v61  ;;  %v3812_v33 = vunpack.i.h.bf16 %v5579_v61  ;;  %v1362_v53 = vmax.f32 %v1346_v22, %v3806_v54  ;;  %v1546_v61 = vld [vmem:[#allocation2 + $0x98] sm:$0xff] }
 0x1d4   :  { %v1435_v3 = vsel %vm1433_vm13, %v3826_v26, %v3827_v20  ;;  %v1363_v21 = vmax.f32 %v1347_v7, %v3807_v10  ;;  %v5694_v7 = vld [vmem:[#allocation7 + $0x1f0] sm:$0xff]  ;;  %v5716_v10 = vld [vmem:[#allocation7 + $0x1e0] sm:$0xff] }
 0x1d5   :  { %v3835_v39 = vpop.permute.xlu1 %3834  ;;  %v1458_v35 = vmax.f32 %v1442_v40, %v3811_v62  ;;  %v1443_v43 = vmax.f32 %v1410_v6, %v1435_v3 }
 0x1d6   :  { %v3820_v13 = vpop.permute.xlu0 %3819  ;;  %v3837_v41 = vunpack.i.h.bf16 %v3835_v39  ;;  %v3836_v46 = vunpack.i.l.bf16 %v3835_v39 }
 0x1d7   :  { %v3822_v57 = vunpack.i.h.bf16 %v3820_v13  ;;  %v3821_v16 = vunpack.i.l.bf16 %v3820_v13  ;;  %v1539_v13 = vld [vmem:[#allocation2 + $0x60] sm:$0xff]  ;;  %v1459_v62 = vmax.f32 %v1443_v43, %v3812_v33 }
 0x1d8   :  { %v1499_v19 = vsel %vm1498_vm14, %v3836_v46, %v3837_v41  ;;  %v5643_v46 = vld [vmem:[#allocation2 + $0x20] sm:$0xff] }
 0x1d9   :  { %v5593_v11 = vpop.permute.xlu1 %3844  ;;  %v1387_v28 = vsel %vm1384_vm12, %v3821_v16, %v3822_v57 }
 0x1da   :  { %v5598_v17 = vpop.permute.xlu0 %3829  ;;  %v3847_v63 = vunpack.i.h.bf16 %v5593_v11  ;;  %v3846_v12 = vunpack.i.l.bf16 %v5593_v11  ;;  %v1395_v37 = vmax.f32 %v1362_v53, %v1387_v28 }
 0x1db   :  { %v3831_v34 = vunpack.i.l.bf16 %v5598_v17  ;;  %v3832_v48 = vunpack.i.h.bf16 %v5598_v17 }
 0x1dc   :  { %v1388_v11 = vsel %vm1384_vm12, %v3846_v12, %v3847_v63  ;;  %v5680_v12 = vld [vmem:[#allocation7 + $0xf8] sm:$0xff] }
 0x1dd   :  { %v5605_v50 = vpop.permute.xlu1 %3854  ;;  %v1474_v1 = vmax.f32 %v1458_v35, %v3831_v34  ;;  %v1475_v9 = vmax.f32 %v1459_v62, %v3832_v48  ;;  %v1396_v26 = vmax.f32 %v1363_v21, %v1388_v11  ;;  %v5698_v48 = vld [vmem:[#allocation7 + $0x70] sm:$0xff]  ;;  %v5718_v62 = vld [vmem:[#allocation7 + $0x60] sm:$0xff]  ;;  %v5734_v11 = vld [vmem:[#allocation7 + $0x58] sm:$0xff] }
 0x1de   :  { %v5610_v24 = vpop.permute.xlu0 %3839  ;;  %v3856_v18 = vunpack.i.l.bf16 %v5605_v50  ;;  %v3857_v20 = vunpack.i.h.bf16 %v5605_v50  ;;  %v5748_v21 = vld [vmem:[#allocation7 + $0x150] sm:$0xff] }
 0x1df   :  { %v1507_v45 = vmax.f32 %v1474_v1, %v1499_v19  ;;  %v3841_v58 = vunpack.i.l.bf16 %v5610_v24  ;;  %v3842_v15 = vunpack.i.h.bf16 %v5610_v24  ;;  %6764 = vst [vmem:[#allocation51_spill] sm:$0xff] %v5748_v21 }
 0x1e1   :  { %v5617_v59 = vmax.f32 %v1507_v45, %v3856_v18  ;;  %v3865_v29 = vpop.permute.xlu1 %3864  ;;  %v1411_v40 = vmax.f32 %v1395_v37, %v3841_v58  ;;  %v1412_v56 = vmax.f32 %v1396_v26, %v3842_v15  ;;  %v5700_v37 = vld [vmem:[#allocation7 + $0x170] sm:$0xff]  ;;  %v5762_v26 = vld [vmem:[#allocation7 + $0xc0] sm:$0xff] }
 0x1e2   :  { %v3850_v32 = vpop.permute.xlu0 %3849  ;;  %v3866_v35 = vunpack.i.l.bf16 %v3865_v29  ;;  %v3867_v50 = vunpack.i.h.bf16 %v3865_v29  ;;  %v5708_v29 = vld [vmem:[#allocation7 + $0x68] sm:$0xff]  ;;  %v5746_v15 = vld [vmem:[#allocation7 + $0x50] sm:$0xff] }
 0x1e3   :  { %v3852_v39 = vunpack.i.h.bf16 %v3850_v32  ;;  %v3851_v14 = vunpack.i.l.bf16 %v3850_v32  ;;  %2459 = vrot.lane.b32.xlu0 %v5617_v59, %s4031_s2  ;;  %3231 = vmatmul.mubr.msk.f32.vlgmr.msra.gmra.mxu0 %vm1692_vm15, %v5617_v59 }
 0x1e4   :  { %3237 = vmatmul.mubr.msk.f32.vlgmr.msra.gmra.mxu1 %vm1692_vm15, %v5617_v59  ;;  %1797 = vmatprep.mubr.f32.mxu0 %v6729_v60 }
 0x1e5   :  { %v1436_v51 = vsel %vm1433_vm13, %v3851_v14, %v3852_v39  ;;  %1886 = vmatprep.mubr.f32.mxu1 %v6729_v60  ;;  %3242 = vmatpush1.msk.msra.mxu0 %vm1705_vm8, %v1552_v38  ;;  %v3875_v0 = vpop.permute.xlu1 %3874  ;;  %v5686_v39 = vld [vmem:[#allocation7 + $0x78] sm:$0xff] }
 0x1e6   :  { %v3860_v30 = vpop.permute.xlu0 %3859  ;;  %3530 = vmatpush3.msk.msra.mxu1 %vm1705_vm8, %v5501_v31  ;;  %1931 = vmatprep.subr.mxu0 %v1546_v61  ;;  %v1444_v41 = vmax.f32 %v1411_v40, %v1436_v51  ;;  %v1533_v31 = vld [vmem:[#allocation2 + $0x30] sm:$0xff]  ;;  %v3876_v36 = vunpack.i.l.bf16 %v3875_v0  ;;  %v3877_v6 = vunpack.i.h.bf16 %v3875_v0  ;;  %v5688_v14 = vld [vmem:[#allocation7 + $0x178] sm:$0xff]  ;;  %v5710_v51 = vld [vmem:[#allocation7 + $0x168] sm:$0xff] }
 0x1e7   :  { %v3862_v44 = vunpack.i.h.bf16 %v3860_v30  ;;  %v3861_v23 = vunpack.i.l.bf16 %v3860_v30  ;;  %3531 = vmatprep.subr.mxu1 %v1547_v2  ;;  %1932 = vmatpush1.msra.mxu0 %v1545_v8  ;;  %v5690_v61 = vld [vmem:[#allocation7 + $0xf0] sm:$0xff]  ;;  %v5706_v8 = vld [vmem:[#allocation7 + $0x1e8] sm:$0xff]  ;;  %v5722_v40 = vld [vmem:[#allocation7 + $0x160] sm:$0xff] }
 0x1e8   :  { %3532 = vmatpush3.msra.mxu1 %v1547_v2  ;;  %1933 = vmatprep.subr.mxu0 %v1539_v13  ;;  %v1460_v57 = vmax.f32 %v1444_v41, %v3866_v35  ;;  %v5702_v2 = vld [vmem:[#allocation7 + $0xe8] sm:$0xff]  ;;  %v5714_v13 = vld [vmem:[#allocation7 + $0xe0] sm:$0xff]  ;;  %v5724_v30 = vld [vmem:[#allocation7 + $0xd8] sm:$0xff] }
 0x1e9   :  { %v1500_v17 = vsel %vm1498_vm14, %v3861_v23, %v3862_v44  ;;  %3533 = vmatprep.subr.mxu1 %v1540_v52  ;;  %1934 = vmatpush1.msra.mxu0 %v5637_v42  ;;  %v1516_v45 = vpop.permute.xlu1 %1515  ;;  %v5736_v44 = vld [vmem:[#allocation7 + $0x158] sm:$0xff]  ;;  %v5738_v23 = vld [vmem:[#allocation7 + $0xd0] sm:$0xff]  ;;  %v5750_v41 = vld [vmem:[#allocation7 + $0xc8] sm:$0xff] }
 0x1ea   :  { %v1508_v34 = vmax.f32 %v1475_v9, %v1500_v17  ;;  %v3870_v49 = vpop.permute.xlu0 %3869  ;;  %3534 = vmatpush3.msra.mxu1 %v1540_v52  ;;  %1935 = vmatprep.subr.mxu0 %v5640_v55  ;;  %v1476_v3 = vmax.f32 %v1460_v57, %v3876_v36  ;;  %v5726_v52 = vld [vmem:[#allocation7 + $0x1d8] sm:$0xff]  ;;  %v5742_v9 = vld [vmem:[#allocation7 + $0x1d0] sm:$0xff]  ;;  %v5758_v17 = vld [vmem:[#allocation7 + $0x48] sm:$0xff] }
 0x1eb   :  { %v3872_v25 = vunpack.i.h.bf16 %v3870_v49  ;;  %v3871_v27 = vunpack.i.l.bf16 %v3870_v49  ;;  %3535 = vmatprep.subr.mxu1 %v1533_v31  ;;  %1936 = vmatpush1.msra.mxu0 %v5643_v46  ;;  %6763 = vst [vmem:[#allocation72_spill] sm:$0xff] %v5742_v9  ;;  %v5766_v35 = vld [vmem:[#allocation7 + $0x1c0] sm:$0xff]  ;;  %v5774_v0 = vld [vmem:[#allocation7 + $0xb8] sm:$0xff]  ;;  %v5786_v57 = vld [vmem:[#allocation7 + $0xb0] sm:$0xff] }
 0x1ec   :  { %v1524_v16 = vmax.f32 %v1508_v34, %v3857_v20  ;;  %3536 = vmatpush3.msra.mxu1 %v1533_v31  ;;  %3285 = vmatprep.subr.mxu0 %v5680_v12  ;;  %v5754_v31 = vld [vmem:[#allocation7 + $0x1c8] sm:$0xff]  ;;  %6767 = vst [vmem:[#allocation78_spill] sm:$0xff] %v5766_v35  ;;  %v5770_v34 = vld [vmem:[#allocation7 + $0x40] sm:$0xff]  ;;  %6770 = vst [vmem:[#allocation27_spill] sm:$0xff] %v5774_v0 }
 0x1ed   :  { %v1437_v1 = vsel %vm1433_vm13, %v3871_v27, %v3872_v25  ;;  %v1518_v38 = vpop.permute.xlu1 %1517  ;;  %6765 = vst [vmem:[#allocation52_spill] sm:$0xff] %v5754_v31  ;;  %v5760_v20 = vld [vmem:[#allocation7 + $0x148] sm:$0xff]  ;;  %6768 = vst [vmem:[#allocation79_spill] sm:$0xff] %v5770_v34  ;;  %v5772_v49 = vld [vmem:[#allocation7 + $0x140] sm:$0xff] }
 0x1ee   :  { %v1445_v22 = vmax.f32 %v1412_v56, %v1437_v1  ;;  %v3880_v19 = vpop.permute.xlu0 %3879  ;;  %2461 = vrot.lane.b32.xlu1 %v1524_v16, %s4031_s2  ;;  %3232 = vmatmul.mubr.msk.f32.gmra.mxu0 %vm1692_vm15, %v1524_v16  ;;  %6766 = vst [vmem:[#allocation53_spill] sm:$0xff] %v5760_v20  ;;  %6769 = vst [vmem:[#allocation26_spill] sm:$0xff] %v5772_v49  ;;  %v5778_v25 = vld [vmem:[#allocation7 + $0x1b8] sm:$0xff]  ;;  %v5794_v1 = vld [vmem:[#allocation7 + $0x30] sm:$0xff] }
 0x1ef   :  { %v3882_v24 = vunpack.i.h.bf16 %v3880_v19  ;;  %v3881_v47 = vunpack.i.l.bf16 %v3880_v19  ;;  %3238 = vmatmul.mubr.msk.f32.gmra.mxu1 %vm1692_vm15, %v1524_v16  ;;  %1803 = vmatprep.mubr.f32.mxu0 %v6729_v60  ;;  %6771 = vst [vmem:[#allocation28_spill] sm:$0xff] %v5778_v25  ;;  %v5782_v27 = vld [vmem:[#allocation7 + $0x38] sm:$0xff]  ;;  %6774 = vst [vmem:[#allocation66_spill] sm:$0xff] %v5786_v57  ;;  %v5798_v36 = vld [vmem:[#allocation7 + $0xa8] sm:$0xff] }
 0x1f0   :  { %v1461_v18 = vmax.f32 %v1445_v22, %v3867_v50  ;;  %1892 = vmatprep.mubr.f32.mxu1 %v6729_v60  ;;  %6772 = vst [vmem:[#allocation58_spill] sm:$0xff] %v5782_v27  ;;  %v5784_v56 = vld [vmem:[#allocation7 + $0x138] sm:$0xff]  ;;  %6776 = vst [vmem:[#allocation62_spill] sm:$0xff] %v5794_v1  ;;  %v5796_v50 = vld [vmem:[#allocation7 + $0x130] sm:$0xff] }
 0x1f1   :  { %v1501_v54 = vsel %vm1498_vm14, %v3881_v47, %v3882_v24  ;;  %6773 = vst [vmem:[#allocation73_spill] sm:$0xff] %v5784_v56  ;;  %6777 = vst [vmem:[#allocation74_spill] sm:$0xff] %v5796_v50  ;;  %v5802_v22 = vld [vmem:[#allocation7 + $0x1a8] sm:$0xff]  ;;  %v5810_v47 = vld [vmem:[#allocation7 + $0xa0] sm:$0xff] }
 0x1f2   :  { %v1509_v5 = vmax.f32 %v1476_v3, %v1501_v54  ;;  %v3885_v4 = vpop.permute.xlu0 %3884  ;;  %v1477_v58 = vmax.f32 %v1461_v18, %v3877_v6  ;;  %6778 = vst [vmem:[#allocation42_spill] sm:$0xff] %v5798_v36  ;;  %6779 = vst [vmem:[#allocation43_spill] sm:$0xff] %v5802_v22  ;;  %v5806_v19 = vld [vmem:[#allocation7 + $0x28] sm:$0xff]  ;;  %v5814_v3 = vld [vmem:[#allocation7 + $0x1a0] sm:$0xff] }
 0x1f3   :  { %v3887_v28 = vunpack.i.h.bf16 %v3885_v4  ;;  %v3886_v33 = vunpack.i.l.bf16 %v3885_v4  ;;  %6780 = vst [vmem:[#allocation44_spill] sm:$0xff] %v5806_v19  ;;  %v5808_v24 = vld [vmem:[#allocation7 + $0x128] sm:$0xff]  ;;  %6782 = vst [vmem:[#allocation19_spill] sm:$0xff] %v5810_v47  ;;  %v5818_v18 = vld [vmem:[#allocation7 + $0x20] sm:$0xff] }
 0x1f4   :  { %v1525_v43 = vmax.f32 %v1509_v5, %v1516_v45  ;;  %6781 = vst [vmem:[#allocation45_spill] sm:$0xff] %v5808_v24  ;;  %6783 = vst [vmem:[#allocation81_spill] sm:$0xff] %v5814_v3  ;;  %v5820_v45 = vld [vmem:[#allocation7 + $0x120] sm:$0xff]  ;;  %v5822_v54 = vld [vmem:[#allocation7 + $0x98] sm:$0xff] }
 0x1f5   :  { %v1502_v53 = vsel %vm1498_vm14, %v3886_v33, %v3887_v28  ;;  %6784 = vst [vmem:[#allocation15_spill] sm:$0xff] %v5818_v18  ;;  %6785 = vst [vmem:[#allocation50_spill] sm:$0xff] %v5820_v45  ;;  %v5826_v6 = vld [vmem:[#allocation7 + $0x198] sm:$0xff]  ;;  %v5834_v28 = vld [vmem:[#allocation7 + $0x90] sm:$0xff] }
 0x1f6   :  { %v1510_v32 = vmax.f32 %v1477_v58, %v1502_v53  ;;  %2463 = vrot.lane.b32.xlu0 %v1525_v43, %s4031_s2  ;;  %3233 = vmatmul.mubr.msk.f32.gmra.mxu0 %vm1692_vm15, %v1525_v43  ;;  %6786 = vst [vmem:[#allocation21_spill] sm:$0xff] %v5822_v54  ;;  %6787 = vst [vmem:[#allocation49_spill] sm:$0xff] %v5826_v6  ;;  %v5828_v5 = vld [vmem:[#allocation7 + $0x18] sm:$0xff]  ;;  %v5836_v33 = vld [vmem:[#allocation7 + $0x190] sm:$0xff] }
 0x1f7   :  { %3239 = vmatmul.mubr.msk.f32.gmra.mxu1 %vm1692_vm15, %v1525_v43  ;;  %1809 = vmatprep.mubr.f32.mxu0 %v6729_v60  ;;  %6788 = vst [vmem:[#allocation35_spill] sm:$0xff] %v5828_v5  ;;  %v5832_v4 = vld [vmem:[#allocation7 + $0x118] sm:$0xff]  ;;  %6790 = vst [vmem:[#allocation75_spill] sm:$0xff] %v5834_v28  ;;  %v5842_v58 = vld [vmem:[#allocation7 + $0x110] sm:$0xff] }
 0x1f8   :  { %v1526_v63 = vmax.f32 %v1510_v32, %v1518_v38  ;;  %1898 = vmatprep.mubr.f32.mxu1 %v6729_v60  ;;  %6789 = vst [vmem:[#allocation63_spill] sm:$0xff] %v5832_v4  ;;  %6791 = vst [vmem:[#allocation70_spill] sm:$0xff] %v5836_v33  ;;  %v5846_v53 = vld [vmem:[#allocation7 + $0x88] sm:$0xff] }
 0x1f9   :  { %6793 = vst [vmem:[#allocation36_spill] sm:$0xff] %v5842_v58  ;;  %6794 = vst [vmem:[#allocation33_spill] sm:$0xff] %v5846_v53  ;;  %v5848_v32 = vld [vmem:[#allocation7 + $0x188] sm:$0xff] }
 0x1fa   :  { %2465 = vrot.lane.b32.xlu1 %v1526_v63, %s4031_s2  ;;  %3234 = vmatmul.mubr.msk.f32.gmra.mxu0 %vm1692_vm15, %v1526_v63  ;;  %6795 = vst [vmem:[#allocation22_spill] sm:$0xff] %v5848_v32  ;;  %v5852_v38 = vld [vmem:[#allocation7 + $0x8] sm:$0xff] }
 0x1fb   :  { %3240 = vmatmul.mubr.msk.f32.gmra.mxu1 %vm1692_vm15, %v1526_v63  ;;  %1969 = vmatprep.mubr.f32.mxu0 %v6729_v60  ;;  %6796 = vst [vmem:[#allocation16_spill] sm:$0xff] %v5852_v38 }
 0x1fc   :  { %3537 = vmatprep.mubr.msk.f32.mxu1 %vm1692_vm15, %v5617_v59 }
 0x1fe   :  { %3243 = vmatmul.mubr.msk.f32.vlgmr.msra.gmra.mxu0 %vm1692_vm15, %v5617_v59  ;;  %v5682_v59 = vld [vmem:[#allocation7 + $0x1f8] sm:$0xff] }
 0x1ff   :  { %3538 = vmatmul.mubr.msk.f32.vlgmr.msra.gmra.mxu1 %vm1692_vm15, %v1524_v16  ;;  %1975 = vmatprep.mubr.f32.mxu0 %v6729_v60 }
 0x200   :  { %3540 = vmatprep.mubr.msk.f32.mxu1 %vm1692_vm15, %v1525_v43  ;;  %3320 = vmatprep.subr.mxu1 %v5682_v59 }
 0x201   :  { %3286 = vmatpush3.msra.mxu0 %v5686_v39  ;;  %3321 = vmatpush3.msra.mxu1 %v5688_v14 }
 0x202   :  { %3244 = vmatmul.mubr.msk.f32.gmra.mxu0 %vm1692_vm15, %v1524_v16  ;;  %3287 = vmatprep.subr.mxu0 %v5690_v61  ;;  %v5790_v16 = vld [vmem:[#allocation7 + $0x1b0] sm:$0xff] }
 0x203   :  { %3541 = vmatmul.mubr.msk.f32.gmra.mxu1 %vm1692_vm15, %v1526_v63  ;;  %1981 = vmatprep.mubr.f32.mxu0 %v6729_v60  ;;  %6775 = vst [vmem:[#allocation80_spill] sm:$0xff] %v5790_v16 }
 0x204   :  { %3322 = vmatprep.subr.mxu1 %v5694_v7  ;;  %3288 = vmatpush3.msra.mxu0 %v5698_v48 }
 0x205   :  { %3323 = vmatpush3.msra.mxu1 %v5700_v37  ;;  %3289 = vmatprep.subr.mxu0 %v5702_v2 }
 0x206   :  { %3245 = vmatmul.mubr.msk.f32.gmra.mxu0 %vm1692_vm15, %v1525_v43  ;;  %3324 = vmatprep.subr.mxu1 %v5706_v8  ;;  %v5840_v43 = vld [vmem:[#allocation7 + $0x10] sm:$0xff] }
 0x207   :  { %1987 = vmatprep.mubr.f32.mxu0 %v6729_v60  ;;  %3290 = vmatpush3.msra.mxu0 %v5708_v29  ;;  %6792 = vst [vmem:[#allocation82_spill] sm:$0xff] %v5840_v43 }
 0x208   :  { %3325 = vmatpush3.msra.mxu1 %v5710_v51  ;;  %3291 = vmatprep.subr.mxu0 %v5714_v13 }
 0x209   :  { %3326 = vmatprep.subr.mxu1 %v5716_v10  ;;  %3292 = vmatpush3.msra.mxu0 %v5718_v62 }
 0x20a   :  { %3246 = vmatmul.mubr.msk.f32.gmra.mxu0 %vm1692_vm15, %v1526_v63  ;;  %3327 = vmatpush3.msra.mxu1 %v5722_v40  ;;  %v5854_v63 = vld [vmem:[#allocation7 + $0x108] sm:$0xff] }
 0x20b   :  { %3293 = vmatprep.subr.mxu0 %v5724_v30  ;;  %3328 = vmatprep.subr.mxu1 %v5726_v52  ;;  %6797 = vst [vmem:[#allocation25_spill] sm:$0xff] %v5854_v63 }
 0x20c   :  { %3294 = vmatpush3.msra.mxu0 %v5734_v11  ;;  %3329 = vmatpush3.msra.mxu1 %v5736_v44 }
 0x20d   :  { %3295 = vmatprep.subr.mxu0 %v5738_v23  ;;  %3330 = vmatprep.subr.mxu1 %v5742_v9  ;;  %v5950_v9 = vld [vmem:[#allocation5 + $0xd0] sm:$0xff] }
 0x20e   :  { %3296 = vmatpush3.msra.mxu0 %v5746_v15  ;;  %3331 = vmatpush3.msra.mxu1 %v5748_v21 }
 0x20f   :  { %3297 = vmatprep.subr.mxu0 %v5750_v41  ;;  %3332 = vmatprep.subr.mxu1 %v5754_v31 }
 0x210   :  { %3298 = vmatpush3.msra.mxu0 %v5758_v17  ;;  %3333 = vmatpush3.msra.mxu1 %v5760_v20 }
 0x211   :  { %3299 = vmatprep.subr.mxu0 %v5762_v26  ;;  %3334 = vmatprep.subr.mxu1 %v5766_v35 }
 0x212   :  { %3300 = vmatpush3.msra.mxu0 %v5770_v34  ;;  %3335 = vmatpush3.msra.mxu1 %v5772_v49  ;;  %v5903_v49 = vld [vmem:[#allocation5 + $0x88] sm:$0xff] }
 0x213   :  { %3301 = vmatprep.subr.mxu0 %v5774_v0  ;;  %3336 = vmatprep.subr.mxu1 %v5778_v25  ;;  %v5899_v25 = vld [vmem:[#allocation5 + $0x18] sm:$0xff]  ;;  %6814 = vst [vmem:[#allocation46_spill] sm:$0xff] %v5903_v49 }
 0x214   :  { %3302 = vmatpush3.msra.mxu0 %v5782_v27  ;;  %3337 = vmatpush3.msra.mxu1 %v5784_v56  ;;  %v5896_v56 = vld [vmem:[#allocation5 + $0x78] sm:$0xff]  ;;  %6813 = vst [vmem:[#allocation84_spill] sm:$0xff] %v5899_v25 }
 0x215   :  { %3303 = vmatprep.subr.mxu0 %v5786_v57  ;;  %3338 = vmatprep.subr.mxu1 %v5790_v16  ;;  %6812 = vst [vmem:[#allocation17_spill] sm:$0xff] %v5896_v56  ;;  %v5908_v57 = vld [vmem:[#allocation5 + $0xa8] sm:$0xff] }
 0x216   :  { %3304 = vmatpush3.msra.mxu0 %v5794_v1  ;;  %3339 = vmatpush3.msra.mxu1 %v5796_v50  ;;  %v5891_v50 = vld [vmem:[#allocation5 + $0x80] sm:$0xff]  ;;  %6815 = vst [vmem:[#allocation13_spill] sm:$0xff] %v5908_v57 }
 0x217   :  { %3305 = vmatprep.subr.mxu0 %v5798_v36  ;;  %3340 = vmatprep.subr.mxu1 %v5802_v22  ;;  %v5889_v22 = vld [vmem:[#allocation5 + $0x50] sm:$0xff]  ;;  %6810 = vst [vmem:[#allocation68_spill] sm:$0xff] %v5891_v50 }
 0x218   :  { %3306 = vmatpush3.msra.mxu0 %v5806_v19  ;;  %3341 = vmatpush3.msra.mxu1 %v5808_v24  ;;  %v5878_v24 = vld [vmem:[#allocation5 + $0x48] sm:$0xff]  ;;  %6809 = vst [vmem:[#allocation24_spill] sm:$0xff] %v5889_v22 }
 0x219   :  { %3307 = vmatprep.subr.mxu0 %v5810_v47  ;;  %3342 = vmatprep.subr.mxu1 %v5814_v3  ;;  %6804 = vst [vmem:[#allocation30_spill] sm:$0xff] %v5878_v24 }
 0x21a   :  { %3308 = vmatpush3.msra.mxu0 %v5818_v18  ;;  %3343 = vmatpush3.msra.mxu1 %v5820_v45  ;;  %v5866_v45 = vld [vmem:[#allocation7 + $0x100] sm:$0xff]  ;;  %v5893_v18 = vld [vmem:[#allocation5 + $0x8] sm:$0xff] }
 0x21b   :  { %3309 = vmatprep.subr.mxu0 %v5822_v54  ;;  %3344 = vmatprep.subr.mxu1 %v5826_v6  ;;  %v5860_v6 = vld [vmem:[#allocation7 + $0x180] sm:$0xff]  ;;  %6801 = vst [vmem:[#allocation41_spill] sm:$0xff] %v5866_v45  ;;  %6811 = vst [vmem:[#allocation77_spill] sm:$0xff] %v5893_v18 }
 0x21c   :  { %3310 = vmatpush3.msra.mxu0 %v5828_v5  ;;  %3345 = vmatpush3.msra.mxu1 %v5832_v4  ;;  %v5856_v4 = vld [vmem:[#allocation7 + $0x80] sm:$0xff]  ;;  %6799 = vst [vmem:[#allocation64_spill] sm:$0xff] %v5860_v6 }
 0x21d   :  { %3311 = vmatprep.subr.mxu0 %v5834_v28  ;;  %3346 = vmatprep.subr.mxu1 %v5836_v33  ;;  %6798 = vst [vmem:[#allocation67_spill] sm:$0xff] %v5856_v4  ;;  %v5862_v33 = vld [vmem:[#allocation7] sm:$0xff]  ;;  %v5876_v28 = vld [vmem:[#allocation5 + $0x38] sm:$0xff] }
 0x21e   :  { %3312 = vmatpush3.msra.mxu0 %v5840_v43  ;;  %3347 = vmatpush3.msra.mxu1 %v5842_v58  ;;  %6800 = vst [vmem:[#allocation76_spill] sm:$0xff] %v5862_v33  ;;  %v5868_v58 = vld [vmem:[#allocation7 + $0x2f8] sm:$0xff]  ;;  %6803 = vst [vmem:[#allocation29_spill] sm:$0xff] %v5876_v28 }
 0x21f   :  { %3313 = vmatprep.subr.mxu0 %v5846_v53  ;;  %3348 = vmatprep.subr.mxu1 %v5848_v32  ;;  %6802 = vst [vmem:[#allocation47_spill] sm:$0xff] %v5868_v58 }
 0x220   :  { %3314 = vmatpush3.msra.mxu0 %v5852_v38  ;;  %3349 = vmatpush3.msra.mxu1 %v5854_v63 }
 0x221   :  { %3315 = vmatprep.subr.mxu0 %v5856_v4  ;;  %3350 = vmatprep.subr.mxu1 %v5860_v6  ;;  %v5880_v4 = vld [vmem:[#allocation5] sm:$0xff] }
 0x222   :  { %3316 = vmatpush3.msra.mxu0 %v5862_v33  ;;  %3351 = vmatpush3.msra.mxu1 %v5866_v45  ;;  %6805 = vst [vmem:[#allocation31_spill] sm:$0xff] %v5880_v4  ;;  %v5882_v6 = vld [vmem:[#allocation5 + $0x40] sm:$0xff]  ;;  %v5884_v45 = vld [vmem:[#allocation5 + $0x70] sm:$0xff] }
 0x223   :  { %3355 = vmatprep.subr.mxu0 %v5868_v58  ;;  %3543 = vmatprep.subr.mxu1 %v6729_v60  ;;  %6806 = vst [vmem:[#allocation32_spill] sm:$0xff] %v5882_v6  ;;  %6807 = vst [vmem:[#allocation37_spill] sm:$0xff] %v5884_v45  ;;  %v5886_v58 = vld [vmem:[#allocation5 + $0x10] sm:$0xff] }
 0x224   :  { %6808 = vst [vmem:[#allocation83_spill] sm:$0xff] %v5886_v58 }
 0x2a3   :  { %v1793_v32 = vpop.f32.mrf.mxu0 }
 0x2a4   :  { %v1882_v38 = vpop.f32.mrf.mxu1  ;;  %v2079_v19 = vmul.f32 %v1793_v32, %v5880_v4 }
 0x2a5   :  { %v1795_v53 = vpop.f32.mrf.mxu0  ;;  %v2081_v1 = vmul.f32 %v1882_v38, %v5886_v58 }
 0x2a6   :  { %v1884_v63 = vpop.f32.mrf.mxu1  ;;  %v2080_v32 = vmul.f32 %v1795_v53, %v5893_v18  ;;  %v5919_v53 = vld [vmem:[#allocation5 + $0xc0] sm:$0xff] }
 0x2a7   :  { %6818 = vst [vmem:[#allocation56_spill] sm:$0xff] %v5919_v53 }
 0x2ae   :  { %v1799_v43 = vpop.f32.mrf.mxu0 }
 0x2af   :  { %v1888_v3 = vpop.f32.mrf.mxu1  ;;  %v2086_v5 = vmul.f32 %v1799_v43, %v5876_v28 }
 0x2b0   :  { %v1801_v33 = vpop.f32.mrf.mxu0  ;;  %v2088_v16 = vmul.f32 %v1888_v3, %v5878_v24 }
 0x2b1   :  { %v1890_v54 = vpop.f32.mrf.mxu1  ;;  %v2087_v36 = vmul.f32 %v1801_v33, %v5882_v6  ;;  %v2107_v4 = vadd.f32 %v2086_v5, %v2079_v19  ;;  %v5912_v6 = vld [vmem:[#allocation5 + $0xb8] sm:$0xff] }
 0x2b2   :  { %v2089_v35 = vmul.f32 %v1890_v54, %v5889_v22  ;;  %6816 = vst [vmem:[#allocation54_spill] sm:$0xff] %v5912_v6  ;;  %v5916_v54 = vld [vmem:[#allocation5 + $0xb0] sm:$0xff] }
 0x2b3   :  { %6817 = vst [vmem:[#allocation55_spill] sm:$0xff] %v5916_v54 }
 0x2b6   :  { %v1805_v47 = vpop.f32.mrf.mxu0 }
 0x2b7   :  { %v2093_v43 = vmul.f32 %v1805_v47, %v5884_v45  ;;  %v1894_v28 = vpop.f32.mrf.mxu1  ;;  %v2082_v47 = vmul.f32 %v1884_v63, %v5899_v25  ;;  %v2125_v45 = vadd.f32 %v2088_v16, %v2081_v1  ;;  %v5926_v25 = vld [vmem:[#allocation5 + $0x30] sm:$0xff] }
 0x2b8   :  { %v2095_v3 = vmul.f32 %v1894_v28, %v5891_v50  ;;  %v1807_v24 = vpop.f32.mrf.mxu0  ;;  %v2116_v28 = vadd.f32 %v2087_v36, %v2080_v32  ;;  %6819 = vst [vmem:[#allocation57_spill] sm:$0xff] %v5926_v25 }
 0x2b9   :  { %v2094_v20 = vmul.f32 %v1807_v24, %v5896_v56  ;;  %v1896_v33 = vpop.f32.mrf.mxu1  ;;  %v2108_v50 = vadd.f32 %v2107_v4, %v2093_v43  ;;  %v2134_v19 = vadd.f32 %v2089_v35, %v2082_v47 }
 0x2ba   :  { %v2096_v38 = vmul.f32 %v1896_v33, %v5903_v49  ;;  %v1811_v58 = vpop.f32.mrf.mxu0  ;;  %v2126_v24 = vadd.f32 %v2125_v45, %v2095_v3 }
 0x2bb   :  { %v2100_v22 = vmul.f32 %v1811_v58, %v5908_v57  ;;  %v1900_v27 = vpop.f32.mrf.mxu1  ;;  %v2117_v18 = vadd.f32 %v2116_v28, %v2094_v20 }
 0x2bc   :  { %v2102_v5 = vmul.f32 %v1900_v27, %v5912_v6  ;;  %v1813_v56 = vpop.f32.mrf.mxu0  ;;  %v2135_v33 = vadd.f32 %v2134_v19, %v2096_v38  ;;  %v5928_v27 = vld [vmem:[#allocation5 + $0x68] sm:$0xff] }
 0x2bd   :  { %v2109_v63 = vadd.f32 %v2108_v50, %v2100_v22  ;;  %v2101_v16 = vmul.f32 %v1813_v56, %v5916_v54  ;;  %v1902_v1 = vpop.f32.mrf.mxu1  ;;  %6820 = vst [vmem:[#allocation59_spill] sm:$0xff] %v5928_v27 }
 0x2be   :  { %v2127_v49 = vadd.f32 %v2126_v24, %v2102_v5  ;;  %v2103_v36 = vmul.f32 %v1902_v1, %v5919_v53  ;;  %v5924_v4 = vpop.f32.mrf.mxu0  ;;  %v5934_v53 = vld [vmem:[#allocation5 + $0xa0] sm:$0xff] }
 0x2bf   :  { %v2110_v58 = vrot.slane %v2109_v63, 4  ;;  %v2118_v43 = vadd.f32 %v2117_v18, %v2101_v16  ;;  %v3539_v32 = vpop.f32.mrf.mxu1  ;;  %6821 = vst [vmem:[#allocation60_spill] sm:$0xff] %v5934_v53 }
 0x2c0   :  { %v2128_v35 = vrot.slane %v2127_v49, 4  ;;  %v2136_v45 = vadd.f32 %v2135_v33, %v2103_v36  ;;  %v1973_v20 = vpop.f32.mrf.mxu0  ;;  %v2092_v18 = vmul.f32 %v3539_v32, %v5928_v27  ;;  %v5932_v33 = vld [vmem:[#allocation5 + $0x60] sm:$0xff] }
 0x2c1   :  { %v2111_v50 = vadd.f32 %v2110_v58, %v2109_v63  ;;  %v2119_v22 = vrot.slane %v2118_v43, 4  ;;  %v2060_v56 = vpop.f32.mrf.mxu1 }
 0x2c2   :  { %v2129_v3 = vadd.f32 %v2128_v35, %v2127_v49  ;;  %v2137_v47 = vrot.slane %v2136_v45, 4  ;;  %v2085_v38 = vmul.f32 %v2060_v56, %v5926_v25  ;;  %v1977_v28 = vpop.f32.mrf.mxu0  ;;  %v5936_v49 = vld [vmem:[#allocation5 + $0x28] sm:$0xff]  ;;  %v5939_v56 = vld [vmem:[#allocation5 + $0xd8] sm:$0xff] }
 0x2c3   :  { %v2112_v19 = vrot.slane %v2111_v50, 2  ;;  %v2120_v24 = vadd.f32 %v2119_v22, %v2118_v43  ;;  %v3542_v5 = vpop.f32.mrf.mxu1  ;;  %6822 = vst [vmem:[#allocation38_spill] sm:$0xff] %v5939_v56  ;;  %v5941_v25 = vld [vmem:[#allocation5 + $0x98] sm:$0xff] }
 0x2c4   :  { %v2130_v16 = vrot.slane %v2129_v3, 2  ;;  %v2138_v1 = vadd.f32 %v2137_v47, %v2136_v45  ;;  %v1979_v36 = vpop.f32.mrf.mxu0  ;;  %v2162_v35 = vsel %vm2161_vm0, %v2085_v38, 0.0  ;;  %v2163_v45 = vsel %vm2161_vm0, %v2092_v18, 0.0 }
 0x2c5   :  { %v2113_v63 = vadd.f32 %v2112_v19, %v2111_v50  ;;  %v2121_v58 = vrot.slane %v2120_v24, 2  ;;  %v2070_v43 = vpop.f32.mrf.mxu1  ;;  %v2091_v47 = vmul.f32 %v1979_v36, %v5932_v33  ;;  %v2084_v19 = vmul.f32 %v1973_v20, %v5936_v49 }
 0x2c6   :  { %v2131_v22 = vadd.f32 %v2130_v16, %v2129_v3  ;;  %v2139_v32 = vrot.slane %v2138_v1, 2  ;;  %v1983_v27 = vpop.f32.mrf.mxu0  ;;  %v2099_v6 = vmul.f32 %v2070_v43, %v5934_v53  ;;  %v2164_v54 = vadd.f32 %v2163_v45, %v2162_v35 }
 0x2c7   :  { %v2122_v50 = vadd.f32 %v2121_v58, %v2120_v24  ;;  %v2106_v38 = vmul.f32 %v3542_v5, %v5939_v56  ;;  %v2114_v0 = vrot.slane %v2113_v63, 1  ;;  %v2152_v24 = vadd.f32 %v2091_v47, %v2084_v19  ;;  %v5952_v58 = vld [vmem:[#allocation5 + $0x58] sm:$0xff]  ;;  %v5962_v47 = vld [vmem:[#allocation5 + $0x90] sm:$0xff] }
 0x2c8   :  { %v1985_v57 = vpop.f32.mrf.mxu0  ;;  %v2140_v31 = vadd.f32 %v2139_v32, %v2138_v1  ;;  %v2132_v3 = vrot.slane %v2131_v22, 1  ;;  %v2165_v16 = vsel %vm2161_vm0, %v2099_v6, 0.0  ;;  %v5964_v19 = vld [vmem:[#allocation7 + $0x2f0] sm:$0xff] }
 0x2c9   :  { %v2098_v21 = vmul.f32 %v1985_v57, %v5941_v25  ;;  %v2166_v34 = vadd.f32 %v2165_v16, %v2164_v54  ;;  %v2123_v36 = vrot.slane %v2122_v50, 1  ;;  %v2167_v20 = vsel %vm2161_vm0, %v2106_v38, 0.0  ;;  %v5956_v57 = vld [vmem:[#allocation7 + $0x278] sm:$0xff]  ;;  %v5960_v16 = vld [vmem:[#allocation5 + $0x20] sm:$0xff]  ;;  %v5982_v38 = vld [vmem:[#allocation7 + $0x268] sm:$0xff] }
 0x2ca   :  { %v1989_v18 = vpop.f32.mrf.mxu0  ;;  %v2141_v43 = vrot.slane %v2140_v31, 1  ;;  %v2115_v32 = vadd.f32 %v2114_v0, %v2113_v63  ;;  %v2133_v45 = vadd.f32 %v2132_v3, %v2131_v22  ;;  %v5958_v54 = vld [vmem:[#allocation7 + $0x358] sm:$0xff]  ;;  %v5969_v63 = vld [vmem:[#allocation7 + $0x350] sm:$0xff]  ;;  %v5971_v22 = vld [vmem:[#allocation5 + $0xc8] sm:$0xff] }
 0x2cb   :  { %v2124_v35 = vadd.f32 %v2123_v36, %v2122_v50  ;;  %v2153_v56 = vadd.f32 %v2152_v24, %v2098_v21  ;;  %v2168_v53 = vadd.f32 %v2167_v20, %v2166_v34  ;;  %v5967_v21 = vld [vmem:[#allocation7 + $0x270] sm:$0xff]  ;;  %6823 = vst [vmem:[#allocation39_spill] sm:$0xff] %v5969_v63  ;;  %v5975_v34 = vld [vmem:[#allocation7 + $0x2e8] sm:$0xff]  ;;  %v2083_v50 = vmul.f32 %v5924_v4, %v5960_v16  ;;  %v5993_v20 = vld [vmem:[#allocation7 + $0x260] sm:$0xff] }
 0x2cc   :  { %v1991_v5 = vpop.f32.mrf.mxu0  ;;  %v2142_v1 = vadd.f32 %v2141_v43, %v2140_v31  ;;  %v2090_v31 = vmul.f32 %v1977_v28, %v5952_v58  ;;  %v2097_v28 = vmul.f32 %v1983_v27, %v5962_v47  ;;  %v5984_v3 = vld [vmem:[#allocation7 + $0x348] sm:$0xff]  ;;  %v5988_v43 = vld [vmem:[#allocation7 + $0x2e0] sm:$0xff]  ;;  %v2104_v4 = vmul.f32 %v1989_v18, %v5971_v22  ;;  %v6003_v18 = vld [vmem:[#allocation7 + $0x258] sm:$0xff] }
 0x2cd   :  { %v2105_v6 = vmul.f32 %v1991_v5, %v5950_v9  ;;  %2242 = vmatprep.mubr.f32.mxu0 %v2124_v35  ;;  %6824 = vst [vmem:[#allocation18_spill] sm:$0xff] %v5984_v3  ;;  %v2169_v36 = vrot.slane %v2168_v53, 4  ;;  %v5995_v5 = vld [vmem:[#allocation7 + $0x340] sm:$0xff]  ;;  %v5999_v35 = vld [vmem:[#allocation7 + $0x2d8] sm:$0xff] }
 0x2ce   :  { %2312 = vmatprep.mubr.f32.mxu1 %v2142_v1  ;;  %2243 = vmatmul.mubr.f32.vlgmr.msra.gmra.mxu0 %v2115_v32  ;;  %v2143_v24 = vadd.f32 %v2090_v31, %v2083_v50  ;;  %6825 = vst [vmem:[#allocation12_spill] sm:$0xff] %v5995_v5  ;;  %v6009_v31 = vld [vmem:[#allocation7 + $0x2d0] sm:$0xff] }
 0x2cf   :  { %v2154_v0 = vadd.f32 %v2153_v56, %v2105_v6  ;;  %2313 = vmatmul.mubr.f32.vlgmr.msra.gmra.mxu1 %v2133_v45  ;;  %3356 = vmatpush3.msra.mxu0 %v5956_v57  ;;  %v6005_v45 = vld [vmem:[#allocation7 + $0x338] sm:$0xff]  ;;  %v2170_v6 = vadd.f32 %v2169_v36, %v2168_v53  ;;  %v6013_v50 = vld [vmem:[#allocation7 + $0x250] sm:$0xff]  ;;  %v6019_v53 = vld [vmem:[#allocation7 + $0x2c8] sm:$0xff] }
 0x2d0   :  { %3544 = vmatpush3.msra.mxu1 %v5958_v54  ;;  %3357 = vmatprep.subr.mxu0 %v5964_v19  ;;  %v2144_v1 = vadd.f32 %v2143_v24, %v2097_v28  ;;  %6826 = vst [vmem:[#allocation34_spill] sm:$0xff] %v6005_v45  ;;  %6827 = vst [vmem:[#allocation23_spill] sm:$0xff] %v6013_v50  ;;  %v6015_v28 = vld [vmem:[#allocation7 + $0x330] sm:$0xff]  ;;  %v6023_v36 = vld [vmem:[#allocation7 + $0x248] sm:$0xff] }
 0x2d1   :  { %v2155_v56 = vrot.slane %v2154_v0, 4  ;;  %3545 = vmatprep.subr.mxu1 %v6729_v60  ;;  %3358 = vmatpush3.msra.mxu0 %v5967_v21  ;;  %6828 = vst [vmem:[#allocation14_spill] sm:$0xff] %v6015_v28  ;;  %6829 = vst [vmem:[#allocation65_spill] sm:$0xff] %v6019_v53  ;;  %v6025_v24 = vld [vmem:[#allocation7 + $0x328] sm:$0xff] }
 0x2d2   :  { %3546 = vmatpush3.msra.mxu1 %v5969_v63  ;;  %3359 = vmatprep.subr.mxu0 %v5975_v34  ;;  %6830 = vst [vmem:[#allocation20_spill] sm:$0xff] %v6025_v24  ;;  %v6039_v63 = vld [vmem:[#allocation7 + $0x2b8] sm:$0xff] }
 0x2d3   :  { %v2156_v27 = vadd.f32 %v2155_v56, %v2154_v0  ;;  %3547 = vmatprep.subr.mxu1 %v6729_v60  ;;  %3360 = vmatpush3.msra.mxu0 %v5982_v38  ;;  %v2145_v0 = vadd.f32 %v2144_v1, %v2104_v4  ;;  %v2171_v1 = vrot.slane %v2170_v6, 2 }
 0x2d4   :  { %3548 = vmatpush3.msra.mxu1 %v5984_v3  ;;  %3361 = vmatprep.subr.mxu0 %v5988_v43 }
 0x2d5   :  { %v2157_v32 = vrot.slane %v2156_v27, 2  ;;  %3549 = vmatprep.subr.mxu1 %v6729_v60  ;;  %3362 = vmatpush3.msra.mxu0 %v5993_v20 }
 0x2d6   :  { %3550 = vmatpush3.msra.mxu1 %v5995_v5  ;;  %3363 = vmatprep.subr.mxu0 %v5999_v35  ;;  %v6035_v5 = vld [vmem:[#allocation7 + $0x320] sm:$0xff] }
 0x2d7   :  { %3551 = vmatprep.subr.mxu1 %v6729_v60  ;;  %v2158_v56 = vadd.f32 %v2157_v32, %v2156_v27  ;;  %3364 = vmatpush3.msra.mxu0 %v6003_v18  ;;  %v6029_v27 = vld [vmem:[#allocation7 + $0x2c0] sm:$0xff]  ;;  %v2146_v32 = vrot.slane %v2145_v0, 4  ;;  %6832 = vst [vmem:[#allocation40_spill] sm:$0xff] %v6035_v5 }
 0x2d8   :  { %3552 = vmatpush3.msra.mxu1 %v6005_v45  ;;  %3365 = vmatprep.subr.mxu0 %v6009_v31  ;;  %6831 = vst [vmem:[#allocation48_spill] sm:$0xff] %v6029_v27  ;;  %v6033_v45 = vld [vmem:[#allocation7 + $0x240] sm:$0xff] }
 0x2d9   :  { %3553 = vmatprep.subr.mxu1 %v6729_v60  ;;  %v2159_v4 = vrot.slane %v2158_v56, 1  ;;  %3366 = vmatpush3.msra.mxu0 %v6013_v50  ;;  %v6047_v50 = vld [vmem:[#allocation7 + $0x318] sm:$0xff] }
 0x2da   :  { %3554 = vmatpush3.msra.mxu1 %v6015_v28  ;;  %3367 = vmatprep.subr.mxu0 %v6019_v53  ;;  %v6043_v28 = vld [vmem:[#allocation7 + $0x238] sm:$0xff]  ;;  %v2172_v53 = vadd.f32 %v2171_v1, %v2170_v6  ;;  %6834 = vst [vmem:[#allocation69_spill] sm:$0xff] %v6047_v50  ;;  %v6058_v6 = vld [vmem:[#allocation7 + $0x2a8] sm:$0xff] }
 0x2db   :  { %3555 = vmatprep.subr.mxu1 %v6729_v60  ;;  %v2160_v3 = vadd.f32 %v2159_v4, %v2158_v56  ;;  %3368 = vmatpush3.msra.mxu0 %v6023_v36  ;;  %6833 = vst [vmem:[#allocation71_spill] sm:$0xff] %v6043_v28  ;;  %v6049_v56 = vld [vmem:[#allocation7 + $0x2b0] sm:$0xff]  ;;  %v2147_v4 = vadd.f32 %v2146_v32, %v2145_v0  ;;  %6838 = vst [vmem:[#allocation87_spill] sm:$0xff] %v6058_v6  ;;  %v6062_v1 = vld [vmem:[#allocation7 + $0x228] sm:$0xff] }
 0x2dc   :  { %3556 = vmatpush3.msra.mxu1 %v6025_v24  ;;  %3369 = vmatprep.subr.mxu0 %v6029_v27  ;;  %6835 = vst [vmem:[#allocation61_spill] sm:$0xff] %v6049_v56  ;;  %v6052_v24 = vld [vmem:[#allocation7 + $0x230] sm:$0xff]  ;;  %6839 = vst [vmem:[#allocation88_spill] sm:$0xff] %v6062_v1  ;;  %v2173_v0 = vrot.slane %v2172_v53, 1  ;;  %v6068_v32 = vld [vmem:[#allocation7 + $0x2a0] sm:$0xff] }
 0x2dd   :  { %3557 = vmatprep.subr.mxu1 %v6729_v60  ;;  %3370 = vmatpush3.msra.mxu0 %v6033_v45  ;;  %6836 = vst [vmem:[#allocation85_spill] sm:$0xff] %v6052_v24  ;;  %v6056_v27 = vld [vmem:[#allocation7 + $0x310] sm:$0xff] }
 0x2de   :  { %3558 = vmatpush3.msra.mxu1 %v6035_v5  ;;  %3371 = vmatprep.subr.mxu0 %v6039_v63  ;;  %6837 = vst [vmem:[#allocation86_spill] sm:$0xff] %v6056_v27  ;;  %v2148_v5 = vrot.slane %v2147_v4, 2 }
 0x2df   :  { %2382 = vmatprep.mubr.f32.mxu0 %v2160_v3  ;;  %3559 = vmatprep.subr.mxu1 %v6729_v60  ;;  %v6066_v3 = vld [vmem:[#allocation7 + $0x308] sm:$0xff] }
 0x2e0   :  { %3372 = vmatpush3.msra.mxu0 %v6043_v28  ;;  %3560 = vmatpush3.msra.mxu1 %v6047_v50  ;;  %6840 = vst [vmem:[#allocation89_spill] sm:$0xff] %v6066_v3  ;;  %v6072_v28 = vld [vmem:[#allocation7 + $0x220] sm:$0xff] }
 0x2e1   :  { %3373 = vmatprep.subr.mxu0 %v6049_v56  ;;  %3561 = vmatprep.subr.mxu1 %v6729_v60  ;;  %6841 = vst [vmem:[#allocation90_spill] sm:$0xff] %v6072_v28  ;;  %v6076_v50 = vld [vmem:[#allocation7 + $0x300] sm:$0xff]  ;;  %v2174_v56 = vadd.f32 %v2173_v0, %v2172_v53  ;;  %v6093_v53 = vld [vmem:[#allocation7 + $0x210] sm:$0xff] }
 0x2e2   :  { %3374 = vmatpush3.msra.mxu0 %v6052_v24  ;;  %3562 = vmatpush3.msra.mxu1 %v6056_v27  ;;  %6842 = vst [vmem:[#allocation91_spill] sm:$0xff] %v6076_v50  ;;  %v6080_v24 = vld [vmem:[#allocation7 + $0x298] sm:$0xff]  ;;  %6846 = vst [vmem:[#allocation95_spill] sm:$0xff] %v6093_v53  ;;  %v3888_v0 = vld [vmem:[#allocation2 + $0xb0] sm:$0x7] }
 0x2e3   :  { %3375 = vmatprep.subr.mxu0 %v6058_v6  ;;  %3563 = vmatprep.subr.mxu1 %v6729_v60  ;;  %6843 = vst [vmem:[#allocation92_spill] sm:$0xff] %v6080_v24  ;;  %v6084_v27 = vld [vmem:[#allocation7 + $0x218] sm:$0xff]  ;;  %v2149_v6 = vadd.f32 %v2148_v5, %v2147_v4  ;;  %v6097_v5 = vld [vmem:[#allocation7 + $0x288] sm:$0xff] }
 0x2e4   :  { %3376 = vmatpush3.msra.mxu0 %v6062_v1  ;;  %3564 = vmatpush3.msra.mxu1 %v6066_v3  ;;  %6844 = vst [vmem:[#allocation93_spill] sm:$0xff] %v6084_v27  ;;  %v6089_v1 = vld [vmem:[#allocation7 + $0x290] sm:$0xff]  ;;  %v3889_v4 = vld [vmem:[#allocation2 + $0xa8] sm:$0x7] }
 0x2e5   :  { %3377 = vmatprep.subr.mxu0 %v6068_v32  ;;  %3565 = vmatprep.subr.mxu1 %v6729_v60  ;;  %6845 = vst [vmem:[#allocation94_spill] sm:$0xff] %v6089_v1  ;;  %v2150_v3 = vrot.slane %v2149_v6, 1 }
 0x2e6   :  { %3378 = vmatpush3.msra.mxu0 %v6072_v28  ;;  %3566 = vmatpush3.msra.mxu1 %v6076_v50  ;;  %v6101_v50 = vld [vmem:[#allocation7 + $0x208] sm:$0xff]  ;;  %v3891_v28 = vld [vmem:[#allocation2 + $0x70] sm:$0xff] }
 0x2e7   :  { %3567 = vmatprep.mubr.msk.f32.mxu1 %vm4032_vm1, %v6729_v60  ;;  %3379 = vmatprep.subr.mxu0 %v6080_v24  ;;  %6847 = vst [vmem:[#allocation96_spill] sm:$0xff] %v6101_v50  ;;  %v3890_v24 = vld [vmem:[#allocation2 + $0x78] sm:$0xff] }
 0x2e8   :  { %3568 = vmatmul.mubr.msk.f32.vlgmr.msra.gmra.mxu1 %vm2161_vm0, %v2174_v56  ;;  %3253 = vmatprep.subr.msk.mxu1 %vm1705_vm8, %v3888_v0  ;;  %v6104_v56 = vld [vmem:[#allocation7 + $0x280] sm:$0xff] }
 0x2e9   :  { %3380 = vmatpush3.msra.mxu0 %v6084_v27  ;;  %3254 = vmatpush1.msk.msra.mxu1 %vm1705_vm8, %v3889_v4  ;;  %6848 = vst [vmem:[#allocation97_spill] sm:$0xff] %v6104_v56  ;;  %v6107_v0 = vld [vmem:[#allocation7 + $0x200] sm:$0xff]  ;;  %v3893_v4 = vld [vmem:[#allocation2 + $0x38] sm:$0xff] }
 0x2ea   :  { %3381 = vmatprep.subr.mxu0 %v6089_v1  ;;  %2501 = vmatprep.subr.mxu1 %v3890_v24  ;;  %6849 = vst [vmem:[#allocation98_spill] sm:$0xff] %v6107_v0  ;;  %v3892_v27 = vld [vmem:[#allocation2 + $0x40] sm:$0xff]  ;;  %v3894_v1 = vld [vmem:[#allocation2 + $0x8] sm:$0xff]  ;;  %v2151_v24 = vadd.f32 %v2150_v3, %v2149_v6  ;;  %v2462_v6 = vpop.permute.xlu1 %2461  ;;  %v3899_v3 = vld [vmem:[#allocation2 + $0xd0] sm:$0x7] }
 0x2eb   :  { %3382 = vmatpush3.msra.mxu0 %v6093_v53  ;;  %2502 = vmatpush1.msra.mxu1 %v3891_v28  ;;  %v6112_v53 = vpop.permute.xlu0 %2459  ;;  %v3895_v28 = vld [vmem:[#allocation2] sm:$0xff] }
 0x2ec   :  { %3383 = vmatprep.subr.mxu0 %v6097_v5  ;;  %2503 = vmatprep.subr.mxu1 %v3892_v27  ;;  %v3896_v27 = vld [vmem:[#allocation2 + $0xc0] sm:$0x7] }
 0x2ed   :  { %3384 = vmatpush3.msra.mxu0 %v6101_v50  ;;  %2504 = vmatpush1.msra.mxu1 %v3893_v4  ;;  %v3897_v4 = vld [vmem:[#allocation2 + $0xb8] sm:$0x7]  ;;  %v3906_v50 = vld [vmem:[#allocation2 + $0x10] sm:$0xff] }
 0x2ee   :  { %3385 = vmatprep.subr.mxu0 %v6104_v56  ;;  %2505 = vmatprep.subr.mxu1 %v3894_v1  ;;  %v3898_v1 = vld [vmem:[#allocation2 + $0x88] sm:$0xff]  ;;  %v3904_v56 = vld [vmem:[#allocation2 + $0x18] sm:$0xff] }
 0x2ef   :  { %3386 = vmatpush3.msra.mxu0 %v6107_v0  ;;  %2506 = vmatpush1.msra.mxu1 %v3895_v28  ;;  %v3901_v28 = vld [vmem:[#allocation2 + $0x50] sm:$0xff]  ;;  %v3903_v0 = vld [vmem:[#allocation2 + $0xc8] sm:$0x7] }
 0x2f0   :  { %2539 = vmatprep.mubr.f32.mxu1 %v6729_v60  ;;  %2383 = vmatmul.mubr.f32.vlgmr.msra.gmra.mxu0 %v2151_v24  ;;  %v3900_v24 = vld [vmem:[#allocation2 + $0x80] sm:$0xff] }
 0x2f1   :  { %3255 = vmatmul.mubr.msk.f32.vlgmr.msra.gmra.mxu1 %vm1692_vm15, %v6112_v53  ;;  %3259 = vmatprep.subr.msk.mxu0 %vm1705_vm8, %v3896_v27  ;;  %v3902_v27 = vld [vmem:[#allocation2 + $0x48] sm:$0xff] }
 0x2f2   :  { %2545 = vmatprep.mubr.f32.mxu1 %v6729_v60  ;;  %3260 = vmatpush1.msk.msra.mxu0 %vm1705_vm8, %v3897_v4  ;;  %v2464_v4 = vpop.permute.xlu0 %2463 }
 0x2f3   :  { %2628 = vmatprep.mubr.f32.mxu0 %v6729_v60  ;;  %2590 = vmatprep.subr.mxu0 %v3898_v1  ;;  %v3905_v1 = vld [vmem:[#allocation2 + $0x98] sm:$0xff] }
 0x2f4   :  { %3265 = vmatprep.subr.msk.mxu1 %vm1705_vm8, %v3899_v3  ;;  %2591 = vmatpush1.msra.mxu0 %v3900_v24  ;;  %v3907_v3 = vld [vmem:[#allocation2 + $0x90] sm:$0xff]  ;;  %v2466_v24 = vpop.permute.xlu1 %2465 }
 0x2f5   :  { %3256 = vmatmul.mubr.msk.f32.gmra.mxu1 %vm1692_vm15, %v2462_v6  ;;  %2592 = vmatprep.subr.mxu0 %v3901_v28  ;;  %v3909_v28 = vld [vmem:[#allocation2 + $0xd8] sm:$0x7] }
 0x2f6   :  { %2551 = vmatprep.mubr.f32.mxu1 %v6729_v60  ;;  %2593 = vmatpush1.msra.mxu0 %v3902_v27  ;;  %v6879_v27 = vld [vmem:[#allocation16_spill] sm:$0xff] }
 0x2f7   :  { %3266 = vmatpush1.msk.msra.mxu1 %vm1705_vm8, %v3903_v0  ;;  %2594 = vmatprep.subr.mxu0 %v3904_v56  ;;  %v3908_v0 = vld [vmem:[#allocation2 + $0x60] sm:$0xff]  ;;  %v6877_v56 = vld [vmem:[#allocation33_spill] sm:$0xff] }
 0x2f8   :  { %2679 = vmatprep.subr.mxu1 %v3905_v1  ;;  %2595 = vmatpush1.msra.mxu0 %v3906_v50  ;;  %v3910_v50 = vld [vmem:[#allocation2 + $0xa0] sm:$0xff] }
 0x2f9   :  { %3257 = vmatmul.mubr.msk.f32.gmra.mxu1 %vm1692_vm15, %v2464_v4  ;;  %3261 = vmatmul.mubr.msk.f32.vlgmr.msra.gmra.mxu0 %vm1692_vm15, %v6112_v53  ;;  %v6881_v1 = vld [vmem:[#allocation67_spill] sm:$0xff] }
 0x2fa   :  { %2557 = vmatprep.mubr.f32.mxu1 %v6729_v60  ;;  %2634 = vmatprep.mubr.f32.mxu0 %v6729_v60 }
 0x2fb   :  { %2680 = vmatpush1.msra.mxu1 %v3907_v3  ;;  %3570 = vmatprep.subr.msk.mxu0 %vm1705_vm8, %v3909_v28  ;;  %v6882_v3 = vld [vmem:[#allocation70_spill] sm:$0xff] }
 0x2fc   :  { %2681 = vmatprep.subr.mxu1 %v3908_v0  ;;  %3571 = vmatpush3.msk.msra.mxu0 %vm1705_vm8, %v3909_v28  ;;  %v6884_v0 = vld [vmem:[#allocation36_spill] sm:$0xff]  ;;  %v6885_v28 = vld [vmem:[#allocation47_spill] sm:$0xff] }
 0x2fd   :  { %3258 = vmatmul.mubr.msk.f32.gmra.mxu1 %vm1692_vm15, %v2466_v24  ;;  %3262 = vmatmul.mubr.msk.f32.gmra.mxu0 %vm1692_vm15, %v2462_v6 }
 0x2fe   :  { %2682 = vmatpush1.msra.mxu1 %v5637_v42  ;;  %2640 = vmatprep.mubr.f32.mxu0 %v6729_v60  ;;  %v3911_v42 = vld [vmem:[#allocation2 + $0x68] sm:$0xff] }
 0x2ff   :  { %2683 = vmatprep.subr.mxu1 %v5640_v55  ;;  %2717 = vmatprep.mubr.f32.mxu1 %v6729_v60  ;;  %v3912_v55 = vld [vmem:[#allocation2 + $0x30] sm:$0xff] }
 0x300   :  { %2684 = vmatpush1.msra.mxu1 %v5643_v46  ;;  %3572 = vmatprep.subr.mxu0 %v3910_v50  ;;  %v6850_v46 = vld [vmem:[#allocation72_spill] sm:$0xff] }
 0x301   :  { %3267 = vmatmul.mubr.msk.f32.vlgmr.msra.gmra.mxu1 %vm1692_vm15, %v6112_v53  ;;  %3263 = vmatmul.mubr.msk.f32.gmra.mxu0 %vm1692_vm15, %v2464_v4 }
 0x302   :  { %2723 = vmatprep.mubr.f32.mxu1 %v6729_v60  ;;  %2646 = vmatprep.mubr.f32.mxu0 %v6729_v60 }
 0x303   :  { %3573 = vmatpush3.msra.mxu0 %v3910_v50  ;;  %3411 = vmatprep.subr.mxu1 %v5680_v12  ;;  %v6851_v12 = vld [vmem:[#allocation79_spill] sm:$0xff]  ;;  %v6886_v50 = vld [vmem:[#allocation22_spill] sm:$0xff] }
 0x304   :  { %3574 = vmatprep.subr.mxu0 %v3911_v42  ;;  %3412 = vmatpush3.msra.mxu1 %v5686_v39  ;;  %v6853_v39 = vld [vmem:[#allocation27_spill] sm:$0xff] }
 0x305   :  { %3268 = vmatmul.mubr.msk.f32.gmra.mxu1 %vm1692_vm15, %v2462_v6  ;;  %3575 = vmatpush3.msra.mxu0 %v3911_v42  ;;  %v6887_v42 = vld [vmem:[#allocation25_spill] sm:$0xff] }
 0x306   :  { %3264 = vmatmul.mubr.msk.f32.gmra.mxu0 %vm1692_vm15, %v2466_v24  ;;  %3576 = vmatprep.subr.mxu0 %v3912_v55 }
 0x307   :  { %3578 = vmatprep.mubr.msk.f32.mxu0 %vm1692_vm15, %v6112_v53  ;;  %2729 = vmatprep.mubr.f32.mxu1 %v6729_v60  ;;  %v6876_v53 = vld [vmem:[#allocation50_spill] sm:$0xff] }
 0x308   :  { %3577 = vmatpush3.msra.mxu0 %v3912_v55  ;;  %3413 = vmatprep.subr.mxu1 %v5690_v61  ;;  %v6855_v61 = vld [vmem:[#allocation58_spill] sm:$0xff]  ;;  %v6888_v55 = vld [vmem:[#allocation64_spill] sm:$0xff] }
 0x309   :  { %3269 = vmatmul.mubr.msk.f32.gmra.mxu1 %vm1692_vm15, %v2464_v4  ;;  %3446 = vmatprep.subr.mxu0 %v5682_v59  ;;  %v6852_v59 = vld [vmem:[#allocation51_spill] sm:$0xff] }
 0x30a   :  { %3579 = vmatmul.mubr.msk.f32.vlgmr.msra.gmra.mxu0 %vm1692_vm15, %v2462_v6  ;;  %2735 = vmatprep.mubr.f32.mxu1 %v6729_v60  ;;  %v6878_v6 = vld [vmem:[#allocation49_spill] sm:$0xff] }
 0x30b   :  { %3581 = vmatprep.mubr.msk.f32.mxu0 %vm1692_vm15, %v2464_v4  ;;  %3414 = vmatpush3.msra.mxu1 %v5698_v48  ;;  %v6857_v48 = vld [vmem:[#allocation66_spill] sm:$0xff]  ;;  %v6880_v4 = vld [vmem:[#allocation63_spill] sm:$0xff] }
 0x30c   :  { %3415 = vmatprep.subr.mxu1 %v5702_v2  ;;  %3447 = vmatpush3.msra.mxu0 %v5688_v14  ;;  %v6854_v14 = vld [vmem:[#allocation52_spill] sm:$0xff]  ;;  %v6859_v2 = vld [vmem:[#allocation62_spill] sm:$0xff] }
 0x30d   :  { %3270 = vmatmul.mubr.msk.f32.gmra.mxu1 %vm1692_vm15, %v2466_v24  ;;  %3448 = vmatprep.subr.mxu0 %v5694_v7  ;;  %v6856_v7 = vld [vmem:[#allocation53_spill] sm:$0xff] }
 0x30e   :  { %3582 = vmatmul.mubr.msk.f32.gmra.mxu0 %vm1692_vm15, %v2466_v24  ;;  %3416 = vmatpush3.msra.mxu1 %v5708_v29  ;;  %v6861_v29 = vld [vmem:[#allocation42_spill] sm:$0xff]  ;;  %v6883_v24 = vld [vmem:[#allocation76_spill] sm:$0xff] }
 0x30f   :  { %3417 = vmatprep.subr.mxu1 %v5714_v13  ;;  %3449 = vmatpush3.msra.mxu0 %v5700_v37  ;;  %v6858_v37 = vld [vmem:[#allocation78_spill] sm:$0xff]  ;;  %v6863_v13 = vld [vmem:[#allocation44_spill] sm:$0xff] }
 0x310   :  { %3418 = vmatpush3.msra.mxu1 %v5718_v62  ;;  %3450 = vmatprep.subr.mxu0 %v5706_v8  ;;  %v6860_v8 = vld [vmem:[#allocation26_spill] sm:$0xff]  ;;  %v6865_v62 = vld [vmem:[#allocation19_spill] sm:$0xff] }
 0x311   :  { %3419 = vmatprep.subr.mxu1 %v5724_v30  ;;  %3451 = vmatpush3.msra.mxu0 %v5710_v51  ;;  %v6862_v51 = vld [vmem:[#allocation28_spill] sm:$0xff]  ;;  %v6867_v30 = vld [vmem:[#allocation15_spill] sm:$0xff] }
 0x312   :  { %3420 = vmatpush3.msra.mxu1 %v5734_v11  ;;  %3452 = vmatprep.subr.mxu0 %v5716_v10  ;;  %v6864_v10 = vld [vmem:[#allocation73_spill] sm:$0xff] }
 0x313   :  { %3421 = vmatprep.subr.mxu1 %v5738_v23  ;;  %3453 = vmatpush3.msra.mxu0 %v5722_v40  ;;  %v6866_v40 = vld [vmem:[#allocation80_spill] sm:$0xff]  ;;  %v6869_v11 = vld [vmem:[#allocation21_spill] sm:$0xff]  ;;  %v6871_v23 = vld [vmem:[#allocation35_spill] sm:$0xff] }
 0x314   :  { %3422 = vmatpush3.msra.mxu1 %v5746_v15  ;;  %3454 = vmatprep.subr.mxu0 %v5726_v52  ;;  %v6868_v52 = vld [vmem:[#allocation74_spill] sm:$0xff]  ;;  %v6872_v15 = vld [vmem:[#allocation45_spill] sm:$0xff] }
 0x315   :  { %3423 = vmatprep.subr.mxu1 %v5750_v41  ;;  %3455 = vmatpush3.msra.mxu0 %v5736_v44  ;;  %v6870_v44 = vld [vmem:[#allocation43_spill] sm:$0xff] }
 0x316   :  { %3424 = vmatpush3.msra.mxu1 %v5758_v17  ;;  %3456 = vmatprep.subr.mxu0 %v6850_v46  ;;  %v6873_v41 = vld [vmem:[#allocation75_spill] sm:$0xff]  ;;  %v6874_v17 = vld [vmem:[#allocation81_spill] sm:$0xff] }
 0x317   :  { %3425 = vmatprep.subr.mxu1 %v5762_v26  ;;  %3457 = vmatpush3.msra.mxu0 %v6852_v59  ;;  %v6875_v26 = vld [vmem:[#allocation82_spill] sm:$0xff]  ;;  %v6889_v46 = vld [vmem:[#allocation41_spill] sm:$0xff] }
 0x318   :  { %3426 = vmatpush3.msra.mxu1 %v6851_v12  ;;  %3458 = vmatprep.subr.mxu0 %v6854_v14 }
 0x319   :  { %3427 = vmatprep.subr.mxu1 %v6853_v39  ;;  %3459 = vmatpush3.msra.mxu0 %v6856_v7 }
 0x31a   :  { %3428 = vmatpush3.msra.mxu1 %v6855_v61  ;;  %3460 = vmatprep.subr.mxu0 %v6858_v37  ;;  %v6224_v37 = vld [vmem:[%s6327_s7] sm:$0x1]  ;;  %s4033_s7 = smov [#allocation8]  }
 0x31b   :  { %3429 = vmatprep.subr.mxu1 %v6857_v48  ;;  %3461 = vmatpush3.msra.mxu0 %v6860_v8  ;;  %s3212_s11 = sshll.u32 %s4033_s7, 4  ;;  %s3213_s11 = int_to_ptr.vmem [resolvable:$true] %s3212_s11 }
 0x31c   :  { %3430 = vmatpush3.msra.mxu1 %v6859_v2  ;;  %3462 = vmatprep.subr.mxu0 %v6862_v51  ;;  %s3973_s12 = scalar_lea.vmem %s3213_s11, 32  ;;  %p3978_p2 = scmp.lt.s32.totalorder %s3213_s11, %s3213_s11 }
 0x31d   :  { %3431 = vmatprep.subr.mxu1 %v6861_v29  ;;  %3463 = vmatpush3.msra.mxu0 %v6864_v10  ;;  %p3974_p1 = scmp.ne.s32.totalorder %s3213_s11, %s3973_s12  ;;  %p3979_p3 = scmp.lt.s32.totalorder %s3973_s12, %s3973_s12 }
 0x31e   :  { %3432 = vmatpush3.msra.mxu1 %v6863_v13  ;;  %3464 = vmatprep.subr.mxu0 %v6866_v40 }
 0x31f   :  { %3433 = vmatprep.subr.mxu1 %v6865_v62  ;;  %3465 = vmatpush3.msra.mxu0 %v6868_v52  ;;  %p3980_p4 = por %p3979_p3, %p3978_p2 }
 0x320   :  { %3434 = vmatpush3.msra.mxu1 %v6867_v30  ;;  %3466 = vmatprep.subr.mxu0 %v6870_v44 }
 0x321   :  { %3435 = vmatprep.subr.mxu1 %v6869_v11  ;;  %3467 = vmatpush3.msra.mxu0 %v6872_v15  ;;  %p3981_p5 = pnand %p3980_p4, %p3974_p1 }
 0x322   :  { %3436 = vmatpush3.msra.mxu1 %v6871_v23  ;;  %3468 = vmatprep.subr.mxu0 %v6874_v17  ;;  %v6890_v23 = vld [vmem:[#allocation29_spill] sm:$0xff]  ;;  %v6891_v17 = vld [vmem:[#allocation31_spill] sm:$0xff] }
 0x323   :  { %3437 = vmatprep.subr.mxu1 %v6873_v41  ;;  %3469 = vmatpush3.msra.mxu0 %v6876_v53  ;;  %v6892_v53 = vld [vmem:[#allocation32_spill] sm:$0xff] }
 0x324   :  { %3438 = vmatpush3.msra.mxu1 %v6875_v26  ;;  %3470 = vmatprep.subr.mxu0 %v6878_v6  ;;  %v6893_v6 = vld [vmem:[#allocation37_spill] sm:$0xff] }
 0x325   :  { %3439 = vmatprep.subr.mxu1 %v6877_v56  ;;  %3471 = vmatpush3.msra.mxu0 %v6880_v4 }
 0x326   :  { %3440 = vmatpush3.msra.mxu1 %v6879_v27  ;;  %3472 = vmatprep.subr.mxu0 %v6882_v3  ;;  %v6894_v3 = vld [vmem:[#allocation77_spill] sm:$0xff] }
 0x327   :  { %3441 = vmatprep.subr.mxu1 %v6881_v1  ;;  %3473 = vmatpush3.msra.mxu0 %v6884_v0 }
 0x328   :  { %3442 = vmatpush3.msra.mxu1 %v6883_v24  ;;  %3474 = vmatprep.subr.mxu0 %v6886_v50 }
 0x329   :  { %3481 = vmatprep.subr.mxu1 %v6885_v28  ;;  %3475 = vmatpush3.msra.mxu0 %v6887_v42  ;;  %v6895_v28 = vld [vmem:[#allocation17_spill] sm:$0xff] }
 0x32a   :  { %3476 = vmatprep.subr.mxu0 %v6888_v55 }
 0x32b   :  { %3477 = vmatpush3.msra.mxu0 %v6889_v46 }
 0x32c   :  { %3584 = vmatprep.subr.mxu0 %v6729_v60 }
 0x38e   :  { %v3317_v59 = vpop.f32.mrf.mxu0 }
 0x38f   :  { %v3352_v12 = vpop.f32.mrf.mxu1 }
 0x390   :  { %v3318_v61 = vpop.f32.mrf.mxu0 }
 0x391   :  { %v3353_v39 = vpop.f32.mrf.mxu1  ;;  %v3319_v48 = vadd.f32 %v3318_v61, %v3317_v59  ;;  %v6896_v59 = vld [vmem:[#allocation13_spill] sm:$0xff] }
 0x392   :  { %v3354_v51 = vadd.f32 %v3353_v39, %v3352_v12 }
 0x393   :  { %v2245_v2 = vadd.f32 %v3319_v48, %v6224_v37 }
 0x395   :  { %v2315_v62 = vadd.f32 %v3354_v51, %v2245_v2  ;;  %v6897_v2 = vld [vmem:[#allocation55_spill] sm:$0xff]  ;;  %v6898_v51 = vld [vmem:[#allocation30_spill] sm:$0xff] }
 0x3a8   :  { %v2454_v14 = vpop.f32.mrf.mxu1 }
 0x3aa   :  { %v3569_v7 = vpop.f32.mrf.mxu1 }
 0x3b0   :  { %v3387_v8 = vpop.f32.mrf.mxu0 }
 0x3b1   :  { %v2541_v29 = vpop.f32.mrf.mxu1 }
 0x3b2   :  { %v3388_v13 = vpop.f32.mrf.mxu0  ;;  %v2827_v26 = vmul.f32 %v2541_v29, %v6891_v17 }
 0x3b3   :  { %v2543_v10 = vpop.f32.mrf.mxu1  ;;  %v3389_v40 = vadd.f32 %v3388_v13, %v3387_v8 }
 0x3b4   :  { %v2828_v24 = vmul.f32 %v2543_v10, %v6894_v3  ;;  %v6903_v3 = vld [vmem:[#allocation46_spill] sm:$0xff] }
 0x3b5   :  { %v2547_v30 = vpop.f32.mrf.mxu1  ;;  %v2385_v52 = vadd.f32 %v3389_v40, %v2315_v62 }
 0x3b6   :  { %v2834_v15 = vmul.f32 %v2547_v30, %v6890_v23 }
 0x3b7   :  { %v2549_v11 = vpop.f32.mrf.mxu1  ;;  %v2455_v44 = vadd.f32 %v2454_v14, %v2385_v52  ;;  %v6899_v52 = vld [vmem:[#allocation83_spill] sm:$0xff] }
 0x3b8   :  { %v2835_v56 = vmul.f32 %v2549_v11, %v6892_v53  ;;  %v2855_v0 = vadd.f32 %v2834_v15, %v2827_v26  ;;  %v6901_v15 = vld [vmem:[#allocation68_spill] sm:$0xff] }
 0x3b9   :  { %v2553_v41 = vpop.f32.mrf.mxu1  ;;  %2458 = vst [vmem:[#allocation8] sm:$0x1] %v2455_v44  ;;  %v2630_v4 = vpop.f32.mrf.mxu0  ;;  %v6900_v44 = vld [vmem:[#allocation24_spill] sm:$0xff] }
 0x3ba   :  { %v2841_v27 = vmul.f32 %v2553_v41, %v6893_v6  ;;  %v2864_v46 = vadd.f32 %v2835_v56, %v2828_v24  ;;  %v2829_v11 = vmul.f32 %v2630_v4, %v6899_v52  ;;  %v6902_v6 = vld [vmem:[#allocation84_spill] sm:$0xff]  ;;  %v6904_v4 = vld [vmem:[#allocation54_spill] sm:$0xff] }
 0x3bb   :  { %v2555_v1 = vpop.f32.mrf.mxu1  ;;  %v2632_v42 = vpop.f32.mrf.mxu0 }
 0x3bc   :  { %v2842_v50 = vmul.f32 %v2555_v1, %v6895_v28  ;;  %v2856_v12 = vadd.f32 %v2855_v0, %v2841_v27  ;;  %v2830_v27 = vmul.f32 %v2632_v42, %v6902_v6 }
 0x3bd   :  { %v2559_v55 = vpop.f32.mrf.mxu1  ;;  %v2636_v14 = vpop.f32.mrf.mxu0 }
 0x3be   :  { %v2848_v39 = vmul.f32 %v2559_v55, %v6896_v59  ;;  %v2865_v7 = vadd.f32 %v2864_v46, %v2842_v50  ;;  %v2836_v13 = vmul.f32 %v2636_v14, %v6898_v51 }
 0x3bf   :  { %v2561_v61 = vpop.f32.mrf.mxu1  ;;  %v2638_v29 = vpop.f32.mrf.mxu0 }
 0x3c0   :  { %v2857_v48 = vadd.f32 %v2856_v12, %v2848_v39  ;;  %v2849_v8 = vmul.f32 %v2561_v61, %v6897_v2  ;;  %v2837_v23 = vmul.f32 %v2638_v29, %v6900_v44  ;;  %v2873_v1 = vadd.f32 %v2836_v13, %v2829_v11 }
 0x3c1   :  { %v2719_v62 = vpop.f32.mrf.mxu1  ;;  %v2642_v30 = vpop.f32.mrf.mxu0 }
 0x3c2   :  { %v2858_v10 = vrot.slane %v2857_v48, 4  ;;  %v2866_v40 = vadd.f32 %v2865_v7, %v2849_v8  ;;  %v2843_v41 = vmul.f32 %v2642_v30, %v6901_v15  ;;  %v2882_v46 = vadd.f32 %v2837_v23, %v2830_v27  ;;  %v6905_v8 = vld [vmem:[#allocation56_spill] sm:$0xff] }
 0x3c3   :  { %v2721_v17 = vpop.f32.mrf.mxu1  ;;  %v2644_v56 = vpop.f32.mrf.mxu0 }
 0x3c4   :  { %v2859_v26 = vadd.f32 %v2858_v10, %v2857_v48  ;;  %v2867_v53 = vrot.slane %v2866_v40, 4  ;;  %v2844_v24 = vmul.f32 %v2644_v56, %v6903_v3  ;;  %v2874_v12 = vadd.f32 %v2873_v1, %v2843_v41  ;;  %v6906_v56 = vld [vmem:[#allocation57_spill] sm:$0xff]  ;;  %v6907_v3 = vld [vmem:[#allocation59_spill] sm:$0xff] }
 0x3c5   :  { %v2725_v0 = vpop.f32.mrf.mxu1  ;;  %v2832_v44 = vmul.f32 %v2721_v17, %v5936_v49 }
 0x3c6   :  { %v2860_v28 = vrot.slane %v2859_v26, 2  ;;  %v2868_v50 = vadd.f32 %v2867_v53, %v2866_v40  ;;  %v2648_v55 = vpop.f32.mrf.mxu0  ;;  %v2883_v48 = vadd.f32 %v2882_v46, %v2844_v24  ;;  %v2838_v46 = vmul.f32 %v2725_v0, %v5952_v58 }
 0x3c7   :  { %v2850_v59 = vmul.f32 %v2648_v55, %v6904_v4  ;;  %v2727_v39 = vpop.f32.mrf.mxu1 }
 0x3c8   :  { %v2861_v14 = vadd.f32 %v2860_v28, %v2859_v26  ;;  %v2869_v61 = vrot.slane %v2868_v50, 2  ;;  %v2650_v7 = vpop.f32.mrf.mxu0  ;;  %v2839_v51 = vmul.f32 %v2727_v39, %v5932_v33  ;;  %v2831_v39 = vmul.f32 %v2719_v62, %v5960_v16 }
 0x3c9   :  { %v2875_v2 = vadd.f32 %v2874_v12, %v2850_v59  ;;  %v2851_v29 = vmul.f32 %v2650_v7, %v6905_v8  ;;  %v2731_v42 = vpop.f32.mrf.mxu1 }
 0x3ca   :  { %v3580_v13 = vpop.f32.mrf.mxu0  ;;  %v2870_v10 = vadd.f32 %v2869_v61, %v2868_v50  ;;  %v2862_v30 = vrot.slane %v2861_v14, 1  ;;  %v2900_v1 = vadd.f32 %v2839_v51, %v2832_v44  ;;  %v2891_v8 = vadd.f32 %v2838_v46, %v2831_v39  ;;  %v6925_v46 = vld [vmem:[#allocation40_spill] sm:$0xff]  ;;  %v6931_v39 = vld [vmem:[#allocation86_spill] sm:$0xff] }
 0x3cb   :  { %v2876_v40 = vrot.slane %v2875_v2, 4  ;;  %v2884_v52 = vadd.f32 %v2883_v48, %v2851_v29  ;;  %v2733_v11 = vpop.f32.mrf.mxu1  ;;  %v2840_v33 = vmul.f32 %v3580_v13, %v6907_v3  ;;  %v6908_v48 = vld [vmem:[#allocation60_spill] sm:$0xff]  ;;  %v6909_v13 = vld [vmem:[#allocation38_spill] sm:$0xff]  ;;  %v6919_v3 = vld [vmem:[#allocation85_spill] sm:$0xff] }
 0x3cc   :  { %v2846_v23 = vmul.f32 %v2733_v11, %v5941_v25  ;;  %v2808_v15 = vpop.f32.mrf.mxu0  ;;  %v2871_v41 = vrot.slane %v2870_v10, 1  ;;  %v2863_v50 = vadd.f32 %v2862_v30, %v2861_v14  ;;  %v2845_v14 = vmul.f32 %v2731_v42, %v5962_v47 }
 0x3cd   :  { %v2877_v26 = vadd.f32 %v2876_v40, %v2875_v2  ;;  %v2885_v53 = vrot.slane %v2884_v52, 4  ;;  %v2833_v6 = vmul.f32 %v2808_v15, %v6906_v56  ;;  %v2737_v27 = vpop.f32.mrf.mxu1  ;;  %v2910_v58 = vsel %vm2161_vm0, %v2840_v33, 0.0  ;;  %v6916_v56 = vld [vmem:[#allocation71_spill] sm:$0xff] }
 0x3ce   :  { %v3583_v24 = vpop.f32.mrf.mxu0  ;;  %v2872_v28 = vadd.f32 %v2871_v41, %v2870_v10  ;;  %v2901_v17 = vadd.f32 %v2900_v1, %v2846_v23  ;;  %v2852_v62 = vmul.f32 %v2737_v27, %v5971_v22  ;;  %v6912_v41 = vld [vmem:[#allocation65_spill] sm:$0xff]  ;;  %v6921_v33 = vld [vmem:[#allocation87_spill] sm:$0xff] }
 0x3cf   :  { %v2878_v55 = vrot.slane %v2877_v26, 2  ;;  %v2886_v12 = vadd.f32 %v2885_v53, %v2884_v52  ;;  %v2739_v49 = vpop.f32.mrf.mxu1  ;;  %v2909_v25 = vsel %vm2161_vm0, %v2833_v6, 0.0  ;;  %v2854_v10 = vmul.f32 %v3583_v24, %v6909_v13  ;;  %v6915_v53 = vld [vmem:[#allocation12_spill] sm:$0xff]  ;;  %v6918_v27 = vld [vmem:[#allocation61_spill] sm:$0xff] }
 0x3d0   :  { %v2853_v4 = vmul.f32 %v2739_v49, %v5950_v9  ;;  %v2818_v59 = vpop.f32.mrf.mxu0  ;;  %2989 = vmatprep.mubr.f32.mxu1 %v2872_v28  ;;  %v2911_v29 = vadd.f32 %v2910_v58, %v2909_v25  ;;  %v6923_v24 = vld [vmem:[#allocation20_spill] sm:$0xff]  ;;  %v6927_v49 = vld [vmem:[#allocation93_spill] sm:$0xff]  ;;  %v6935_v58 = vld [vmem:[#allocation98_spill] sm:$0xff] }
 0x3d1   :  { %v2879_v61 = vadd.f32 %v2878_v55, %v2877_v26  ;;  %v2887_v7 = vrot.slane %v2886_v12, 2  ;;  %v2847_v2 = vmul.f32 %v2818_v59, %v6908_v48  ;;  %2990 = vmatmul.mubr.f32.vlgmr.msra.gmra.mxu1 %v2863_v50  ;;  %v2914_v22 = vsel %vm2161_vm0, %v2854_v10, 0.0  ;;  %v6924_v55 = vld [vmem:[#allocation90_spill] sm:$0xff]  ;;  %v6930_v59 = vld [vmem:[#allocation95_spill] sm:$0xff]  ;;  %v6934_v48 = vld [vmem:[#allocation97_spill] sm:$0xff] }
 0x3d2   :  { %v2902_v0 = vadd.f32 %v2901_v17, %v2853_v4  ;;  %3482 = vmatpush3.msra.mxu1 %v5956_v57  ;;  %v2892_v57 = vadd.f32 %v2891_v8, %v2845_v14  ;;  %v6928_v17 = vld [vmem:[#allocation69_spill] sm:$0xff]  ;;  %v6929_v4 = vld [vmem:[#allocation94_spill] sm:$0xff] }
 0x3d3   :  { %v2912_v9 = vsel %vm2161_vm0, %v2847_v2, 0.0  ;;  %3483 = vmatprep.subr.mxu1 %v5964_v19  ;;  %v2888_v51 = vadd.f32 %v2887_v7, %v2886_v12  ;;  %v2880_v16 = vrot.slane %v2879_v61, 1  ;;  %v6926_v12 = vld [vmem:[#allocation92_spill] sm:$0xff]  ;;  %v6933_v7 = vld [vmem:[#allocation89_spill] sm:$0xff] }
 0x3d4   :  { %v2903_v30 = vrot.slane %v2902_v0, 4  ;;  %3484 = vmatpush3.msra.mxu1 %v5967_v21  ;;  %v2913_v47 = vadd.f32 %v2912_v9, %v2911_v29  ;;  %v2893_v11 = vadd.f32 %v2892_v57, %v2852_v62 }
 0x3d5   :  { %3485 = vmatprep.subr.mxu1 %v5975_v34  ;;  %v2889_v42 = vrot.slane %v2888_v51, 1  ;;  %v2881_v52 = vadd.f32 %v2880_v16, %v2879_v61  ;;  %v6932_v61 = vld [vmem:[#allocation96_spill] sm:$0xff] }
 0x3d6   :  { %v2904_v40 = vadd.f32 %v2903_v30, %v2902_v0  ;;  %3486 = vmatpush3.msra.mxu1 %v5982_v38  ;;  %v2915_v23 = vadd.f32 %v2914_v22, %v2913_v47  ;;  %v2894_v34 = vrot.slane %v2893_v11, 4  ;;  %v6910_v38 = vld [vmem:[#allocation23_spill] sm:$0xff] }
 0x3d7   :  { %3487 = vmatprep.subr.mxu1 %v5988_v43  ;;  %v2890_v19 = vadd.f32 %v2889_v42, %v2888_v51  ;;  %v6936_v0 = vld [vmem:[#allocation91_spill] sm:$0xff] }
 0x3d8   :  { %v2905_v44 = vrot.slane %v2904_v40, 2  ;;  %3488 = vmatpush3.msra.mxu1 %v5993_v20  ;;  %v2916_v15 = vrot.slane %v2915_v23, 4  ;;  %v6911_v20 = vld [vmem:[#allocation39_spill] sm:$0xff] }
 0x3d9   :  { %3059 = vmatprep.mubr.f32.mxu0 %v2890_v19  ;;  %3489 = vmatprep.subr.mxu1 %v5999_v35 }
 0x3da   :  { %3060 = vmatmul.mubr.f32.vlgmr.msra.gmra.mxu0 %v2881_v52  ;;  %3490 = vmatpush3.msra.mxu1 %v6003_v18  ;;  %v2906_v21 = vadd.f32 %v2905_v44, %v2904_v40  ;;  %v6913_v18 = vld [vmem:[#allocation18_spill] sm:$0xff]  ;;  %v2917_v26 = vadd.f32 %v2916_v15, %v2915_v23 }
 0x3db   :  { %3585 = vmatpush3.msra.mxu0 %v5958_v54  ;;  %3491 = vmatprep.subr.mxu1 %v6009_v31  ;;  %v6914_v54 = vld [vmem:[#allocation48_spill] sm:$0xff]  ;;  %v2895_v31 = vadd.f32 %v2894_v34, %v2893_v11 }
 0x3dc   :  { %3586 = vmatprep.subr.mxu0 %v6729_v60  ;;  %3492 = vmatpush3.msra.mxu1 %v6910_v38  ;;  %v2907_v43 = vrot.slane %v2906_v21, 1  ;;  %v2918_v1 = vrot.slane %v2917_v26, 2 }
 0x3dd   :  { %3587 = vmatpush3.msra.mxu0 %v6911_v20  ;;  %3493 = vmatprep.subr.mxu1 %v6912_v41  ;;  %v2896_v6 = vrot.slane %v2895_v31, 2 }
 0x3de   :  { %3588 = vmatprep.subr.mxu0 %v6729_v60  ;;  %3494 = vmatpush3.msra.mxu1 %v6023_v36  ;;  %v2908_v35 = vadd.f32 %v2907_v43, %v2906_v21  ;;  %v6917_v36 = vld [vmem:[#allocation34_spill] sm:$0xff]  ;;  %v2919_v50 = vadd.f32 %v2918_v1, %v2917_v26 }
 0x3df   :  { %3589 = vmatpush3.msra.mxu0 %v6913_v18  ;;  %3495 = vmatprep.subr.mxu1 %v6914_v54  ;;  %v2897_v28 = vadd.f32 %v2896_v6, %v2895_v31 }
 0x3e0   :  { %3590 = vmatprep.subr.mxu0 %v6729_v60  ;;  %3496 = vmatpush3.msra.mxu1 %v6033_v45  ;;  %v6920_v45 = vld [vmem:[#allocation14_spill] sm:$0xff] }
 0x3e1   :  { %3591 = vmatpush3.msra.mxu0 %v6915_v53  ;;  %3497 = vmatprep.subr.mxu1 %v6039_v63  ;;  %v6922_v63 = vld [vmem:[#allocation88_spill] sm:$0xff]  ;;  %v2898_v25 = vrot.slane %v2897_v28, 1 }
 0x3e2   :  { %3129 = vmatprep.mubr.f32.mxu1 %v2908_v35  ;;  %3592 = vmatprep.subr.mxu0 %v6729_v60 }
 0x3e3   :  { %3498 = vmatpush3.msra.mxu1 %v6916_v56  ;;  %3593 = vmatpush3.msra.mxu0 %v6917_v36  ;;  %v2899_v2 = vadd.f32 %v2898_v25, %v2897_v28 }
 0x3e4   :  { %3499 = vmatprep.subr.mxu1 %v6918_v27  ;;  %3594 = vmatprep.subr.mxu0 %v6729_v60 }
 0x3e5   :  { %3500 = vmatpush3.msra.mxu1 %v6919_v3  ;;  %3595 = vmatpush3.msra.mxu0 %v6920_v45 }
 0x3e6   :  { %3501 = vmatprep.subr.mxu1 %v6921_v33  ;;  %3596 = vmatprep.subr.mxu0 %v6729_v60 }
 0x3e7   :  { %3502 = vmatpush3.msra.mxu1 %v6922_v63  ;;  %3597 = vmatpush3.msra.mxu0 %v6923_v24 }
 0x3e8   :  { %3503 = vmatprep.subr.mxu1 %v6068_v32  ;;  %3598 = vmatprep.subr.mxu0 %v6729_v60  ;;  %v2920_v32 = vrot.slane %v2919_v50, 1 }
 0x3e9   :  { %3504 = vmatpush3.msra.mxu1 %v6924_v55  ;;  %3599 = vmatpush3.msra.mxu0 %v6925_v46 }
 0x3ea   :  { %3505 = vmatprep.subr.mxu1 %v6926_v12  ;;  %3600 = vmatprep.subr.mxu0 %v6729_v60  ;;  %v2921_v14 = vadd.f32 %v2920_v32, %v2919_v50 }
 0x3eb   :  { %3506 = vmatpush3.msra.mxu1 %v6927_v49  ;;  %3601 = vmatpush3.msra.mxu0 %v6928_v17 }
 0x3ec   :  { %3507 = vmatprep.subr.mxu1 %v6929_v4  ;;  %3602 = vmatprep.subr.mxu0 %v6729_v60 }
 0x3ed   :  { %3508 = vmatpush3.msra.mxu1 %v6930_v59  ;;  %3603 = vmatpush3.msra.mxu0 %v6931_v39 }
 0x3ee   :  { %3509 = vmatprep.subr.mxu1 %v6097_v5  ;;  %3604 = vmatprep.subr.mxu0 %v6729_v60 }
 0x3ef   :  { %3510 = vmatpush3.msra.mxu1 %v6932_v61  ;;  %3605 = vmatpush3.msra.mxu0 %v6933_v7 }
 0x3f0   :  { %3511 = vmatprep.subr.mxu1 %v6934_v48  ;;  %3606 = vmatprep.subr.mxu0 %v6729_v60 }
 0x3f1   :  { %3512 = vmatpush3.msra.mxu1 %v6935_v58  ;;  %3607 = vmatpush3.msra.mxu0 %v6936_v0 }
 0x3f2   :  { %3608 = vmatprep.mubr.msk.f32.mxu0 %vm4032_vm1, %v6729_v60  ;;  %3130 = vmatmul.mubr.f32.vlgmr.msra.gmra.mxu1 %v2899_v2 }
 0x3f3   :  { %3609 = vmatmul.mubr.msk.f32.vlgmr.msra.gmra.mxu0 %vm2161_vm0, %v2921_v14 }
 0x491   :  { %v3443_v5 = vpop.f32.mrf.mxu1 }
 0x493   :  { %v3444_v29 = vpop.f32.mrf.mxu1 }
 0x494   :  { %v3445_v51 = vadd.f32 %v3444_v29, %v3443_v5 }
 0x496   :  { %v2992_v13 = vadd.f32 %v3445_v51, %v6224_v37 }
 0x49a   :  { %v3478_v8 = vpop.f32.mrf.mxu0 }
 0x49c   :  { %v3479_v9 = vpop.f32.mrf.mxu0 }
 0x49d   :  { %v3480_v16 = vadd.f32 %v3479_v9, %v3478_v8 }
 0x49f   :  { %v3062_v47 = vadd.f32 %v3480_v16, %v2992_v13 }
 0x4b2   :  { %v3513_v62 = vpop.f32.mrf.mxu1 }
 0x4b3   :  { %v3201_v10 = vpop.f32.mrf.mxu0 }
 0x4b4   :  { %v3514_v30 = vpop.f32.mrf.mxu1 }
 0x4b5   :  { %v3515_v42 = vadd.f32 %v3514_v30, %v3513_v62  ;;  %v3610_v57 = vpop.f32.mrf.mxu0 }
 0x4b7   :  { %v3132_v60 = vadd.f32 %v3515_v42, %v3062_v47 }
 0x4b9   :  { %v3202_v40 = vadd.f32 %v3201_v10, %v3132_v60 }
 0x4bb   :  { %3205 = vst [vmem:[#allocation8 + $0x1] sm:$0x1] %v3202_v40 }
 0x4bc   :  { %3984 = shalt.err (!%p3981_p5)
}
 0x4bd   :  { %3215 = dma.vmem_to_hbm [thread:$0]  %s3213_s11, 32, %s6328_s8, [#allocation4]  }
 0x4be   :  { %3997 = dma.done.wait [#allocation4], 32  }
 0x4bf   :  { %3998 = vsyncadd [#allocation4], 4294967264 }
 0x4c0   :  { %3219 = vsyncpa [#allocation3], 1 }
 0x4c1   :  { %3220 = vsyncpa [#allocation6], 1 }
 0x4c2   :  { %3221 = vsyncpa [#allocation4], 1 }

</bundles_post_ra>
